<compile_context>
chip_gen: v7x
topology: tpu7x:2x2x1
jax: 0.10.0
libtpu: 0.0.40
codegen_flags: <defaults>
</compile_context>

<pallas_src>
import functools

import numpy as np
import jax
import jax.numpy as jnp
from jax import lax
from jax.experimental import pallas as pl
from jax.experimental.pallas import tpu as pltpu


# --------------------- fused PGD attack (one pallas_call) -------------------
def _fused_pgd_kernel(x_ref, t_ref, w_ref, wt_ref, b_ref, bx_ref, y_ref, *,
                      step_size, eps, inv_bo, iterations, compare_with_init):
    x0 = x_ref[...]                      # (tb, D) f32  -- also the orig_input
    w = w_ref[...]                       # (D, O)
    wt = wt_ref[...]                     # (O, D)  pre-transposed weight
    b = b_ref[...]                       # (1, O)
    t = t_ref[...]                       # (tb, O)

    # initial forward + per-example loss (needed for restart get_best)
    y0 = jnp.dot(x0, w, preferred_element_type=jnp.float32) + b
    d0 = y0 - t
    loss0 = jnp.sum(d0 * d0, axis=1, keepdims=True)          # (tb, 1)

    def pgd_iter(xc):
        # forward
        y = jnp.dot(xc, w, preferred_element_type=jnp.float32) + b
        # dL/dy for L = mean((y - t)^2) over ALL batch*O elements
        dy = (2.0 * inv_bo) * (y - t)
        # dL/dx = dy @ W^T  (uses the resident pre-transposed weight)
        g = jnp.dot(dy, wt, preferred_element_type=jnp.float32)   # (tb, D)
        # L2Step.step: x + step_size * g / (||g||_2 + 1e-10)
        g_norm = jnp.sqrt(jnp.sum(g * g, axis=1, keepdims=True))
        xc = xc + g * (step_size / (g_norm + 1e-10))
        # L2Step.project: diff.renorm(p=2, maxnorm=eps) around orig_input
        diff = xc - x0
        d_norm = jnp.sqrt(jnp.sum(diff * diff, axis=1, keepdims=True))
        scale = jnp.where(d_norm > eps, eps / (d_norm + 1e-7), 1.0)
        return x0 + diff * scale

    x_adv = x0
    for _ in range(iterations):          # static trip count -> fully unrolled
        x_adv = pgd_iter(x_adv)

    # final forward + per-example loss
    y_adv = jnp.dot(x_adv, w, preferred_element_type=jnp.float32) + b
    da = y_adv - t
    loss_adv = jnp.sum(da * da, axis=1, keepdims=True)        # (tb, 1)

    if compare_with_init:
        # AttackerStep.get_best: keep the higher-loss example per row.
        # (all restarts are identical with random_start=False, so applying it
        #  once equals applying it `random_restarts` times)
        replace = loss0 < loss_adv
        bx_ref[...] = jnp.where(replace, x_adv, x0)
        y_ref[...] = jnp.where(replace, y_adv, y0)
    else:
        bx_ref[...] = x_adv
        y_ref[...] = y_adv


# ------------------------ plain linear forward (no attack) ------------------
def _linear_kernel(x_ref, w_ref, b_ref, y_ref):
    y_ref[...] = (jnp.dot(x_ref[...], w_ref[...],
                          preferred_element_type=jnp.float32) + b_ref[...])


def _linear_forward(x_flat, w, b):
    B = x_flat.shape[0]
    O = w.shape[1]
    vmem = pl.BlockSpec(memory_space=pltpu.MemorySpace.VMEM)
    return pl.pallas_call(
        _linear_kernel,
        out_shape=jax.ShapeDtypeStruct((B, O), jnp.float32),
        in_specs=[vmem, vmem, vmem],
        out_specs=vmem,
    )(x_flat, w, b)


# ------------------------------ AttackerModel.forward -----------------------
@functools.partial(jax.jit, static_argnames=("make_adv", "eps", "step_size",
                                             "iterations", "random_restarts"))
def attacker_model_forward(x, target, w, b, *, make_adv=True, eps=0.1,
                           step_size=0.1, iterations=10, random_restarts=5):
    """Matches AttackerModel.forward with constraint='2', random_start=False,
    use_best=False, restart_use_best=True (module defaults)."""
    B = x.shape[0]
    x_flat = x.reshape(B, -1).astype(jnp.float32)
    D = x_flat.shape[1]
    O = w.shape[1]

    if not make_adv:
        return x, _linear_forward(x_flat, w, b)

    w_t = jnp.transpose(w)               # transpose ONCE in the wrapper
    inv_bo = 1.0 / float(B * O)          # MSELoss mean over all elements

    tb = B                               # one batch tile at these shapes
    grid = (pl.cdiv(B, tb),)

    kern = functools.partial(
        _fused_pgd_kernel,
        step_size=float(step_size), eps=float(eps), inv_bo=inv_bo,
        iterations=int(iterations),
        compare_with_init=bool(random_restarts))

    best_x, y_best = pl.pallas_call(
        kern,
        out_shape=(jax.ShapeDtypeStruct((B, D), jnp.float32),
                   jax.ShapeDtypeStruct((B, O), jnp.float32)),
        grid=grid,
        in_specs=[pl.BlockSpec((tb, D), lambda i: (i, 0)),   # x / orig_input
                  pl.BlockSpec((tb, O), lambda i: (i, 0)),   # target
                  pl.BlockSpec((D, O), lambda i: (0, 0)),    # w   (resident)
                  pl.BlockSpec((O, D), lambda i: (0, 0)),    # w^T (resident)
                  pl.BlockSpec((1, O), lambda i: (0, 0))],   # bias
        out_specs=(pl.BlockSpec((tb, D), lambda i: (i, 0)),
                   pl.BlockSpec((tb, O), lambda i: (i, 0))),
        compiler_params=pltpu.CompilerParams(
            dimension_semantics=("parallel",)),
    )(x_flat, target, w, w_t, b)

    return best_x.reshape(x.shape), y_best


# ----------------------------- pure-JAX reference ---------------------------
def ref_forward(x, target, w, b, eps, step_size, iterations, random_restarts):
    B = x.shape[0]
    x_flat = x.reshape(B, -1)
    model = lambda xf: xf @ w + b
    loss_fn = lambda xf: (model(xf) - target) ** 2
    grad_fn = jax.grad(lambda xf: jnp.mean(loss_fn(xf)))
    orig = x_flat
    best_x, best_loss = x_flat, loss_fn(x_flat)
    for _ in range(random_restarts):
        xc = x_flat
        for _ in range(iterations):
            g = grad_fn(xc)
            gn = jnp.linalg.norm(g, axis=1, keepdims=True)
            xc = xc + step_size * g / (gn + 1e-10)
            diff = xc - orig
            dn = jnp.linalg.norm(diff, axis=1, keepdims=True)
            xc = orig + diff * jnp.where(dn > eps, eps / (dn + 1e-7), 1.0)
        la = loss_fn(xc)
        repl = (jnp.sum(best_loss, axis=1, keepdims=True)
                < jnp.sum(la, axis=1, keepdims=True))
        best_x = jnp.where(repl, xc, best_x)
        best_loss = jnp.where(repl, la, best_loss)
    return best_x.reshape(x.shape), model(best_x)


if __name__ == "__main__":
    B, C, H, W_sp = 2, 4, 16, 16
    D, O = C * H * W_sp, 32

    key = jax.random.PRNGKey(0)
    kx, kt, kw, kb = jax.random.split(key, 4)
    x = jax.random.normal(kx, (B, C, H, W_sp), jnp.float32)
    target = jax.random.normal(kt, (B, O), jnp.float32)
    w = jax.random.normal(kw, (D, O), jnp.float32) * 0.02   # deterministic params
    b = jax.random.normal(kb, (1, O), jnp.float32) * 0.01

    adv_x, y = attacker_model_forward(x, target, w, b, make_adv=True,
                                      eps=0.1, step_size=0.1,
                                      iterations=10, random_restarts=5)
    adv_x = jax.block_until_ready(adv_x)
    y = jax.block_until_ready(y)

    ref_adv, ref_y = ref_forward(x, target, w, b, 0.1, 0.1, 10, 5)
    np.testing.assert_allclose(np.asarray(adv_x), np.asarray(ref_adv),
                               rtol=1e-2, atol=1e-2)
    np.testing.assert_allclose(np.asarray(y), np.asarray(ref_y),
                               rtol=1e-2, atol=1e-2)

    # also exercise the make_adv=False path
    clean_x, clean_y = attacker_model_forward(x, target, w, b, make_adv=False)
    clean_y = jax.block_until_ready(clean_y)
    np.testing.assert_allclose(np.asarray(clean_y),
                               np.asarray(x.reshape(B, -1) @ w + b),
                               rtol=1e-2, atol=1e-2)

    print("KERNEL_OK")
</pallas_src>

<mosaic_0001>
module attributes {stable_mosaic.version = 11 : i64} {
  func.func @_fused_pgd_kernel(%arg0: i32, %arg1: memref<2x1024xf32, #tpu.memory_space<vmem>>, %arg2: memref<2x32xf32, #tpu.memory_space<vmem>>, %arg3: memref<1024x32xf32, #tpu.memory_space<vmem>>, %arg4: memref<32x1024xf32, #tpu.memory_space<vmem>>, %arg5: memref<1x32xf32, #tpu.memory_space<vmem>>, %arg6: memref<2x1024xf32, #tpu.memory_space<vmem>>, %arg7: memref<2x32xf32, #tpu.memory_space<vmem>>) attributes {dimension_semantics = [#tpu.dimension_semantics<parallel>], iteration_bounds = array<i64: 1>, scalar_prefetch = 0 : i64, scratch_operands = 0 : i64, tpu.core_type = #tpu.core_type<tc>, window_params = [{transform_indices = @transform_0, window_bounds = array<i64: 2, 1024>}, {transform_indices = @transform_1, window_bounds = array<i64: 2, 32>}, {pipeline_mode = #tpu.pipeline_mode<synchronous>, transform_indices = @transform_2, window_bounds = array<i64: 1024, 32>}, {pipeline_mode = #tpu.pipeline_mode<synchronous>, transform_indices = @transform_3, window_bounds = array<i64: 32, 1024>}, {pipeline_mode = #tpu.pipeline_mode<synchronous>, transform_indices = @transform_4, window_bounds = array<i64: 1, 32>}, {transform_indices = @transform_5, window_bounds = array<i64: 2, 1024>}, {transform_indices = @transform_6, window_bounds = array<i64: 2, 32>}]} {
    %c0 = arith.constant 0 : index
    %c0_0 = arith.constant 0 : index
    %0 = vector.load %arg1[%c0, %c0_0] : memref<2x1024xf32, #tpu.memory_space<vmem>>, vector<2x1024xf32>
    %c0_1 = arith.constant 0 : index
    %c0_2 = arith.constant 0 : index
    %1 = vector.load %arg3[%c0_1, %c0_2] : memref<1024x32xf32, #tpu.memory_space<vmem>>, vector<1024x32xf32>
    %c0_3 = arith.constant 0 : index
    %c0_4 = arith.constant 0 : index
    %2 = vector.load %arg4[%c0_3, %c0_4] : memref<32x1024xf32, #tpu.memory_space<vmem>>, vector<32x1024xf32>
    %c0_5 = arith.constant 0 : index
    %c0_6 = arith.constant 0 : index
    %3 = vector.load %arg5[%c0_5, %c0_6] : memref<1x32xf32, #tpu.memory_space<vmem>>, vector<1x32xf32>
    %c0_7 = arith.constant 0 : index
    %c0_8 = arith.constant 0 : index
    %4 = vector.load %arg2[%c0_7, %c0_8] : memref<2x32xf32, #tpu.memory_space<vmem>>, vector<2x32xf32>
    %cst = arith.constant dense<0.000000e+00> : vector<2x32xf32>
    %5 = tpu.matmul %0, %1, %cst {dimension_numbers = #tpu.dot_dimension_numbers<[1], [0], [0], [1], [0, 0, 1, 1], [], []>} : vector<2x1024xf32>, vector<1024x32xf32>, vector<2x32xf32> -> vector<2x32xf32>
    %6 = vector.broadcast %3 : vector<1x32xf32> to vector<2x32xf32>
    %7 = arith.addf %5, %6 : vector<2x32xf32>
    %8 = arith.subf %7, %4 : vector<2x32xf32>
    %9 = arith.mulf %8, %8 : vector<2x32xf32>
    %cst_9 = arith.constant dense<0.000000e+00> : vector<2xf32>
    %10 = vector.multi_reduction <add>, %9, %cst_9 [1] : vector<2x32xf32> to vector<2xf32>
    %11 = vector.shape_cast %10 : vector<2xf32> to vector<2x1xf32>
    %cst_10 = arith.constant dense<0.000000e+00> : vector<2x32xf32>
    %12 = tpu.matmul %0, %1, %cst_10 {dimension_numbers = #tpu.dot_dimension_numbers<[1], [0], [0], [1], [0, 0, 1, 1], [], []>} : vector<2x1024xf32>, vector<1024x32xf32>, vector<2x32xf32> -> vector<2x32xf32>
    %13 = vector.broadcast %3 : vector<1x32xf32> to vector<2x32xf32>
    %14 = arith.addf %12, %13 : vector<2x32xf32>
    %15 = arith.subf %14, %4 : vector<2x32xf32>
    %cst_11 = arith.constant 3.125000e-02 : f32
    %16 = vector.broadcast %cst_11 : f32 to vector<2x32xf32>
    %17 = arith.mulf %16, %15 : vector<2x32xf32>
    %cst_12 = arith.constant dense<0.000000e+00> : vector<2x1024xf32>
    %18 = tpu.matmul %17, %2, %cst_12 {dimension_numbers = #tpu.dot_dimension_numbers<[1], [0], [0], [1], [0, 0, 1, 1], [], []>} : vector<2x32xf32>, vector<32x1024xf32>, vector<2x1024xf32> -> vector<2x1024xf32>
    %19 = arith.mulf %18, %18 : vector<2x1024xf32>
    %cst_13 = arith.constant dense<0.000000e+00> : vector<2xf32>
    %20 = vector.multi_reduction <add>, %19, %cst_13 [1] : vector<2x1024xf32> to vector<2xf32>
    %21 = vector.shape_cast %20 : vector<2xf32> to vector<2x1xf32>
    %22 = math.sqrt %21 : vector<2x1xf32>
    %cst_14 = arith.constant 1.000000e-10 : f32
    %23 = vector.broadcast %cst_14 : f32 to vector<2x1xf32>
    %24 = arith.addf %22, %23 : vector<2x1xf32>
    %cst_15 = arith.constant 1.000000e-01 : f32
    %25 = vector.broadcast %cst_15 : f32 to vector<2x1xf32>
    %26 = arith.divf %25, %24 : vector<2x1xf32>
    %27 = vector.broadcast %26 : vector<2x1xf32> to vector<2x1024xf32>
    %28 = arith.mulf %18, %27 : vector<2x1024xf32>
    %29 = arith.addf %0, %28 : vector<2x1024xf32>
    %30 = arith.subf %29, %0 : vector<2x1024xf32>
    %31 = arith.mulf %30, %30 : vector<2x1024xf32>
    %cst_16 = arith.constant dense<0.000000e+00> : vector<2xf32>
    %32 = vector.multi_reduction <add>, %31, %cst_16 [1] : vector<2x1024xf32> to vector<2xf32>
    %33 = vector.shape_cast %32 : vector<2xf32> to vector<2x1xf32>
    %34 = math.sqrt %33 : vector<2x1xf32>
    %cst_17 = arith.constant 1.000000e-01 : f32
    %35 = vector.broadcast %cst_17 : f32 to vector<2x1xf32>
    %36 = arith.cmpf ogt, %34, %35 : vector<2x1xf32>
    %cst_18 = arith.constant 1.000000e-07 : f32
    %37 = vector.broadcast %cst_18 : f32 to vector<2x1xf32>
    %38 = arith.addf %34, %37 : vector<2x1xf32>
    %cst_19 = arith.constant 1.000000e-01 : f32
    %39 = vector.broadcast %cst_19 : f32 to vector<2x1xf32>
    %40 = arith.divf %39, %38 : vector<2x1xf32>
    %cst_20 = arith.constant 1.000000e+00 : f32
    %41 = vector.broadcast %cst_20 : f32 to vector<2x1xf32>
    %42 = arith.select %36, %40, %41 : vector<2x1xi1>, vector<2x1xf32>
    %43 = vector.broadcast %42 : vector<2x1xf32> to vector<2x1024xf32>
    %44 = arith.mulf %30, %43 : vector<2x1024xf32>
    %45 = arith.addf %0, %44 : vector<2x1024xf32>
    %cst_21 = arith.constant dense<0.000000e+00> : vector<2x32xf32>
    %46 = tpu.matmul %45, %1, %cst_21 {dimension_numbers = #tpu.dot_dimension_numbers<[1], [0], [0], [1], [0, 0, 1, 1], [], []>} : vector<2x1024xf32>, vector<1024x32xf32>, vector<2x32xf32> -> vector<2x32xf32>
    %47 = vector.broadcast %3 : vector<1x32xf32> to vector<2x32xf32>
    %48 = arith.addf %46, %47 : vector<2x32xf32>
    %49 = arith.subf %48, %4 : vector<2x32xf32>
    %cst_22 = arith.constant 3.125000e-02 : f32
    %50 = vector.broadcast %cst_22 : f32 to vector<2x32xf32>
    %51 = arith.mulf %50, %49 : vector<2x32xf32>
    %cst_23 = arith.constant dense<0.000000e+00> : vector<2x1024xf32>
    %52 = tpu.matmul %51, %2, %cst_23 {dimension_numbers = #tpu.dot_dimension_numbers<[1], [0], [0], [1], [0, 0, 1, 1], [], []>} : vector<2x32xf32>, vector<32x1024xf32>, vector<2x1024xf32> -> vector<2x1024xf32>
    %53 = arith.mulf %52, %52 : vector<2x1024xf32>
    %cst_24 = arith.constant dense<0.000000e+00> : vector<2xf32>
    %54 = vector.multi_reduction <add>, %53, %cst_24 [1] : vector<2x1024xf32> to vector<2xf32>
    %55 = vector.shape_cast %54 : vector<2xf32> to vector<2x1xf32>
    %56 = math.sqrt %55 : vector<2x1xf32>
    %cst_25 = arith.constant 1.000000e-10 : f32
    %57 = vector.broadcast %cst_25 : f32 to vector<2x1xf32>
    %58 = arith.addf %56, %57 : vector<2x1xf32>
    %cst_26 = arith.constant 1.000000e-01 : f32
    %59 = vector.broadcast %cst_26 : f32 to vector<2x1xf32>
    %60 = arith.divf %59, %58 : vector<2x1xf32>
    %61 = vector.broadcast %60 : vector<2x1xf32> to vector<2x1024xf32>
    %62 = arith.mulf %52, %61 : vector<2x1024xf32>
    %63 = arith.addf %45, %62 : vector<2x1024xf32>
    %64 = arith.subf %63, %0 : vector<2x1024xf32>
    %65 = arith.mulf %64, %64 : vector<2x1024xf32>
    %cst_27 = arith.constant dense<0.000000e+00> : vector<2xf32>
    %66 = vector.multi_reduction <add>, %65, %cst_27 [1] : vector<2x1024xf32> to vector<2xf32>
    %67 = vector.shape_cast %66 : vector<2xf32> to vector<2x1xf32>
    %68 = math.sqrt %67 : vector<2x1xf32>
    %cst_28 = arith.constant 1.000000e-01 : f32
    %69 = vector.broadcast %cst_28 : f32 to vector<2x1xf32>
    %70 = arith.cmpf ogt, %68, %69 : vector<2x1xf32>
    %cst_29 = arith.constant 1.000000e-07 : f32
    %71 = vector.broadcast %cst_29 : f32 to vector<2x1xf32>
    %72 = arith.addf %68, %71 : vector<2x1xf32>
    %cst_30 = arith.constant 1.000000e-01 : f32
    %73 = vector.broadcast %cst_30 : f32 to vector<2x1xf32>
    %74 = arith.divf %73, %72 : vector<2x1xf32>
    %cst_31 = arith.constant 1.000000e+00 : f32
    %75 = vector.broadcast %cst_31 : f32 to vector<2x1xf32>
    %76 = arith.select %70, %74, %75 : vector<2x1xi1>, vector<2x1xf32>
    %77 = vector.broadcast %76 : vector<2x1xf32> to vector<2x1024xf32>
    %78 = arith.mulf %64, %77 : vector<2x1024xf32>
    %79 = arith.addf %0, %78 : vector<2x1024xf32>
    %cst_32 = arith.constant dense<0.000000e+00> : vector<2x32xf32>
    %80 = tpu.matmul %79, %1, %cst_32 {dimension_numbers = #tpu.dot_dimension_numbers<[1], [0], [0], [1], [0, 0, 1, 1], [], []>} : vector<2x1024xf32>, vector<1024x32xf32>, vector<2x32xf32> -> vector<2x32xf32>
    %81 = vector.broadcast %3 : vector<1x32xf32> to vector<2x32xf32>
    %82 = arith.addf %80, %81 : vector<2x32xf32>
    %83 = arith.subf %82, %4 : vector<2x32xf32>
    %cst_33 = arith.constant 3.125000e-02 : f32
    %84 = vector.broadcast %cst_33 : f32 to vector<2x32xf32>
    %85 = arith.mulf %84, %83 : vector<2x32xf32>
    %cst_34 = arith.constant dense<0.000000e+00> : vector<2x1024xf32>
    %86 = tpu.matmul %85, %2, %cst_34 {dimension_numbers = #tpu.dot_dimension_numbers<[1], [0], [0], [1], [0, 0, 1, 1], [], []>} : vector<2x32xf32>, vector<32x1024xf32>, vector<2x1024xf32> -> vector<2x1024xf32>
    %87 = arith.mulf %86, %86 : vector<2x1024xf32>
    %cst_35 = arith.constant dense<0.000000e+00> : vector<2xf32>
    %88 = vector.multi_reduction <add>, %87, %cst_35 [1] : vector<2x1024xf32> to vector<2xf32>
    %89 = vector.shape_cast %88 : vector<2xf32> to vector<2x1xf32>
    %90 = math.sqrt %89 : vector<2x1xf32>
    %cst_36 = arith.constant 1.000000e-10 : f32
    %91 = vector.broadcast %cst_36 : f32 to vector<2x1xf32>
    %92 = arith.addf %90, %91 : vector<2x1xf32>
    %cst_37 = arith.constant 1.000000e-01 : f32
    %93 = vector.broadcast %cst_37 : f32 to vector<2x1xf32>
    %94 = arith.divf %93, %92 : vector<2x1xf32>
    %95 = vector.broadcast %94 : vector<2x1xf32> to vector<2x1024xf32>
    %96 = arith.mulf %86, %95 : vector<2x1024xf32>
    %97 = arith.addf %79, %96 : vector<2x1024xf32>
    %98 = arith.subf %97, %0 : vector<2x1024xf32>
    %99 = arith.mulf %98, %98 : vector<2x1024xf32>
    %cst_38 = arith.constant dense<0.000000e+00> : vector<2xf32>
    %100 = vector.multi_reduction <add>, %99, %cst_38 [1] : vector<2x1024xf32> to vector<2xf32>
    %101 = vector.shape_cast %100 : vector<2xf32> to vector<2x1xf32>
    %102 = math.sqrt %101 : vector<2x1xf32>
    %cst_39 = arith.constant 1.000000e-01 : f32
    %103 = vector.broadcast %cst_39 : f32 to vector<2x1xf32>
    %104 = arith.cmpf ogt, %102, %103 : vector<2x1xf32>
    %cst_40 = arith.constant 1.000000e-07 : f32
    %105 = vector.broadcast %cst_40 : f32 to vector<2x1xf32>
    %106 = arith.addf %102, %105 : vector<2x1xf32>
    %cst_41 = arith.constant 1.000000e-01 : f32
    %107 = vector.broadcast %cst_41 : f32 to vector<2x1xf32>
    %108 = arith.divf %107, %106 : vector<2x1xf32>
    %cst_42 = arith.constant 1.000000e+00 : f32
    %109 = vector.broadcast %cst_42 : f32 to vector<2x1xf32>
    %110 = arith.select %104, %108, %109 : vector<2x1xi1>, vector<2x1xf32>
    %111 = vector.broadcast %110 : vector<2x1xf32> to vector<2x1024xf32>
    %112 = arith.mulf %98, %111 : vector<2x1024xf32>
    %113 = arith.addf %0, %112 : vector<2x1024xf32>
    %cst_43 = arith.constant dense<0.000000e+00> : vector<2x32xf32>
    %114 = tpu.matmul %113, %1, %cst_43 {dimension_numbers = #tpu.dot_dimension_numbers<[1], [0], [0], [1], [0, 0, 1, 1], [], []>} : vector<2x1024xf32>, vector<1024x32xf32>, vector<2x32xf32> -> vector<2x32xf32>
    %115 = vector.broadcast %3 : vector<1x32xf32> to vector<2x32xf32>
    %116 = arith.addf %114, %115 : vector<2x32xf32>
    %117 = arith.subf %116, %4 : vector<2x32xf32>
    %cst_44 = arith.constant 3.125000e-02 : f32
    %118 = vector.broadcast %cst_44 : f32 to vector<2x32xf32>
    %119 = arith.mulf %118, %117 : vector<2x32xf32>
    %cst_45 = arith.constant dense<0.000000e+00> : vector<2x1024xf32>
    %120 = tpu.matmul %119, %2, %cst_45 {dimension_numbers = #tpu.dot_dimension_numbers<[1], [0], [0], [1], [0, 0, 1, 1], [], []>} : vector<2x32xf32>, vector<32x1024xf32>, vector<2x1024xf32> -> vector<2x1024xf32>
    %121 = arith.mulf %120, %120 : vector<2x1024xf32>
    %cst_46 = arith.constant dense<0.000000e+00> : vector<2xf32>
    %122 = vector.multi_reduction <add>, %121, %cst_46 [1] : vector<2x1024xf32> to vector<2xf32>
    %123 = vector.shape_cast %122 : vector<2xf32> to vector<2x1xf32>
    %124 = math.sqrt %123 : vector<2x1xf32>
    %cst_47 = arith.constant 1.000000e-10 : f32
    %125 = vector.broadcast %cst_47 : f32 to vector<2x1xf32>
    %126 = arith.addf %124, %125 : vector<2x1xf32>
    %cst_48 = arith.constant 1.000000e-01 : f32
    %127 = vector.broadcast %cst_48 : f32 to vector<2x1xf32>
    %128 = arith.divf %127, %126 : vector<2x1xf32>
    %129 = vector.broadcast %128 : vector<2x1xf32> to vector<2x1024xf32>
    %130 = arith.mulf %120, %129 : vector<2x1024xf32>
    %131 = arith.addf %113, %130 : vector<2x1024xf32>
    %132 = arith.subf %131, %0 : vector<2x1024xf32>
    %133 = arith.mulf %132, %132 : vector<2x1024xf32>
    %cst_49 = arith.constant dense<0.000000e+00> : vector<2xf32>
    %134 = vector.multi_reduction <add>, %133, %cst_49 [1] : vector<2x1024xf32> to vector<2xf32>
    %135 = vector.shape_cast %134 : vector<2xf32> to vector<2x1xf32>
    %136 = math.sqrt %135 : vector<2x1xf32>
    %cst_50 = arith.constant 1.000000e-01 : f32
    %137 = vector.broadcast %cst_50 : f32 to vector<2x1xf32>
    %138 = arith.cmpf ogt, %136, %137 : vector<2x1xf32>
    %cst_51 = arith.constant 1.000000e-07 : f32
    %139 = vector.broadcast %cst_51 : f32 to vector<2x1xf32>
    %140 = arith.addf %136, %139 : vector<2x1xf32>
    %cst_52 = arith.constant 1.000000e-01 : f32
    %141 = vector.broadcast %cst_52 : f32 to vector<2x1xf32>
    %142 = arith.divf %141, %140 : vector<2x1xf32>
    %cst_53 = arith.constant 1.000000e+00 : f32
    %143 = vector.broadcast %cst_53 : f32 to vector<2x1xf32>
    %144 = arith.select %138, %142, %143 : vector<2x1xi1>, vector<2x1xf32>
    %145 = vector.broadcast %144 : vector<2x1xf32> to vector<2x1024xf32>
    %146 = arith.mulf %132, %145 : vector<2x1024xf32>
    %147 = arith.addf %0, %146 : vector<2x1024xf32>
    %cst_54 = arith.constant dense<0.000000e+00> : vector<2x32xf32>
    %148 = tpu.matmul %147, %1, %cst_54 {dimension_numbers = #tpu.dot_dimension_numbers<[1], [0], [0], [1], [0, 0, 1, 1], [], []>} : vector<2x1024xf32>, vector<1024x32xf32>, vector<2x32xf32> -> vector<2x32xf32>
    %149 = vector.broadcast %3 : vector<1x32xf32> to vector<2x32xf32>
    %150 = arith.addf %148, %149 : vector<2x32xf32>
    %151 = arith.subf %150, %4 : vector<2x32xf32>
    %cst_55 = arith.constant 3.125000e-02 : f32
    %152 = vector.broadcast %cst_55 : f32 to vector<2x32xf32>
    %153 = arith.mulf %152, %151 : vector<2x32xf32>
    %cst_56 = arith.constant dense<0.000000e+00> : vector<2x1024xf32>
    %154 = tpu.matmul %153, %2, %cst_56 {dimension_numbers = #tpu.dot_dimension_numbers<[1], [0], [0], [1], [0, 0, 1, 1], [], []>} : vector<2x32xf32>, vector<32x1024xf32>, vector<2x1024xf32> -> vector<2x1024xf32>
    %155 = arith.mulf %154, %154 : vector<2x1024xf32>
    %cst_57 = arith.constant dense<0.000000e+00> : vector<2xf32>
    %156 = vector.multi_reduction <add>, %155, %cst_57 [1] : vector<2x1024xf32> to vector<2xf32>
    %157 = vector.shape_cast %156 : vector<2xf32> to vector<2x1xf32>
    %158 = math.sqrt %157 : vector<2x1xf32>
    %cst_58 = arith.constant 1.000000e-10 : f32
    %159 = vector.broadcast %cst_58 : f32 to vector<2x1xf32>
    %160 = arith.addf %158, %159 : vector<2x1xf32>
    %cst_59 = arith.constant 1.000000e-01 : f32
    %161 = vector.broadcast %cst_59 : f32 to vector<2x1xf32>
    %162 = arith.divf %161, %160 : vector<2x1xf32>
    %163 = vector.broadcast %162 : vector<2x1xf32> to vector<2x1024xf32>
    %164 = arith.mulf %154, %163 : vector<2x1024xf32>
    %165 = arith.addf %147, %164 : vector<2x1024xf32>
    %166 = arith.subf %165, %0 : vector<2x1024xf32>
    %167 = arith.mulf %166, %166 : vector<2x1024xf32>
    %cst_60 = arith.constant dense<0.000000e+00> : vector<2xf32>
    %168 = vector.multi_reduction <add>, %167, %cst_60 [1] : vector<2x1024xf32> to vector<2xf32>
    %169 = vector.shape_cast %168 : vector<2xf32> to vector<2x1xf32>
    %170 = math.sqrt %169 : vector<2x1xf32>
    %cst_61 = arith.constant 1.000000e-01 : f32
    %171 = vector.broadcast %cst_61 : f32 to vector<2x1xf32>
    %172 = arith.cmpf ogt, %170, %171 : vector<2x1xf32>
    %cst_62 = arith.constant 1.000000e-07 : f32
    %173 = vector.broadcast %cst_62 : f32 to vector<2x1xf32>
    %174 = arith.addf %170, %173 : vector<2x1xf32>
    %cst_63 = arith.constant 1.000000e-01 : f32
    %175 = vector.broadcast %cst_63 : f32 to vector<2x1xf32>
    %176 = arith.divf %175, %174 : vector<2x1xf32>
    %cst_64 = arith.constant 1.000000e+00 : f32
    %177 = vector.broadcast %cst_64 : f32 to vector<2x1xf32>
    %178 = arith.select %172, %176, %177 : vector<2x1xi1>, vector<2x1xf32>
    %179 = vector.broadcast %178 : vector<2x1xf32> to vector<2x1024xf32>
    %180 = arith.mulf %166, %179 : vector<2x1024xf32>
    %181 = arith.addf %0, %180 : vector<2x1024xf32>
    %cst_65 = arith.constant dense<0.000000e+00> : vector<2x32xf32>
    %182 = tpu.matmul %181, %1, %cst_65 {dimension_numbers = #tpu.dot_dimension_numbers<[1], [0], [0], [1], [0, 0, 1, 1], [], []>} : vector<2x1024xf32>, vector<1024x32xf32>, vector<2x32xf32> -> vector<2x32xf32>
    %183 = vector.broadcast %3 : vector<1x32xf32> to vector<2x32xf32>
    %184 = arith.addf %182, %183 : vector<2x32xf32>
    %185 = arith.subf %184, %4 : vector<2x32xf32>
    %cst_66 = arith.constant 3.125000e-02 : f32
    %186 = vector.broadcast %cst_66 : f32 to vector<2x32xf32>
    %187 = arith.mulf %186, %185 : vector<2x32xf32>
    %cst_67 = arith.constant dense<0.000000e+00> : vector<2x1024xf32>
    %188 = tpu.matmul %187, %2, %cst_67 {dimension_numbers = #tpu.dot_dimension_numbers<[1], [0], [0], [1], [0, 0, 1, 1], [], []>} : vector<2x32xf32>, vector<32x1024xf32>, vector<2x1024xf32> -> vector<2x1024xf32>
    %189 = arith.mulf %188, %188 : vector<2x1024xf32>
    %cst_68 = arith.constant dense<0.000000e+00> : vector<2xf32>
    %190 = vector.multi_reduction <add>, %189, %cst_68 [1] : vector<2x1024xf32> to vector<2xf32>
    %191 = vector.shape_cast %190 : vector<2xf32> to vector<2x1xf32>
    %192 = math.sqrt %191 : vector<2x1xf32>
    %cst_69 = arith.constant 1.000000e-10 : f32
    %193 = vector.broadcast %cst_69 : f32 to vector<2x1xf32>
    %194 = arith.addf %192, %193 : vector<2x1xf32>
    %cst_70 = arith.constant 1.000000e-01 : f32
    %195 = vector.broadcast %cst_70 : f32 to vector<2x1xf32>
    %196 = arith.divf %195, %194 : vector<2x1xf32>
    %197 = vector.broadcast %196 : vector<2x1xf32> to vector<2x1024xf32>
    %198 = arith.mulf %188, %197 : vector<2x1024xf32>
    %199 = arith.addf %181, %198 : vector<2x1024xf32>
    %200 = arith.subf %199, %0 : vector<2x1024xf32>
    %201 = arith.mulf %200, %200 : vector<2x1024xf32>
    %cst_71 = arith.constant dense<0.000000e+00> : vector<2xf32>
    %202 = vector.multi_reduction <add>, %201, %cst_71 [1] : vector<2x1024xf32> to vector<2xf32>
    %203 = vector.shape_cast %202 : vector<2xf32> to vector<2x1xf32>
    %204 = math.sqrt %203 : vector<2x1xf32>
    %cst_72 = arith.constant 1.000000e-01 : f32
    %205 = vector.broadcast %cst_72 : f32 to vector<2x1xf32>
    %206 = arith.cmpf ogt, %204, %205 : vector<2x1xf32>
    %cst_73 = arith.constant 1.000000e-07 : f32
    %207 = vector.broadcast %cst_73 : f32 to vector<2x1xf32>
    %208 = arith.addf %204, %207 : vector<2x1xf32>
    %cst_74 = arith.constant 1.000000e-01 : f32
    %209 = vector.broadcast %cst_74 : f32 to vector<2x1xf32>
    %210 = arith.divf %209, %208 : vector<2x1xf32>
    %cst_75 = arith.constant 1.000000e+00 : f32
    %211 = vector.broadcast %cst_75 : f32 to vector<2x1xf32>
    %212 = arith.select %206, %210, %211 : vector<2x1xi1>, vector<2x1xf32>
    %213 = vector.broadcast %212 : vector<2x1xf32> to vector<2x1024xf32>
    %214 = arith.mulf %200, %213 : vector<2x1024xf32>
    %215 = arith.addf %0, %214 : vector<2x1024xf32>
    %cst_76 = arith.constant dense<0.000000e+00> : vector<2x32xf32>
    %216 = tpu.matmul %215, %1, %cst_76 {dimension_numbers = #tpu.dot_dimension_numbers<[1], [0], [0], [1], [0, 0, 1, 1], [], []>} : vector<2x1024xf32>, vector<1024x32xf32>, vector<2x32xf32> -> vector<2x32xf32>
    %217 = vector.broadcast %3 : vector<1x32xf32> to vector<2x32xf32>
    %218 = arith.addf %216, %217 : vector<2x32xf32>
    %219 = arith.subf %218, %4 : vector<2x32xf32>
    %cst_77 = arith.constant 3.125000e-02 : f32
    %220 = vector.broadcast %cst_77 : f32 to vector<2x32xf32>
    %221 = arith.mulf %220, %219 : vector<2x32xf32>
    %cst_78 = arith.constant dense<0.000000e+00> : vector<2x1024xf32>
    %222 = tpu.matmul %221, %2, %cst_78 {dimension_numbers = #tpu.dot_dimension_numbers<[1], [0], [0], [1], [0, 0, 1, 1], [], []>} : vector<2x32xf32>, vector<32x1024xf32>, vector<2x1024xf32> -> vector<2x1024xf32>
    %223 = arith.mulf %222, %222 : vector<2x1024xf32>
    %cst_79 = arith.constant dense<0.000000e+00> : vector<2xf32>
    %224 = vector.multi_reduction <add>, %223, %cst_79 [1] : vector<2x1024xf32> to vector<2xf32>
    %225 = vector.shape_cast %224 : vector<2xf32> to vector<2x1xf32>
    %226 = math.sqrt %225 : vector<2x1xf32>
    %cst_80 = arith.constant 1.000000e-10 : f32
    %227 = vector.broadcast %cst_80 : f32 to vector<2x1xf32>
    %228 = arith.addf %226, %227 : vector<2x1xf32>
    %cst_81 = arith.constant 1.000000e-01 : f32
    %229 = vector.broadcast %cst_81 : f32 to vector<2x1xf32>
    %230 = arith.divf %229, %228 : vector<2x1xf32>
    %231 = vector.broadcast %230 : vector<2x1xf32> to vector<2x1024xf32>
    %232 = arith.mulf %222, %231 : vector<2x1024xf32>
    %233 = arith.addf %215, %232 : vector<2x1024xf32>
    %234 = arith.subf %233, %0 : vector<2x1024xf32>
    %235 = arith.mulf %234, %234 : vector<2x1024xf32>
    %cst_82 = arith.constant dense<0.000000e+00> : vector<2xf32>
    %236 = vector.multi_reduction <add>, %235, %cst_82 [1] : vector<2x1024xf32> to vector<2xf32>
    %237 = vector.shape_cast %236 : vector<2xf32> to vector<2x1xf32>
    %238 = math.sqrt %237 : vector<2x1xf32>
    %cst_83 = arith.constant 1.000000e-01 : f32
    %239 = vector.broadcast %cst_83 : f32 to vector<2x1xf32>
    %240 = arith.cmpf ogt, %238, %239 : vector<2x1xf32>
    %cst_84 = arith.constant 1.000000e-07 : f32
    %241 = vector.broadcast %cst_84 : f32 to vector<2x1xf32>
    %242 = arith.addf %238, %241 : vector<2x1xf32>
    %cst_85 = arith.constant 1.000000e-01 : f32
    %243 = vector.broadcast %cst_85 : f32 to vector<2x1xf32>
    %244 = arith.divf %243, %242 : vector<2x1xf32>
    %cst_86 = arith.constant 1.000000e+00 : f32
    %245 = vector.broadcast %cst_86 : f32 to vector<2x1xf32>
    %246 = arith.select %240, %244, %245 : vector<2x1xi1>, vector<2x1xf32>
    %247 = vector.broadcast %246 : vector<2x1xf32> to vector<2x1024xf32>
    %248 = arith.mulf %234, %247 : vector<2x1024xf32>
    %249 = arith.addf %0, %248 : vector<2x1024xf32>
    %cst_87 = arith.constant dense<0.000000e+00> : vector<2x32xf32>
    %250 = tpu.matmul %249, %1, %cst_87 {dimension_numbers = #tpu.dot_dimension_numbers<[1], [0], [0], [1], [0, 0, 1, 1], [], []>} : vector<2x1024xf32>, vector<1024x32xf32>, vector<2x32xf32> -> vector<2x32xf32>
    %251 = vector.broadcast %3 : vector<1x32xf32> to vector<2x32xf32>
    %252 = arith.addf %250, %251 : vector<2x32xf32>
    %253 = arith.subf %252, %4 : vector<2x32xf32>
    %cst_88 = arith.constant 3.125000e-02 : f32
    %254 = vector.broadcast %cst_88 : f32 to vector<2x32xf32>
    %255 = arith.mulf %254, %253 : vector<2x32xf32>
    %cst_89 = arith.constant dense<0.000000e+00> : vector<2x1024xf32>
    %256 = tpu.matmul %255, %2, %cst_89 {dimension_numbers = #tpu.dot_dimension_numbers<[1], [0], [0], [1], [0, 0, 1, 1], [], []>} : vector<2x32xf32>, vector<32x1024xf32>, vector<2x1024xf32> -> vector<2x1024xf32>
    %257 = arith.mulf %256, %256 : vector<2x1024xf32>
    %cst_90 = arith.constant dense<0.000000e+00> : vector<2xf32>
    %258 = vector.multi_reduction <add>, %257, %cst_90 [1] : vector<2x1024xf32> to vector<2xf32>
    %259 = vector.shape_cast %258 : vector<2xf32> to vector<2x1xf32>
    %260 = math.sqrt %259 : vector<2x1xf32>
    %cst_91 = arith.constant 1.000000e-10 : f32
    %261 = vector.broadcast %cst_91 : f32 to vector<2x1xf32>
    %262 = arith.addf %260, %261 : vector<2x1xf32>
    %cst_92 = arith.constant 1.000000e-01 : f32
    %263 = vector.broadcast %cst_92 : f32 to vector<2x1xf32>
    %264 = arith.divf %263, %262 : vector<2x1xf32>
    %265 = vector.broadcast %264 : vector<2x1xf32> to vector<2x1024xf32>
    %266 = arith.mulf %256, %265 : vector<2x1024xf32>
    %267 = arith.addf %249, %266 : vector<2x1024xf32>
    %268 = arith.subf %267, %0 : vector<2x1024xf32>
    %269 = arith.mulf %268, %268 : vector<2x1024xf32>
    %cst_93 = arith.constant dense<0.000000e+00> : vector<2xf32>
    %270 = vector.multi_reduction <add>, %269, %cst_93 [1] : vector<2x1024xf32> to vector<2xf32>
    %271 = vector.shape_cast %270 : vector<2xf32> to vector<2x1xf32>
    %272 = math.sqrt %271 : vector<2x1xf32>
    %cst_94 = arith.constant 1.000000e-01 : f32
    %273 = vector.broadcast %cst_94 : f32 to vector<2x1xf32>
    %274 = arith.cmpf ogt, %272, %273 : vector<2x1xf32>
    %cst_95 = arith.constant 1.000000e-07 : f32
    %275 = vector.broadcast %cst_95 : f32 to vector<2x1xf32>
    %276 = arith.addf %272, %275 : vector<2x1xf32>
    %cst_96 = arith.constant 1.000000e-01 : f32
    %277 = vector.broadcast %cst_96 : f32 to vector<2x1xf32>
    %278 = arith.divf %277, %276 : vector<2x1xf32>
    %cst_97 = arith.constant 1.000000e+00 : f32
    %279 = vector.broadcast %cst_97 : f32 to vector<2x1xf32>
    %280 = arith.select %274, %278, %279 : vector<2x1xi1>, vector<2x1xf32>
    %281 = vector.broadcast %280 : vector<2x1xf32> to vector<2x1024xf32>
    %282 = arith.mulf %268, %281 : vector<2x1024xf32>
    %283 = arith.addf %0, %282 : vector<2x1024xf32>
    %cst_98 = arith.constant dense<0.000000e+00> : vector<2x32xf32>
    %284 = tpu.matmul %283, %1, %cst_98 {dimension_numbers = #tpu.dot_dimension_numbers<[1], [0], [0], [1], [0, 0, 1, 1], [], []>} : vector<2x1024xf32>, vector<1024x32xf32>, vector<2x32xf32> -> vector<2x32xf32>
    %285 = vector.broadcast %3 : vector<1x32xf32> to vector<2x32xf32>
    %286 = arith.addf %284, %285 : vector<2x32xf32>
    %287 = arith.subf %286, %4 : vector<2x32xf32>
    %cst_99 = arith.constant 3.125000e-02 : f32
    %288 = vector.broadcast %cst_99 : f32 to vector<2x32xf32>
    %289 = arith.mulf %288, %287 : vector<2x32xf32>
    %cst_100 = arith.constant dense<0.000000e+00> : vector<2x1024xf32>
    %290 = tpu.matmul %289, %2, %cst_100 {dimension_numbers = #tpu.dot_dimension_numbers<[1], [0], [0], [1], [0, 0, 1, 1], [], []>} : vector<2x32xf32>, vector<32x1024xf32>, vector<2x1024xf32> -> vector<2x1024xf32>
    %291 = arith.mulf %290, %290 : vector<2x1024xf32>
    %cst_101 = arith.constant dense<0.000000e+00> : vector<2xf32>
    %292 = vector.multi_reduction <add>, %291, %cst_101 [1] : vector<2x1024xf32> to vector<2xf32>
    %293 = vector.shape_cast %292 : vector<2xf32> to vector<2x1xf32>
    %294 = math.sqrt %293 : vector<2x1xf32>
    %cst_102 = arith.constant 1.000000e-10 : f32
    %295 = vector.broadcast %cst_102 : f32 to vector<2x1xf32>
    %296 = arith.addf %294, %295 : vector<2x1xf32>
    %cst_103 = arith.constant 1.000000e-01 : f32
    %297 = vector.broadcast %cst_103 : f32 to vector<2x1xf32>
    %298 = arith.divf %297, %296 : vector<2x1xf32>
    %299 = vector.broadcast %298 : vector<2x1xf32> to vector<2x1024xf32>
    %300 = arith.mulf %290, %299 : vector<2x1024xf32>
    %301 = arith.addf %283, %300 : vector<2x1024xf32>
    %302 = arith.subf %301, %0 : vector<2x1024xf32>
    %303 = arith.mulf %302, %302 : vector<2x1024xf32>
    %cst_104 = arith.constant dense<0.000000e+00> : vector<2xf32>
    %304 = vector.multi_reduction <add>, %303, %cst_104 [1] : vector<2x1024xf32> to vector<2xf32>
    %305 = vector.shape_cast %304 : vector<2xf32> to vector<2x1xf32>
    %306 = math.sqrt %305 : vector<2x1xf32>
    %cst_105 = arith.constant 1.000000e-01 : f32
    %307 = vector.broadcast %cst_105 : f32 to vector<2x1xf32>
    %308 = arith.cmpf ogt, %306, %307 : vector<2x1xf32>
    %cst_106 = arith.constant 1.000000e-07 : f32
    %309 = vector.broadcast %cst_106 : f32 to vector<2x1xf32>
    %310 = arith.addf %306, %309 : vector<2x1xf32>
    %cst_107 = arith.constant 1.000000e-01 : f32
    %311 = vector.broadcast %cst_107 : f32 to vector<2x1xf32>
    %312 = arith.divf %311, %310 : vector<2x1xf32>
    %cst_108 = arith.constant 1.000000e+00 : f32
    %313 = vector.broadcast %cst_108 : f32 to vector<2x1xf32>
    %314 = arith.select %308, %312, %313 : vector<2x1xi1>, vector<2x1xf32>
    %315 = vector.broadcast %314 : vector<2x1xf32> to vector<2x1024xf32>
    %316 = arith.mulf %302, %315 : vector<2x1024xf32>
    %317 = arith.addf %0, %316 : vector<2x1024xf32>
    %cst_109 = arith.constant dense<0.000000e+00> : vector<2x32xf32>
    %318 = tpu.matmul %317, %1, %cst_109 {dimension_numbers = #tpu.dot_dimension_numbers<[1], [0], [0], [1], [0, 0, 1, 1], [], []>} : vector<2x1024xf32>, vector<1024x32xf32>, vector<2x32xf32> -> vector<2x32xf32>
    %319 = vector.broadcast %3 : vector<1x32xf32> to vector<2x32xf32>
    %320 = arith.addf %318, %319 : vector<2x32xf32>
    %321 = arith.subf %320, %4 : vector<2x32xf32>
    %cst_110 = arith.constant 3.125000e-02 : f32
    %322 = vector.broadcast %cst_110 : f32 to vector<2x32xf32>
    %323 = arith.mulf %322, %321 : vector<2x32xf32>
    %cst_111 = arith.constant dense<0.000000e+00> : vector<2x1024xf32>
    %324 = tpu.matmul %323, %2, %cst_111 {dimension_numbers = #tpu.dot_dimension_numbers<[1], [0], [0], [1], [0, 0, 1, 1], [], []>} : vector<2x32xf32>, vector<32x1024xf32>, vector<2x1024xf32> -> vector<2x1024xf32>
    %325 = arith.mulf %324, %324 : vector<2x1024xf32>
    %cst_112 = arith.constant dense<0.000000e+00> : vector<2xf32>
    %326 = vector.multi_reduction <add>, %325, %cst_112 [1] : vector<2x1024xf32> to vector<2xf32>
    %327 = vector.shape_cast %326 : vector<2xf32> to vector<2x1xf32>
    %328 = math.sqrt %327 : vector<2x1xf32>
    %cst_113 = arith.constant 1.000000e-10 : f32
    %329 = vector.broadcast %cst_113 : f32 to vector<2x1xf32>
    %330 = arith.addf %328, %329 : vector<2x1xf32>
    %cst_114 = arith.constant 1.000000e-01 : f32
    %331 = vector.broadcast %cst_114 : f32 to vector<2x1xf32>
    %332 = arith.divf %331, %330 : vector<2x1xf32>
    %333 = vector.broadcast %332 : vector<2x1xf32> to vector<2x1024xf32>
    %334 = arith.mulf %324, %333 : vector<2x1024xf32>
    %335 = arith.addf %317, %334 : vector<2x1024xf32>
    %336 = arith.subf %335, %0 : vector<2x1024xf32>
    %337 = arith.mulf %336, %336 : vector<2x1024xf32>
    %cst_115 = arith.constant dense<0.000000e+00> : vector<2xf32>
    %338 = vector.multi_reduction <add>, %337, %cst_115 [1] : vector<2x1024xf32> to vector<2xf32>
    %339 = vector.shape_cast %338 : vector<2xf32> to vector<2x1xf32>
    %340 = math.sqrt %339 : vector<2x1xf32>
    %cst_116 = arith.constant 1.000000e-01 : f32
    %341 = vector.broadcast %cst_116 : f32 to vector<2x1xf32>
    %342 = arith.cmpf ogt, %340, %341 : vector<2x1xf32>
    %cst_117 = arith.constant 1.000000e-07 : f32
    %343 = vector.broadcast %cst_117 : f32 to vector<2x1xf32>
    %344 = arith.addf %340, %343 : vector<2x1xf32>
    %cst_118 = arith.constant 1.000000e-01 : f32
    %345 = vector.broadcast %cst_118 : f32 to vector<2x1xf32>
    %346 = arith.divf %345, %344 : vector<2x1xf32>
    %cst_119 = arith.constant 1.000000e+00 : f32
    %347 = vector.broadcast %cst_119 : f32 to vector<2x1xf32>
    %348 = arith.select %342, %346, %347 : vector<2x1xi1>, vector<2x1xf32>
    %349 = vector.broadcast %348 : vector<2x1xf32> to vector<2x1024xf32>
    %350 = arith.mulf %336, %349 : vector<2x1024xf32>
    %351 = arith.addf %0, %350 : vector<2x1024xf32>
    %cst_120 = arith.constant dense<0.000000e+00> : vector<2x32xf32>
    %352 = tpu.matmul %351, %1, %cst_120 {dimension_numbers = #tpu.dot_dimension_numbers<[1], [0], [0], [1], [0, 0, 1, 1], [], []>} : vector<2x1024xf32>, vector<1024x32xf32>, vector<2x32xf32> -> vector<2x32xf32>
    %353 = vector.broadcast %3 : vector<1x32xf32> to vector<2x32xf32>
    %354 = arith.addf %352, %353 : vector<2x32xf32>
    %355 = arith.subf %354, %4 : vector<2x32xf32>
    %356 = arith.mulf %355, %355 : vector<2x32xf32>
    %cst_121 = arith.constant dense<0.000000e+00> : vector<2xf32>
    %357 = vector.multi_reduction <add>, %356, %cst_121 [1] : vector<2x32xf32> to vector<2xf32>
    %358 = vector.shape_cast %357 : vector<2xf32> to vector<2x1xf32>
    %359 = arith.cmpf olt, %11, %358 : vector<2x1xf32>
    %360 = vector.shape_cast %359 : vector<2x1xi1> to vector<2x1xi1>
    %361 = vector.broadcast %360 : vector<2x1xi1> to vector<2x1024xi1>
    %362 = arith.select %361, %351, %0 : vector<2x1024xi1>, vector<2x1024xf32>
    %c0_122 = arith.constant 0 : index
    %c0_123 = arith.constant 0 : index
    %363 = vector.load %arg6[%c0_122, %c0_123] : memref<2x1024xf32, #tpu.memory_space<vmem>>, vector<2x1024xf32>
    tpu.vector_store %arg6[%c0_122, %c0_123], %362 {strides = array<i32>} : memref<2x1024xf32, #tpu.memory_space<vmem>>, vector<2x1024xf32>,
    %364 = vector.shape_cast %359 : vector<2x1xi1> to vector<2x1xi1>
    %365 = vector.broadcast %364 : vector<2x1xi1> to vector<2x32xi1>
    %366 = arith.select %365, %354, %7 : vector<2x32xi1>, vector<2x32xf32>
    %c0_124 = arith.constant 0 : index
    %c0_125 = arith.constant 0 : index
    %367 = vector.load %arg7[%c0_124, %c0_125] : memref<2x32xf32, #tpu.memory_space<vmem>>, vector<2x32xf32>
    tpu.vector_store %arg7[%c0_124, %c0_125], %366 {strides = array<i32>} : memref<2x32xf32, #tpu.memory_space<vmem>>, vector<2x32xf32>,
    return
  }
  func.func @transform_0(%arg0: i32) -> (i32, i32) {
    %c0_i32 = arith.constant 0 : i32
    %c0_i32_0 = arith.constant 0 : i32
    return %arg0, %c0_i32 : i32, i32
  }
  func.func @transform_1(%arg0: i32) -> (i32, i32) {
    %c0_i32 = arith.constant 0 : i32
    %c0_i32_0 = arith.constant 0 : i32
    return %arg0, %c0_i32 : i32, i32
  }
  func.func @transform_2(%arg0: i32) -> (i32, i32) {
    %c0_i32 = arith.constant 0 : i32
    %c0_i32_0 = arith.constant 0 : i32
    %c0_i32_1 = arith.constant 0 : i32
    return %c0_i32, %c0_i32_0 : i32, i32
  }
  func.func @transform_3(%arg0: i32) -> (i32, i32) {
    %c0_i32 = arith.constant 0 : i32
    %c0_i32_0 = arith.constant 0 : i32
    %c0_i32_1 = arith.constant 0 : i32
    return %c0_i32, %c0_i32_0 : i32, i32
  }
  func.func @transform_4(%arg0: i32) -> (i32, i32) {
    %c0_i32 = arith.constant 0 : i32
    %c0_i32_0 = arith.constant 0 : i32
    %c0_i32_1 = arith.constant 0 : i32
    return %c0_i32, %c0_i32_0 : i32, i32
  }
  func.func @transform_5(%arg0: i32) -> (i32, i32) {
    %c0_i32 = arith.constant 0 : i32
    %c0_i32_0 = arith.constant 0 : i32
    return %arg0, %c0_i32 : i32, i32
  }
  func.func @transform_6(%arg0: i32) -> (i32, i32) {
    %c0_i32 = arith.constant 0 : i32
    %c0_i32_0 = arith.constant 0 : i32
    return %arg0, %c0_i32 : i32, i32
  }
}

</mosaic_0001>

<bundles_post_ra>
// kernel: attacker_model_forward.1
= control target key start
LH: loop header
LB: loop body
LE: loop exit
PB: predicated region body
PF: predicated region fallthrough
CT: control target
= control target key end

     0   :  { %v11959_v47 = vmov 1983009808   ;;  %v199_v49 = vlaneseq  ;;  %s14288_s0 = inlined_call_operand.vmem [shape: f32[2,1024], index: 0, kind: input, shape index: {}]   ;;  %s14289_s1 = inlined_call_operand.vmem [shape: f32[2,32], index: 1, kind: input, shape index: {}]   ;;  %s14290_s2 = inlined_call_operand.vmem [shape: f32[1024,32], index: 2, kind: input, shape index: {}]   ;;  %s14291_s3 = inlined_call_operand.vmem [shape: f32[32,1024], index: 3, kind: input, shape index: {}]   ;;  %s14292_s4 = inlined_call_operand.vmem [shape: f32[1,32], index: 4, kind: input, shape index: {}]   ;;  %s14293_s5 = inlined_call_operand.vmem [shape: f32[2,1024], index: 5, kind: output, shape index: {0}]   ;;  %s14294_s6 = inlined_call_operand.hbm [shape: f32[2,32], index: 6, kind: output, shape index: {1}]  }
   0x1   :  { %v41_v0 = vld [vmem:[%s14290_s2 + $0x80] sm:$0xff]  ;;  %v42_v1 = vld [vmem:[%s14290_s2 + $0x88] sm:$0xff]  ;;  %v43_v11 = vld [vmem:[%s14290_s2 + $0x90] sm:$0xff]  ;;  %v197_v48 = vunpack.c.l.s4 %v11959_v47 }
   0x2   :  { %v25_v2 = vld [vmem:[%s14290_s2] sm:$0xff]  ;;  %v12007_v3 = vpack.c.bf16 %v42_v1, %v41_v0  ;;  %v26_v4 = vld [vmem:[%s14290_s2 + $0x8] sm:$0xff]  ;;  %v44_v13 = vld [vmem:[%s14290_s2 + $0x98] sm:$0xff]  ;;  %v12174_v0 = vshrl.u32 %v199_v49, 7 }
   0x3   :  { %v73_v5 = vld [vmem:[%s14290_s2 + $0x180] sm:$0xff]  ;;  %v74_v6 = vld [vmem:[%s14290_s2 + $0x188] sm:$0xff]  ;;  %v12018_v7 = vpack.c.bf16 %v26_v4, %v25_v2  ;;  %v27_v14 = vld [vmem:[%s14290_s2 + $0x10] sm:$0xff]  ;;  %v12045_v16 = vpack.c.bf16 %v44_v13, %v43_v11  ;;  %v198_v63 = vunpack.c.0.s8 %v197_v48 }
   0x4   :  { %14473 = vst [vmem:[#allocation5_spill] sm:$0xff] %v12007_v3  ;;  %v12020_v8 = vpack.c.bf16 %v74_v6, %v73_v5  ;;  %v57_v9 = vld [vmem:[%s14290_s2 + $0x100] sm:$0xff]  ;;  %v58_v10 = vld [vmem:[%s14290_s2 + $0x108] sm:$0xff]  ;;  %10108 = vmatprep.subr.bf16.mxu0 %v12007_v3  ;;  %v28_v15 = vld [vmem:[%s14290_s2 + $0x18] sm:$0xff] }
   0x5   :  { %14474 = vst [vmem:[#allocation6_spill] sm:$0xff] %v12018_v7  ;;  %v12032_v12 = vpack.c.bf16 %v58_v10, %v57_v9  ;;  %10110 = vmatpush3.bf16.msra.mxu0 %v12018_v7  ;;  %14477 = vst [vmem:[#allocation9_spill] sm:$0xff] %v12045_v16  ;;  %v12047_v17 = vpack.c.bf16 %v28_v15, %v27_v14  ;;  %v75_v18 = vld [vmem:[%s14290_s2 + $0x190] sm:$0xff]  ;;  %v76_v19 = vld [vmem:[%s14290_s2 + $0x198] sm:$0xff] }
   0x6   :  { %14475 = vst [vmem:[#allocation7_spill] sm:$0xff] %v12020_v8  ;;  %10140 = vmatprep.subr.bf16.mxu1 %v12020_v8  ;;  %v59_v20 = vld [vmem:[%s14290_s2 + $0x110] sm:$0xff]  ;;  %v12059_v21 = vpack.c.bf16 %v76_v19, %v75_v18  ;;  %v60_v22 = vld [vmem:[%s14290_s2 + $0x118] sm:$0xff]  ;;  %v45_v23 = vld [vmem:[%s14290_s2 + $0xa0] sm:$0xff]  ;;  %10112 = vmatprep.subr.bf16.mxu0 %v12045_v16  ;;  %v12213_v19 = vsub.s32 %v198_v63, %v12174_v0 }
   0x7   :  { %14476 = vst [vmem:[#allocation8_spill] sm:$0xff] %v12032_v12  ;;  %14478 = vst [vmem:[#allocation10_spill] sm:$0xff] %v12047_v17  ;;  %10142 = vmatpush3.bf16.msra.mxu1 %v12032_v12  ;;  %v46_v24 = vld [vmem:[%s14290_s2 + $0xa8] sm:$0xff]  ;;  %v12071_v25 = vpack.c.bf16 %v60_v22, %v59_v20  ;;  %v29_v27 = vld [vmem:[%s14290_s2 + $0x20] sm:$0xff] }
   0x8   :  { %14479 = vst [vmem:[#allocation11_spill] sm:$0xff] %v12059_v21  ;;  %v12073_v26 = vpack.c.bf16 %v46_v24, %v45_v23  ;;  %v30_v28 = vld [vmem:[%s14290_s2 + $0x28] sm:$0xff]  ;;  %v77_v29 = vld [vmem:[%s14290_s2 + $0x1a0] sm:$0xff]  ;;  %10144 = vmatprep.subr.bf16.mxu1 %v12059_v21  ;;  %v47_v35 = vld [vmem:[%s14290_s2 + $0xb0] sm:$0xff] }
   0x9   :  { %14480 = vst [vmem:[#allocation12_spill] sm:$0xff] %v12071_v25  ;;  %v78_v30 = vld [vmem:[%s14290_s2 + $0x1a8] sm:$0xff]  ;;  %v61_v31 = vld [vmem:[%s14290_s2 + $0x120] sm:$0xff]  ;;  %10114 = vmatpush3.bf16.msra.mxu0 %v12047_v17  ;;  %v12095_v33 = vpack.c.bf16 %v30_v28, %v29_v27  ;;  %v48_v36 = vld [vmem:[%s14290_s2 + $0xb8] sm:$0xff] }
   0xa   :  { %14481 = vst [vmem:[#allocation13_spill] sm:$0xff] %v12073_v26  ;;  %v62_v32 = vld [vmem:[%s14290_s2 + $0x128] sm:$0xff]  ;;  %v12097_v34 = vpack.c.bf16 %v78_v30, %v77_v29  ;;  %v31_v37 = vld [vmem:[%s14290_s2 + $0x30] sm:$0xff]  ;;  %10116 = vmatprep.subr.bf16.mxu0 %v12073_v26  ;;  %v12112_v39 = vpack.c.bf16 %v48_v36, %v47_v35  ;;  %v32_v40 = vld [vmem:[%s14290_s2 + $0x38] sm:$0xff] }
   0xb   :  { %14482 = vst [vmem:[#allocation14_spill] sm:$0xff] %v12095_v33  ;;  %10146 = vmatpush3.bf16.msra.mxu1 %v12071_v25  ;;  %v12110_v38 = vpack.c.bf16 %v62_v32, %v61_v31  ;;  %v79_v41 = vld [vmem:[%s14290_s2 + $0x1b0] sm:$0xff]  ;;  %v80_v42 = vld [vmem:[%s14290_s2 + $0x1b8] sm:$0xff]  ;;  %v49_v46 = vld [vmem:[%s14290_s2 + $0xc0] sm:$0xff]  ;;  %v12139_v51 = vpack.c.bf16 %v32_v40, %v31_v37 }
   0xc   :  { %14483 = vst [vmem:[#allocation15_spill] sm:$0xff] %v12097_v34  ;;  %14485 = vst [vmem:[#allocation17_spill] sm:$0xff] %v12112_v39  ;;  %10148 = vmatprep.subr.bf16.mxu1 %v12097_v34  ;;  %v12124_v43 = vpack.c.bf16 %v80_v42, %v79_v41  ;;  %v63_v44 = vld [vmem:[%s14290_s2 + $0x130] sm:$0xff]  ;;  %v64_v45 = vld [vmem:[%s14290_s2 + $0x138] sm:$0xff] }
   0xd   :  { %14484 = vst [vmem:[#allocation16_spill] sm:$0xff] %v12110_v38  ;;  %v50_v50 = vld [vmem:[%s14290_s2 + $0xc8] sm:$0xff]  ;;  %10118 = vmatpush3.bf16.msra.mxu0 %v12095_v33  ;;  %14487 = vst [vmem:[#allocation19_spill] sm:$0xff] %v12139_v51  ;;  %v81_v52 = vld [vmem:[%s14290_s2 + $0x1c0] sm:$0xff]  ;;  %v12149_v54 = vpack.c.bf16 %v64_v45, %v63_v44 }
   0xe   :  { %14486 = vst [vmem:[#allocation18_spill] sm:$0xff] %v12124_v43  ;;  %v82_v53 = vld [vmem:[%s14290_s2 + $0x1c8] sm:$0xff]  ;;  %10120 = vmatprep.subr.bf16.mxu0 %v12112_v39  ;;  %v12151_v55 = vpack.c.bf16 %v50_v50, %v49_v46  ;;  %v33_v56 = vld [vmem:[%s14290_s2 + $0x40] sm:$0xff]  ;;  %v51_v61 = vld [vmem:[%s14290_s2 + $0xd0] sm:$0xff] }
   0xf   :  { %10150 = vmatpush3.bf16.msra.mxu1 %v12110_v38  ;;  %14488 = vst [vmem:[#allocation20_spill] sm:$0xff] %v12149_v54  ;;  %v34_v57 = vld [vmem:[%s14290_s2 + $0x48] sm:$0xff]  ;;  %v65_v58 = vld [vmem:[%s14290_s2 + $0x140] sm:$0xff]  ;;  %v12163_v59 = vpack.c.bf16 %v82_v53, %v81_v52  ;;  %v52_v62 = vld [vmem:[%s14290_s2 + $0xd8] sm:$0xff] }
  0x10   :  { %14489 = vst [vmem:[#allocation21_spill] sm:$0xff] %v12151_v55  ;;  %10152 = vmatprep.subr.bf16.mxu1 %v12124_v43  ;;  %v66_v60 = vld [vmem:[%s14290_s2 + $0x148] sm:$0xff]  ;;  %v83_v1 = vld [vmem:[%s14290_s2 + $0x1d0] sm:$0xff]  ;;  %v84_v2 = vld [vmem:[%s14290_s2 + $0x1d8] sm:$0xff]  ;;  %v12183_v4 = vpack.c.bf16 %v34_v57, %v33_v56  ;;  %v12189_v6 = vpack.c.bf16 %v52_v62, %v51_v61 }
  0x11   :  { %14490 = vst [vmem:[#allocation22_spill] sm:$0xff] %v12163_v59  ;;  %10122 = vmatpush3.bf16.msra.mxu0 %v12139_v51  ;;  %v12187_v5 = vpack.c.bf16 %v66_v60, %v65_v58  ;;  %v35_v9 = vld [vmem:[%s14290_s2 + $0x50] sm:$0xff]  ;;  %v36_v10 = vld [vmem:[%s14290_s2 + $0x58] sm:$0xff]  ;;  %v12201_v13 = vpack.c.bf16 %v84_v2, %v83_v1  ;;  %v53_v15 = vld [vmem:[%s14290_s2 + $0xe0] sm:$0xff] }
  0x12   :  { %14491 = vst [vmem:[#allocation23_spill] sm:$0xff] %v12183_v4  ;;  %10124 = vmatprep.subr.bf16.mxu0 %v12151_v55  ;;  %14493 = vst [vmem:[#allocation25_spill] sm:$0xff] %v12189_v6  ;;  %v67_v11 = vld [vmem:[%s14290_s2 + $0x150] sm:$0xff]  ;;  %v68_v14 = vld [vmem:[%s14290_s2 + $0x158] sm:$0xff]  ;;  %v12222_v23 = vpack.c.bf16 %v36_v10, %v35_v9 }
  0x13   :  { %10154 = vmatpush3.bf16.msra.mxu1 %v12149_v54  ;;  %14492 = vst [vmem:[#allocation24_spill] sm:$0xff] %v12187_v5  ;;  %14494 = vst [vmem:[#allocation26_spill] sm:$0xff] %v12201_v13  ;;  %v54_v18 = vld [vmem:[%s14290_s2 + $0xe8] sm:$0xff]  ;;  %v85_v20 = vld [vmem:[%s14290_s2 + $0x1e0] sm:$0xff]  ;;  %v12229_v27 = vpack.c.bf16 %v68_v14, %v67_v11 }
  0x14   :  { %10156 = vmatprep.subr.bf16.mxu1 %v12163_v59  ;;  %v86_v22 = vld [vmem:[%s14290_s2 + $0x1e8] sm:$0xff]  ;;  %14495 = vst [vmem:[#allocation27_spill] sm:$0xff] %v12222_v23  ;;  %v37_v24 = vld [vmem:[%s14290_s2 + $0x60] sm:$0xff]  ;;  %v12231_v28 = vpack.c.bf16 %v54_v18, %v53_v15  ;;  %v55_v36 = vld [vmem:[%s14290_s2 + $0xf0] sm:$0xff] }
  0x15   :  { %10126 = vmatpush3.bf16.msra.mxu0 %v12183_v4  ;;  %14496 = vst [vmem:[#allocation28_spill] sm:$0xff] %v12229_v27  ;;  %v38_v29 = vld [vmem:[%s14290_s2 + $0x68] sm:$0xff]  ;;  %v69_v30 = vld [vmem:[%s14290_s2 + $0x160] sm:$0xff]  ;;  %v12245_v32 = vpack.c.bf16 %v86_v22, %v85_v20  ;;  %v56_v37 = vld [vmem:[%s14290_s2 + $0xf8] sm:$0xff] }
  0x16   :  { %10128 = vmatprep.subr.bf16.mxu0 %v12189_v6  ;;  %14497 = vst [vmem:[#allocation29_spill] sm:$0xff] %v12231_v28  ;;  %v12242_v31 = vld [vmem:[%s14288_s0] sm:$0xff]  ;;  %v70_v35 = vld [vmem:[%s14290_s2 + $0x168] sm:$0xff]  ;;  %v87_v42 = vld [vmem:[%s14290_s2 + $0x1f0] sm:$0xff]  ;;  %v12269_v45 = vpack.c.bf16 %v38_v29, %v37_v24  ;;  %v12282_v49 = vpack.c.bf16 %v56_v37, %v55_v36 }
  0x17   :  { %10158 = vmatpush3.bf16.msra.mxu1 %v12187_v5  ;;  %14498 = vst [vmem:[#allocation30_spill] sm:$0xff] %v12245_v32  ;;  %v12258_v40 = vrot.slane %v12242_v31, %v12213_v19  ;;  %v195_v41 = vcombine.high %v12242_v31, %v12242_v31  ;;  %v88_v44 = vld [vmem:[%s14290_s2 + $0x1f8] sm:$0xff]  ;;  %v12280_v48 = vpack.c.bf16 %v70_v35, %v69_v30  ;;  %v39_v50 = vld [vmem:[%s14290_s2 + $0x70] sm:$0xff]  ;;  %v105_v58 = vld [vmem:[%s14290_s2 + $0x280] sm:$0xff] }
  0x18   :  { %10160 = vmatprep.subr.bf16.mxu1 %v12201_v13  ;;  %14500 = vst [vmem:[#allocation32_spill] sm:$0xff] %v12269_v45  ;;  %14504 = vst [vmem:[#allocation36_spill] sm:$0xff] %v12282_v49  ;;  %v40_v52 = vld [vmem:[%s14290_s2 + $0x78] sm:$0xff]  ;;  %v71_v53 = vld [vmem:[%s14290_s2 + $0x170] sm:$0xff]  ;;  %v12294_v56 = vpack.c.bf16 %v88_v44, %v87_v42 }
  0x19   :  { %14499 = vst [vmem:[#allocation31_spill] sm:$0xff] %v12258_v40  ;;  %10130 = vmatpush3.bf16.msra.mxu0 %v12222_v23  ;;  %v12273_v46 = vcombine.high %v12258_v40, %v12258_v40  ;;  %v12276_v47 = vrot.slane %v195_v41, %v12213_v19  ;;  %14503 = vst [vmem:[#allocation35_spill] sm:$0xff] %v12280_v48  ;;  %v72_v57 = vld [vmem:[%s14290_s2 + $0x178] sm:$0xff]  ;;  %v106_v60 = vld [vmem:[%s14290_s2 + $0x288] sm:$0xff]  ;;  %v12317_v1 = vpack.c.bf16 %v40_v52, %v39_v50 }
  0x1a   :  { %10132 = vmatprep.subr.bf16.mxu0 %v12231_v28  ;;  %14505 = vst [vmem:[#allocation37_spill] sm:$0xff] %v12294_v56  ;;  %v137_v62 = vld [vmem:[%s14290_s2 + $0x380] sm:$0xff]  ;;  %v138_v63 = vld [vmem:[%s14290_s2 + $0x388] sm:$0xff]  ;;  %v12322_v2 = vpack.c.bf16 %v72_v57, %v71_v53  ;;  %v12324_v9 = vpack.c.bf16 %v106_v60, %v105_v58  ;;  %v107_v20 = vld [vmem:[%s14290_s2 + $0x290] sm:$0xff] }
  0x1b   :  { %14501 = vst [vmem:[#allocation33_spill] sm:$0xff] %v12273_v46  ;;  %14502 = vst [vmem:[#allocation34_spill] sm:$0xff] %v12276_v47  ;;  %10162 = vmatpush3.bf16.msra.mxu1 %v12229_v27  ;;  %301 = vmatprep.mubr.f32.mxu0 %v12273_v46  ;;  %v12308_v61 = vcombine.high %v12276_v47, %v12276_v47  ;;  %v89_v10 = vld [vmem:[%s14290_s2 + $0x200] sm:$0xff]  ;;  %v90_v11 = vld [vmem:[%s14290_s2 + $0x208] sm:$0xff]  ;;  %v12336_v15 = vpack.c.bf16 %v138_v63, %v137_v62 }
  0x1c   :  { %10164 = vmatprep.subr.bf16.mxu1 %v12245_v32  ;;  %14507 = vst [vmem:[#allocation39_spill] sm:$0xff] %v12317_v1  ;;  %14508 = vst [vmem:[#allocation40_spill] sm:$0xff] %v12322_v2  ;;  %v121_v14 = vld [vmem:[%s14290_s2 + $0x300] sm:$0xff]  ;;  %v122_v18 = vld [vmem:[%s14290_s2 + $0x308] sm:$0xff]  ;;  %v12354_v30 = vpack.c.bf16 %v90_v11, %v89_v10 }
  0x1d   :  { %14506 = vst [vmem:[#allocation38_spill] sm:$0xff] %v12308_v61  ;;  %10134 = vmatpush3.bf16.msra.mxu0 %v12269_v45  ;;  %371 = vmatprep.mubr.f32.mxu1 %v12308_v61  ;;  %14509 = vst [vmem:[#allocation41_spill] sm:$0xff] %v12324_v9  ;;  %v108_v22 = vld [vmem:[%s14290_s2 + $0x298] sm:$0xff]  ;;  %v139_v24 = vld [vmem:[%s14290_s2 + $0x390] sm:$0xff]  ;;  %v12358_v35 = vpack.c.bf16 %v122_v18, %v121_v14 }
  0x1e   :  { %10136 = vmatprep.subr.bf16.mxu0 %v12282_v49  ;;  %14510 = vst [vmem:[#allocation42_spill] sm:$0xff] %v12336_v15  ;;  %v140_v29 = vld [vmem:[%s14290_s2 + $0x398] sm:$0xff]  ;;  %v12360_v36 = vpack.c.bf16 %v108_v22, %v107_v20  ;;  %v91_v37 = vld [vmem:[%s14290_s2 + $0x210] sm:$0xff]  ;;  %v109_v52 = vld [vmem:[%s14290_s2 + $0x2a0] sm:$0xff] }
  0x1f   :  { %10166 = vmatpush3.bf16.msra.mxu1 %v12280_v48  ;;  %v92_v41 = vld [vmem:[%s14290_s2 + $0x218] sm:$0xff]  ;;  %v123_v42 = vld [vmem:[%s14290_s2 + $0x310] sm:$0xff]  ;;  %v12372_v44 = vpack.c.bf16 %v140_v29, %v139_v24  ;;  %v110_v53 = vld [vmem:[%s14290_s2 + $0x2a8] sm:$0xff] }
  0x20   :  { %10168 = vmatprep.subr.bf16.mxu1 %v12294_v56  ;;  %v124_v50 = vld [vmem:[%s14290_s2 + $0x318] sm:$0xff]  ;;  %v141_v57 = vld [vmem:[%s14290_s2 + $0x3a0] sm:$0xff]  ;;  %v142_v58 = vld [vmem:[%s14290_s2 + $0x3a8] sm:$0xff]  ;;  %v12392_v60 = vpack.c.bf16 %v92_v41, %v91_v37  ;;  %v12398_v63 = vpack.c.bf16 %v110_v53, %v109_v52 }
  0x21   :  { %10138 = vmatpush3.bf16.msra.mxu0 %v12317_v1  ;;  %v12396_v62 = vpack.c.bf16 %v124_v50, %v123_v42  ;;  %v93_v10 = vld [vmem:[%s14290_s2 + $0x220] sm:$0xff]  ;;  %v94_v11 = vld [vmem:[%s14290_s2 + $0x228] sm:$0xff]  ;;  %v12410_v18 = vpack.c.bf16 %v142_v58, %v141_v57  ;;  %v111_v22 = vld [vmem:[%s14290_s2 + $0x2b0] sm:$0xff] }
  0x22   :  { %10172 = vmatprep.subr.bf16.mxu0 %v12324_v9  ;;  %v125_v14 = vld [vmem:[%s14290_s2 + $0x320] sm:$0xff]  ;;  %v126_v20 = vld [vmem:[%s14290_s2 + $0x328] sm:$0xff]  ;;  %v112_v24 = vld [vmem:[%s14290_s2 + $0x2b8] sm:$0xff]  ;;  %v12428_v41 = vpack.c.bf16 %v94_v11, %v93_v10 }
  0x23   :  { %10170 = vmatpush3.bf16.msra.mxu1 %v12322_v2  ;;  %14511 = vst [vmem:[#allocation43_spill] sm:$0xff] %v12410_v18  ;;  %v143_v29 = vld [vmem:[%s14290_s2 + $0x3b0] sm:$0xff]  ;;  %v144_v37 = vld [vmem:[%s14290_s2 + $0x3b8] sm:$0xff]  ;;  %v12435_v50 = vpack.c.bf16 %v126_v20, %v125_v14  ;;  %v12437_v52 = vpack.c.bf16 %v112_v24, %v111_v22  ;;  %v113_v11 = vld [vmem:[%s14290_s2 + $0x2c0] sm:$0xff] }
  0x24   :  { %10204 = vmatprep.subr.bf16.mxu1 %v12336_v15  ;;  %302 = vmatmul.mubr.f32.vlgmr.msra.gmra.mrb[0].mxu0 %v12258_v40  ;;  %14512 = vst [vmem:[#allocation44_spill] sm:$0xff] %v12428_v41  ;;  %v95_v42 = vld [vmem:[%s14290_s2 + $0x230] sm:$0xff]  ;;  %v96_v53 = vld [vmem:[%s14290_s2 + $0x238] sm:$0xff]  ;;  %v12449_v10 = vpack.c.bf16 %v144_v37, %v143_v29  ;;  %v114_v14 = vld [vmem:[%s14290_s2 + $0x2c8] sm:$0xff] }
  0x25   :  { %10174 = vmatpush3.bf16.msra.mxu0 %v12354_v30  ;;  %14513 = vst [vmem:[#allocation45_spill] sm:$0xff] %v12435_v50  ;;  %14514 = vst [vmem:[#allocation46_spill] sm:$0xff] %v12437_v52  ;;  %v127_v57 = vld [vmem:[%s14290_s2 + $0x330] sm:$0xff]  ;;  %v128_v58 = vld [vmem:[%s14290_s2 + $0x338] sm:$0xff] }
  0x26   :  { %372 = vmatmul.mubr.f32.vlgmr.msra.gmra.mrb[0].mxu1 %v12276_v47  ;;  %10176 = vmatprep.subr.bf16.mxu0 %v12360_v36  ;;  %14515 = vst [vmem:[#allocation47_spill] sm:$0xff] %v12449_v10  ;;  %v145_v20 = vld [vmem:[%s14290_s2 + $0x3c0] sm:$0xff]  ;;  %v146_v22 = vld [vmem:[%s14290_s2 + $0x3c8] sm:$0xff] }
  0x27   :  { %10206 = vmatpush3.bf16.msra.mxu1 %v12358_v35  ;;  %v12466_v24 = vld [vmem:[%s14288_s0 + $0x8] sm:$0xff] }
  0x28   :  { %10208 = vmatprep.subr.bf16.mxu1 %v12372_v44 }
  0x29   :  { %10178 = vmatpush3.bf16.msra.mxu0 %v12392_v60 }
  0x2a   :  { %10180 = vmatprep.subr.bf16.mxu0 %v12398_v63 }
  0x2b   :  { %10210 = vmatpush3.bf16.msra.mxu1 %v12396_v62 }
  0x2c   :  { %10212 = vmatprep.subr.bf16.mxu1 %v12410_v18 }
  0x2d   :  { %12 = vsyncpa [#allocation3], 0  ;;  %10182 = vmatpush3.bf16.msra.mxu0 %v12428_v41  ;;  %v12469_v29 = vpack.c.bf16 %v96_v53, %v95_v42  ;;  %v12473_v37 = vrot.slane %v12466_v24, %v12213_v19  ;;  %v212_v61 = vcombine.high %v12466_v24, %v12466_v24  ;;  %v12479_v47 = vpack.c.bf16 %v128_v58, %v127_v57  ;;  %v97_v42 = vld [vmem:[%s14290_s2 + $0x240] sm:$0xff]  ;;  %v98_v53 = vld [vmem:[%s14290_s2 + $0x248] sm:$0xff] }
  0x2e   :  { %10184 = vmatprep.subr.bf16.mxu0 %v12437_v52  ;;  %v12481_v46 = vpack.c.bf16 %v114_v14, %v113_v11  ;;  %v129_v40 = vld [vmem:[%s14290_s2 + $0x340] sm:$0xff]  ;;  %v130_v57 = vld [vmem:[%s14290_s2 + $0x348] sm:$0xff]  ;;  %v115_v58 = vld [vmem:[%s14290_s2 + $0x2d0] sm:$0xff]  ;;  %v12518_v52 = vpack.c.bf16 %v98_v53, %v97_v42  ;;  %vm524_vm0 = vcmask 261120   ;;  %vm820_vm1 = vcmask 1041408  }
  0x2f   :  { %14516 = vst [vmem:[#allocation48_spill] sm:$0xff] %v12469_v29  ;;  %14517 = vst [vmem:[#allocation49_spill] sm:$0xff] %v12473_v37  ;;  %10214 = vmatpush3.bf16.msra.mxu1 %v12435_v50  ;;  %v12493_v50 = vpack.c.bf16 %v146_v22, %v145_v20  ;;  %v116_v11 = vld [vmem:[%s14290_s2 + $0x2d8] sm:$0xff]  ;;  %v12506_v14 = vcombine.high %v12473_v37, %v12473_v37  ;;  %v147_v20 = vld [vmem:[%s14290_s2 + $0x3d0] sm:$0xff] }
  0x30   :  { %14518 = vst [vmem:[#allocation50_spill] sm:$0xff] %v12479_v47  ;;  %14519 = vst [vmem:[#allocation51_spill] sm:$0xff] %v12481_v46  ;;  %10216 = vmatprep.subr.bf16.mxu1 %v12449_v10  ;;  %v12509_v10 = vrot.slane %v212_v61, %v12213_v19  ;;  %v148_v22 = vld [vmem:[%s14290_s2 + $0x3d8] sm:$0xff]  ;;  %v12527_v61 = vpack.c.bf16 %v130_v57, %v129_v40  ;;  %v12529_v18 = vpack.c.bf16 %v116_v11, %v115_v58  ;;  %v131_v53 = vld [vmem:[%s14290_s2 + $0x350] sm:$0xff] }
  0x31   :  { %14520 = vst [vmem:[#allocation52_spill] sm:$0xff] %v12493_v50  ;;  %14521 = vst [vmem:[#allocation53_spill] sm:$0xff] %v12506_v14  ;;  %10186 = vmatpush3.bf16.msra.mxu0 %v12469_v29  ;;  %441 = vmatprep.mubr.f32.mxu0 %v12506_v14  ;;  %v99_v29 = vld [vmem:[%s14290_s2 + $0x250] sm:$0xff]  ;;  %v100_v42 = vld [vmem:[%s14290_s2 + $0x258] sm:$0xff]  ;;  %v12541_v14 = vpack.c.bf16 %v148_v22, %v147_v20 }
  0x32   :  { %14522 = vst [vmem:[#allocation54_spill] sm:$0xff] %v12509_v10  ;;  %14523 = vst [vmem:[#allocation55_spill] sm:$0xff] %v12518_v52  ;;  %v12523_v41 = vcombine.high %v12509_v10, %v12509_v10  ;;  %10188 = vmatprep.subr.bf16.mxu0 %v12481_v46  ;;  %v132_v40 = vld [vmem:[%s14290_s2 + $0x358] sm:$0xff]  ;;  %v117_v57 = vld [vmem:[%s14290_s2 + $0x2e0] sm:$0xff]  ;;  %v12560_v22 = vpack.c.bf16 %v100_v42, %v99_v29 }
  0x33   :  { %10218 = vmatpush3.bf16.msra.mxu1 %v12479_v47  ;;  %14525 = vst [vmem:[#allocation57_spill] sm:$0xff] %v12527_v61  ;;  %14526 = vst [vmem:[#allocation58_spill] sm:$0xff] %v12529_v18  ;;  %v118_v58 = vld [vmem:[%s14290_s2 + $0x2e8] sm:$0xff]  ;;  %v149_v11 = vld [vmem:[%s14290_s2 + $0x3e0] sm:$0xff] }
  0x34   :  { %14524 = vst [vmem:[#allocation56_spill] sm:$0xff] %v12523_v41  ;;  %10220 = vmatprep.subr.bf16.mxu1 %v12493_v50  ;;  %14527 = vst [vmem:[#allocation59_spill] sm:$0xff] %v12541_v14  ;;  %511 = vmatprep.mubr.f32.mxu1 %v12523_v41  ;;  %v150_v20 = vld [vmem:[%s14290_s2 + $0x3e8] sm:$0xff]  ;;  %v12564_v50 = vpack.c.bf16 %v132_v40, %v131_v53  ;;  %v12566_v47 = vpack.c.bf16 %v118_v58, %v117_v57  ;;  %v101_v41 = vld [vmem:[%s14290_s2 + $0x260] sm:$0xff] }
  0x35   :  { %10190 = vmatpush3.bf16.msra.mxu0 %v12518_v52  ;;  %14528 = vst [vmem:[#allocation60_spill] sm:$0xff] %v12560_v22  ;;  %v102_v46 = vld [vmem:[%s14290_s2 + $0x268] sm:$0xff]  ;;  %v133_v29 = vld [vmem:[%s14290_s2 + $0x360] sm:$0xff]  ;;  %v12578_v42 = vpack.c.bf16 %v150_v20, %v149_v11  ;;  %v119_v40 = vld [vmem:[%s14290_s2 + $0x2f0] sm:$0xff] }
  0x36   :  { %10192 = vmatprep.subr.bf16.mxu0 %v12529_v18  ;;  %14529 = vst [vmem:[#allocation61_spill] sm:$0xff] %v12564_v50  ;;  %14530 = vst [vmem:[#allocation62_spill] sm:$0xff] %v12566_v47  ;;  %v134_v53 = vld [vmem:[%s14290_s2 + $0x368] sm:$0xff]  ;;  %v120_v57 = vld [vmem:[%s14290_s2 + $0x2f8] sm:$0xff]  ;;  %v12596_v20 = vpack.c.bf16 %v102_v46, %v101_v41 }
  0x37   :  { %10222 = vmatpush3.bf16.msra.mxu1 %v12527_v61  ;;  %14531 = vst [vmem:[#allocation63_spill] sm:$0xff] %v12578_v42  ;;  %v151_v58 = vld [vmem:[%s14290_s2 + $0x3f0] sm:$0xff]  ;;  %v152_v11 = vld [vmem:[%s14290_s2 + $0x3f8] sm:$0xff]  ;;  %v12602_v61 = vpack.c.bf16 %v120_v57, %v119_v40 }
  0x38   :  { %10224 = vmatprep.subr.bf16.mxu1 %v12541_v14  ;;  %14532 = vst [vmem:[#allocation64_spill] sm:$0xff] %v12596_v20  ;;  %v12600_v14 = vpack.c.bf16 %v134_v53, %v133_v29  ;;  %v103_v18 = vld [vmem:[%s14290_s2 + $0x270] sm:$0xff]  ;;  %v104_v52 = vld [vmem:[%s14290_s2 + $0x278] sm:$0xff]  ;;  %v12611_v46 = vpack.c.bf16 %v152_v11, %v151_v58 }
  0x39   :  { %10194 = vmatpush3.bf16.msra.mxu0 %v12560_v22  ;;  %14534 = vst [vmem:[#allocation66_spill] sm:$0xff] %v12602_v61  ;;  %v135_v41 = vld [vmem:[%s14290_s2 + $0x370] sm:$0xff]  ;;  %v136_v29 = vld [vmem:[%s14290_s2 + $0x378] sm:$0xff]  ;;  %v12620_v53 = vpack.c.bf16 %v104_v52, %v103_v18  ;;  %v154_v18 = vld [vmem:[%s14291_s3 + $0x8] sm:$0xff] }
  0x3a   :  { %10196 = vmatprep.subr.bf16.mxu0 %v12566_v47  ;;  %14533 = vst [vmem:[#allocation65_spill] sm:$0xff] %v12600_v14  ;;  %14535 = vst [vmem:[#allocation67_spill] sm:$0xff] %v12611_v46  ;;  %v12624_v40 = vpack.c.bf16 %v136_v29, %v135_v41  ;;  %v162_v52 = vld [vmem:[%s14291_s3 + $0x48] sm:$0xff]  ;;  %v156_v57 = vld [vmem:[%s14291_s3 + $0x18] sm:$0xff] }
  0x3b   :  { %10226 = vmatpush3.bf16.msra.mxu1 %v12564_v50  ;;  %14536 = vst [vmem:[#allocation68_spill] sm:$0xff] %v12620_v53  ;;  %v12640_v58 = vpack.c.bf16 %v162_v52, %v154_v18  ;;  %v164_v11 = vld [vmem:[%s14291_s3 + $0x58] sm:$0xff]  ;;  %v153_v41 = vld [vmem:[%s14291_s3] sm:$0xff]  ;;  %v155_v18 = vld [vmem:[%s14291_s3 + $0x10] sm:$0xff] }
  0x3c   :  { %10228 = vmatprep.subr.bf16.mxu1 %v12578_v42  ;;  %14537 = vst [vmem:[#allocation69_spill] sm:$0xff] %v12624_v40  ;;  %v161_v29 = vld [vmem:[%s14291_s3 + $0x40] sm:$0xff]  ;;  %v163_v52 = vld [vmem:[%s14291_s3 + $0x50] sm:$0xff] }
  0x3d   :  { %10198 = vmatpush3.bf16.msra.mxu0 %v12596_v20  ;;  %14538 = vst [vmem:[#allocation70_spill] sm:$0xff] %v12640_v58  ;;  %v12732_v50 = vld [vmem:[%s14289_s1] sm:$0x3] }
  0x3e   :  { %10200 = vmatprep.subr.bf16.mxu0 %v12602_v61 }
  0x3f   :  { %10230 = vmatpush3.bf16.msra.mxu1 %v12600_v14 }
  0x40   :  { %10232 = vmatprep.subr.bf16.mxu1 %v12611_v46 }
  0x41   :  { %10202 = vmatpush3.bf16.msra.mxu0 %v12620_v53  ;;  %v160_v53 = vld [vmem:[%s14291_s3 + $0x38] sm:$0xff] }
  0x42   :  { %10236 = vmatprep.subr.bf16.mxu0 %v12640_v58 }
  0x43   :  { %10234 = vmatpush3.bf16.msra.mxu1 %v12624_v40  ;;  %v12662_v40 = vpack.c.bf16 %v163_v52, %v155_v18  ;;  %v180_v18 = vld [vmem:[%s14291_s3 + $0xd8] sm:$0xff]  ;;  %v169_v52 = vld [vmem:[%s14291_s3 + $0x80] sm:$0xff] }
  0x44   :  { %442 = vmatmul.mubr.f32.vlgmr.msra.gmra.mrb[2].mxu0 %v12473_v37  ;;  %v12653_v37 = vpack.c.bf16 %v161_v29, %v153_v41  ;;  %v172_v29 = vld [vmem:[%s14291_s3 + $0x98] sm:$0xff] }
  0x45   :  { %14541 = vst [vmem:[#allocation73_spill] sm:$0xff] %v12662_v40 }
  0x46   :  { %512 = vmatmul.mubr.f32.vlgmr.msra.gmra.mrb[2].mxu1 %v12509_v10  ;;  %v12651_v10 = vpack.c.bf16 %v164_v11, %v156_v57  ;;  %14540 = vst [vmem:[#allocation72_spill] sm:$0xff] %v12653_v37  ;;  %10238 = vmatpush1.bf16.msra.mxu0 %v12653_v37  ;;  %v170_v57 = vld [vmem:[%s14291_s3 + $0x88] sm:$0xff]  ;;  %v12684_v37 = vpack.c.bf16 %v180_v18, %v172_v29 }
  0x47   :  { %v178_v11 = vld [vmem:[%s14291_s3 + $0xc8] sm:$0xff] }
  0x48   :  { %14539 = vst [vmem:[#allocation71_spill] sm:$0xff] %v12651_v10  ;;  %10244 = vmatprep.subr.bf16.mxu1 %v12651_v10  ;;  %v12673_v41 = vpack.c.bf16 %v178_v11, %v170_v57  ;;  %14543 = vst [vmem:[#allocation75_spill] sm:$0xff] %v12684_v37  ;;  %v171_v57 = vld [vmem:[%s14291_s3 + $0x90] sm:$0xff]  ;;  %v158_v29 = vld [vmem:[%s14291_s3 + $0x28] sm:$0xff] }
  0x49   :  { %10246 = vmatpush1.bf16.msra.mxu1 %v12662_v40  ;;  %v177_v40 = vld [vmem:[%s14291_s3 + $0xc0] sm:$0xff]  ;;  %v179_v11 = vld [vmem:[%s14291_s3 + $0xd0] sm:$0xff]  ;;  %v166_v18 = vld [vmem:[%s14291_s3 + $0x68] sm:$0xff] }
  0x4a   :  { %14542 = vst [vmem:[#allocation74_spill] sm:$0xff] %v12673_v41  ;;  %10240 = vmatprep.subr.bf16.mxu0 %v12673_v41  ;;  %v12696_v10 = vpack.c.bf16 %v177_v40, %v169_v52  ;;  %v12698_v58 = vpack.c.bf16 %v179_v11, %v171_v57  ;;  %10248 = vmatprep.subr.bf16.mxu1 %v12684_v37  ;;  %v168_v52 = vld [vmem:[%s14291_s3 + $0x78] sm:$0xff]  ;;  %v14353_v11 = vmov 0.0  }
  0x4b   :  { %v12712_v40 = vpack.c.bf16 %v166_v18, %v158_v29  ;;  %v12717_v57 = vpack.c.bf16 %v168_v52, %v160_v53  ;;  %592 = vmatprep.mubr.f32.mxu0 %v14353_v11  ;;  %663 = vmatprep.mubr.f32.mxu1 %v14353_v11  ;;  %v12726_v29 = vld [vmem:[%s14292_s4] ss:$0 sm:$0xff] }
  0x4c   :  { %14544 = vst [vmem:[#allocation76_spill] sm:$0xff] %v12696_v10  ;;  %14545 = vst [vmem:[#allocation77_spill] sm:$0xff] %v12698_v58  ;;  %10242 = vmatpush1.bf16.msra.mxu0 %v12696_v10 }
  0x4d   :  { %10250 = vmatpush1.bf16.msra.mxu1 %v12698_v58  ;;  %14546 = vst [vmem:[#allocation78_spill] sm:$0xff] %v12712_v40  ;;  %14547 = vst [vmem:[#allocation79_spill] sm:$0xff] %v12717_v57  ;;  %10252 = vmatprep.subr.bf16.mxu0 %v12712_v40 }
  0x4e   :  { %10260 = vmatprep.subr.bf16.mxu1 %v12717_v57  ;;  %14548 = vst [vmem:[#allocation80_spill] sm:$0xff] %v12726_v29 }
  0xf7   :  { %v8599_v10 = vpop.f32.mrb[0].mxu0 }
  0xf8   :  { %v8600_v18 = vpop.f32.mrb[1].mxu0 }
  0xf9   :  { %v8634_v58 = vpop.f32.mrb[0].mxu1  ;;  %v8601_v37 = vadd.f32 %v8600_v18, %v8599_v10  ;;  %v157_v10 = vld [vmem:[%s14291_s3 + $0x20] sm:$0xff] }
  0xfa   :  { %v8635_v53 = vpop.f32.mrb[1].mxu1  ;;  %v173_v18 = vld [vmem:[%s14291_s3 + $0xa0] sm:$0xff] }
  0xfb   :  { %v8636_v52 = vadd.f32 %v8635_v53, %v8634_v58  ;;  %v304_v41 = vadd.f32 %v8601_v37, %v12726_v29  ;;  %v165_v37 = vld [vmem:[%s14291_s3 + $0x60] sm:$0xff] }
  0xfd   :  { %v374_v46 = vadd.f32 %v8636_v52, %v304_v41  ;;  %v184_v41 = vld [vmem:[%s14291_s3 + $0xf8] sm:$0xff] }
 0x117   :  { %v8669_v14 = vpop.f32.mrb[2].mxu0 }
 0x118   :  { %v8670_v11 = vpop.f32.mrb[3].mxu0 }
 0x119   :  { %v8704_v61 = vpop.f32.mrb[2].mxu1  ;;  %v8671_v40 = vadd.f32 %v8670_v11, %v8669_v14  ;;  %v159_v14 = vld [vmem:[%s14291_s3 + $0x30] sm:$0xff] }
 0x11a   :  { %v8705_v20 = vpop.f32.mrb[3].mxu1 }
 0x11b   :  { %v8706_v57 = vadd.f32 %v8705_v20, %v8704_v61  ;;  %v444_v42 = vadd.f32 %v8671_v40, %v374_v46  ;;  %v167_v61 = vld [vmem:[%s14291_s3 + $0x70] sm:$0xff]  ;;  %v174_v20 = vld [vmem:[%s14291_s3 + $0xa8] sm:$0xff] }
 0x11c   :  { %v182_v46 = vld [vmem:[%s14291_s3 + $0xe8] sm:$0xff]  ;;  %v12766_v11 = vpack.c.bf16 %v167_v61, %v159_v14 }
 0x11d   :  { %v12740_v58 = vadd.f32 %v8706_v57, %v444_v42  ;;  %v176_v42 = vld [vmem:[%s14291_s3 + $0xb8] sm:$0xff]  ;;  %v12764_v57 = vpack.c.bf16 %v165_v37, %v157_v10  ;;  %v12772_v52 = vpack.c.bf16 %v182_v46, %v174_v20  ;;  %v175_v10 = vld [vmem:[%s14291_s3 + $0xb0] sm:$0xff]  ;;  %v14557_v20 = vmov 0.0  }
 0x11e   :  { %14552 = vst [vmem:[#allocation84_spill] sm:$0xff] %v12766_v11  ;;  %v12774_v29 = vpack.c.bf16 %v184_v41, %v176_v42  ;;  %v183_v37 = vld [vmem:[%s14291_s3 + $0xf0] sm:$0xff] }
 0x11f   :  { %14549 = vst [vmem:[#allocation81_spill] sm:$0xff] %v12740_v58  ;;  %v12762_v40 = vsub.f32 %v12740_v58, %v12732_v50  ;;  %14551 = vst [vmem:[#allocation83_spill] sm:$0xff] %v12764_v57  ;;  %v181_v58 = vld [vmem:[%s14291_s3 + $0xe0] sm:$0xff]  ;;  %v12791_v61 = vpack.c.bf16 %v183_v37, %v175_v10 }
 0x120   :  { %14553 = vst [vmem:[#allocation85_spill] sm:$0xff] %v12772_v52  ;;  %14554 = vst [vmem:[#allocation86_spill] sm:$0xff] %v12774_v29  ;;  %v12789_v14 = vpack.c.bf16 %v181_v58, %v173_v18 }
 0x121   :  { %14550 = vst [vmem:[#allocation82_spill] sm:$0xff] %v12762_v40  ;;  %v523_v53 = vmul.f32 0.03125, %v12762_v40  ;;  %14556 = vst [vmem:[#allocation88_spill] sm:$0xff] %v12791_v61 }
 0x122   :  { %14555 = vst [vmem:[#allocation87_spill] sm:$0xff] %v12789_v14 }
 0x123   :  { %8527 = vmatmul.mubr.msk.f32.vlgmr.msra.gmra.mrb[4].mxu0 %vm524_vm0, %v523_v53  ;;  %8528 = vmatmul.mubr.msk.f32.vlgmr.msra.gmra.mrb[4].mxu1 %vm524_vm0, %v523_v53 }
 0x124   :  { %10254 = vmatpush1.bf16.msra.mxu0 %v12764_v57  ;;  %10262 = vmatpush1.bf16.msra.mxu1 %v12766_v11 }
 0x125   :  { %10256 = vmatprep.subr.bf16.mxu0 %v12772_v52  ;;  %10264 = vmatprep.subr.bf16.mxu1 %v12774_v29 }
 0x126   :  { %734 = vmatprep.mubr.f32.mxu0 %v14557_v20  ;;  %805 = vmatprep.mubr.f32.mxu1 %v14557_v20 }
 0x128   :  { %10258 = vmatpush1.bf16.msra.mxu0 %v12789_v14  ;;  %10266 = vmatpush1.bf16.msra.mxu1 %v12791_v61 }
 0x129   :  { %10268 = vmatprep.subr.bf16.mxu0 %v12007_v3  ;;  %10300 = vmatprep.subr.bf16.mxu1 %v12020_v8 }
 0x12b   :  { %8529 = vmatmul.mubr.msk.f32.vlgmr.msra.gmra.mrb[6].mxu0 %vm524_vm0, %v523_v53  ;;  %8530 = vmatmul.mubr.msk.f32.vlgmr.msra.gmra.mrb[6].mxu1 %vm524_vm0, %v523_v53 }
 0x12c   :  { %10270 = vmatpush3.bf16.msra.mxu0 %v12018_v7  ;;  %10302 = vmatpush3.bf16.msra.mxu1 %v12032_v12 }
 0x12d   :  { %10272 = vmatprep.subr.bf16.mxu0 %v12045_v16  ;;  %10304 = vmatprep.subr.bf16.mxu1 %v12059_v21 }
 0x130   :  { %10274 = vmatpush3.bf16.msra.mxu0 %v12047_v17  ;;  %10306 = vmatpush3.bf16.msra.mxu1 %v12071_v25 }
 0x131   :  { %10276 = vmatprep.subr.bf16.mxu0 %v12073_v26  ;;  %10308 = vmatprep.subr.bf16.mxu1 %v12097_v34 }
 0x134   :  { %10278 = vmatpush3.bf16.msra.mxu0 %v12095_v33  ;;  %10310 = vmatpush3.bf16.msra.mxu1 %v12110_v38 }
 0x135   :  { %10280 = vmatprep.subr.bf16.mxu0 %v12112_v39  ;;  %10312 = vmatprep.subr.bf16.mxu1 %v12124_v43 }
 0x138   :  { %10282 = vmatpush3.bf16.msra.mxu0 %v12139_v51  ;;  %10314 = vmatpush3.bf16.msra.mxu1 %v12149_v54 }
 0x139   :  { %10284 = vmatprep.subr.bf16.mxu0 %v12151_v55  ;;  %10316 = vmatprep.subr.bf16.mxu1 %v12163_v59 }
 0x13c   :  { %10286 = vmatpush3.bf16.msra.mxu0 %v12183_v4  ;;  %10318 = vmatpush3.bf16.msra.mxu1 %v12187_v5 }
 0x13d   :  { %10288 = vmatprep.subr.bf16.mxu0 %v12189_v6  ;;  %10320 = vmatprep.subr.bf16.mxu1 %v12201_v13 }
 0x140   :  { %10290 = vmatpush3.bf16.msra.mxu0 %v12222_v23  ;;  %10322 = vmatpush3.bf16.msra.mxu1 %v12229_v27 }
 0x141   :  { %10292 = vmatprep.subr.bf16.mxu0 %v12231_v28  ;;  %10324 = vmatprep.subr.bf16.mxu1 %v12245_v32 }
 0x144   :  { %10294 = vmatpush3.bf16.msra.mxu0 %v12269_v45  ;;  %10326 = vmatpush3.bf16.msra.mxu1 %v12280_v48 }
 0x145   :  { %10296 = vmatprep.subr.bf16.mxu0 %v12282_v49  ;;  %10328 = vmatprep.subr.bf16.mxu1 %v12294_v56 }
 0x148   :  { %10298 = vmatpush3.bf16.msra.mxu0 %v12317_v1  ;;  %10330 = vmatpush3.bf16.msra.mxu1 %v12322_v2 }
 0x149   :  { %10332 = vmatprep.subr.bf16.mxu0 %v12324_v9  ;;  %10364 = vmatprep.subr.bf16.mxu1 %v12336_v15 }
 0x1f6   :  { %v594_v58 = vpop.f32.mrb[4].mxu0  ;;  %v665_v46 = vpop.f32.mrb[4].mxu1 }
 0x1f7   :  { %v812_v42 = vmul.f32 %v594_v58, %v594_v58  ;;  %v596_v41 = vpop.f32.mrb[5].mxu0  ;;  %v667_v18 = vpop.f32.mrb[5].mxu1  ;;  %v814_v53 = vmul.f32 %v665_v46, %v665_v46 }
 0x1f8   :  { %v813_v10 = vmul.f32 %v596_v41, %v596_v41  ;;  %v815_v56 = vmul.f32 %v667_v18, %v667_v18 }
 0x1f9   :  { %v821_v37 = vsel %vm820_vm1, %v812_v42, 0.0  ;;  %v824_v2 = vsel %vm820_vm1, %v814_v53, 0.0 }
 0x1fa   :  { %v822_v40 = vsel %vm820_vm1, %v813_v10, 0.0  ;;  %v826_v9 = vsel %vm820_vm1, %v815_v56, 0.0 }
 0x1fb   :  { %v823_v1 = vadd.f32 %v822_v40, %v821_v37 }
 0x1fd   :  { %v825_v49 = vadd.f32 %v824_v2, %v823_v1 }
 0x1fe   :  { %v736_v15 = vpop.f32.mrb[6].mxu0  ;;  %v807_v48 = vpop.f32.mrb[6].mxu1 }
 0x1ff   :  { %v827_v45 = vadd.f32 %v826_v9, %v825_v49  ;;  %v816_v32 = vmul.f32 %v736_v15, %v736_v15  ;;  %v738_v28 = vpop.f32.mrb[7].mxu0  ;;  %v809_v27 = vpop.f32.mrb[7].mxu1  ;;  %v818_v6 = vmul.f32 %v807_v48, %v807_v48 }
 0x200   :  { %v817_v23 = vmul.f32 %v738_v28, %v738_v28  ;;  %v819_v5 = vmul.f32 %v809_v27, %v809_v27 }
 0x201   :  { %v828_v13 = vsel %vm820_vm1, %v816_v32, 0.0  ;;  %v832_v53 = vsel %vm820_vm1, %v818_v6, 0.0 }
 0x202   :  { %v829_v42 = vadd.f32 %v828_v13, %v827_v45  ;;  %v830_v10 = vsel %vm820_vm1, %v817_v23, 0.0  ;;  %v834_v56 = vsel %vm820_vm1, %v819_v5, 0.0 }
 0x204   :  { %v831_v40 = vadd.f32 %v830_v10, %v829_v42 }
 0x206   :  { %v833_v1 = vadd.f32 %v832_v53, %v831_v40 }
 0x208   :  { %v835_v2 = vadd.f32 %v834_v56, %v833_v1 }
 0x20a   :  { %836 = vadd.xlane.f32.xlu0 %v835_v2 }
 0x297   :  { %v837_v49 = vpop.xlane.xlu0 %836 }
 0x298   :  { %11841 = vrsqrt.f32 %v837_v49  ;;  %vm840_vm2 = vcmp.eq.f32.partialorder %v837_v49, inf  ;;  %v843_v4 = vand.u32 2147483648, %v837_v49  ;;  %vm842_vm3 = vcmp.eq.f32.partialorder %v837_v49, 0.0 }
 0x2a2   :  { %v11842_v9 = vpop.eup %11841 }
 0x2a3   :  { %v839_v37 = vmul.f32 %v11842_v9, %v837_v49 }
 0x2a5   :  { %v841_v32 = vsel %vm840_vm2, %v837_v49, %v839_v37 }
 0x2a6   :  { %v844_v13 = vsel %vm842_vm3, %v843_v4, %v841_v32 }
 0x2a7   :  { %v845_v45 = vadd.f32 1e-10, %v844_v13 }
 0x2a9   :  { %11843 = vrcp.f32 %v845_v45 }
 0x2b3   :  { %v11844_v23 = vpop.eup %11843 }
 0x2b4   :  { %v847_v42 = vmul.f32 0.1, %v11844_v23 }
 0x2b6   :  { %v848_v10 = vmul.f32 %v847_v42, %v594_v58  ;;  %v849_v6 = vmul.f32 %v847_v42, %v596_v41  ;;  %v850_v40 = vmul.f32 %v847_v42, %v665_v46  ;;  %v851_v53 = vmul.f32 %v847_v42, %v667_v18 }
 0x2b7   :  { %v852_v5 = vmul.f32 %v847_v42, %v736_v15  ;;  %v853_v1 = vmul.f32 %v847_v42, %v738_v28  ;;  %v854_v56 = vmul.f32 %v847_v42, %v807_v48  ;;  %v855_v2 = vmul.f32 %v847_v42, %v809_v27 }
 0x2b8   :  { %v864_v59 = vcombine.low %v848_v10, %v849_v6  ;;  %v865_v55 = vcombine.low %v850_v40, %v851_v53 }
 0x2b9   :  { %v881_v9 = vcombine.low %v852_v5, %v853_v1  ;;  %v882_v54 = vcombine.low %v854_v56, %v855_v2 }
 0x2ba   :  { %v872_v37 = vrot.slane %v864_v59, %v12213_v19  ;;  %v879_v4 = vrot.slane %v865_v55, %v12213_v19 }
 0x2bb   :  { %v889_v49 = vrot.slane %v881_v9, %v12213_v19  ;;  %v896_v32 = vrot.slane %v882_v54, %v12213_v19 }
 0x2bc   :  { %v880_v58 = vcombine.low %v872_v37, %v879_v4 }
 0x2bd   :  { %v897_v41 = vcombine.low %v889_v49, %v896_v32 }
 0x2be   :  { %v900_v46 = vadd.f32 %v880_v58, %v12242_v31 }
 0x2bf   :  { %v901_v28 = vadd.f32 %v897_v41, %v12466_v24 }
 0x2c0   :  { %v902_v27 = vsub.f32 %v900_v46, %v12242_v31 }
 0x2c1   :  { %v903_v48 = vsub.f32 %v901_v28, %v12466_v24 }
 0x2c2   :  { %v904_v15 = vmul.f32 %v902_v27, %v902_v27 }
 0x2c3   :  { %v905_v18 = vmul.f32 %v903_v48, %v903_v48 }
 0x2c4   :  { %v908_v13 = vcombine.high %v904_v15, %v904_v15  ;;  %v915_v59 = vrot.slane %v904_v15, %v12213_v19 }
 0x2c5   :  { %v925_v23 = vcombine.high %v905_v18, %v905_v18  ;;  %v932_v42 = vrot.slane %v905_v18, %v12213_v19 }
 0x2c6   :  { %v922_v55 = vrot.slane %v908_v13, %v12213_v19  ;;  %v923_v45 = vcombine.high %v915_v59, %v915_v59  ;;  %v950_v10 = vsel %vm820_vm1, %v915_v59, 0.0 }
 0x2c7   :  { %v939_v1 = vrot.slane %v925_v23, %v12213_v19  ;;  %v940_v56 = vcombine.high %v932_v42, %v932_v42  ;;  %v957_v37 = vsel %vm820_vm1, %v932_v42, 0.0  ;;  %v11961_v42 = vmov 269488144  }
 0x2c8   :  { %v924_v54 = vcombine.high %v922_v55, %v922_v55  ;;  %v951_v6 = vsel %vm820_vm1, %v923_v45, 0.0  ;;  %v953_v53 = vsel %vm820_vm1, %v922_v55, 0.0 }
 0x2c9   :  { %v952_v40 = vadd.f32 %v951_v6, %v950_v10  ;;  %v941_v49 = vcombine.high %v939_v1, %v939_v1  ;;  %v959_v32 = vsel %vm820_vm1, %v940_v56, 0.0  ;;  %v961_v41 = vsel %vm820_vm1, %v939_v1, 0.0 }
 0x2ca   :  { %v955_v2 = vsel %vm820_vm1, %v924_v54, 0.0  ;;  %v981_v10 = vunpack.c.l.s4 %v11961_v42  ;;  %v14567_v42 = vld [vmem:[#allocation55_spill] sm:$0xff] }
 0x2cb   :  { %v954_v5 = vadd.f32 %v953_v53, %v952_v40  ;;  %v963_v28 = vsel %vm820_vm1, %v941_v49, 0.0 }
 0x2cc   :  { %v982_v6 = vunpack.c.0.s8 %v981_v10  ;;  %v14568_v10 = vld [vmem:[#allocation58_spill] sm:$0xff] }
 0x2cd   :  { %v956_v9 = vadd.f32 %v955_v2, %v954_v5 }
 0x2ce   :  { %v12864_v53 = vsub.s32 %v982_v6, %v12174_v0  ;;  %v14569_v6 = vld [vmem:[#allocation57_spill] sm:$0xff] }
 0x2cf   :  { %v958_v4 = vadd.f32 %v957_v37, %v956_v9 }
 0x2d1   :  { %v960_v58 = vadd.f32 %v959_v32, %v958_v4 }
 0x2d3   :  { %v962_v46 = vadd.f32 %v961_v41, %v960_v58 }
 0x2d5   :  { %v964_v15 = vadd.f32 %v963_v28, %v962_v46  ;;  %v14558_v28 = vld [vmem:[#allocation43_spill] sm:$0xff] }
 0x2d7   :  { %965 = vadd.xlane.f32.xlu0 %v964_v15  ;;  %v14559_v15 = vld [vmem:[#allocation44_spill] sm:$0xff] }
 0x364   :  { %v966_v18 = vpop.xlane.xlu0 %965 }
 0x365   :  { %11845 = vrsqrt.f32 %v966_v18  ;;  %vm969_vm4 = vcmp.eq.f32.partialorder %v966_v18, inf  ;;  %v972_v55 = vand.u32 2147483648, %v966_v18  ;;  %vm971_vm5 = vcmp.eq.f32.partialorder %v966_v18, 0.0 }
 0x36f   :  { %v11846_v13 = vpop.eup %11845 }
 0x370   :  { %v968_v59 = vmul.f32 %v11846_v13, %v966_v18  ;;  %v14561_v13 = vld [vmem:[#allocation45_spill] sm:$0xff] }
 0x372   :  { %v970_v45 = vsel %vm969_vm4, %v966_v18, %v968_v59  ;;  %v14560_v18 = vld [vmem:[#allocation46_spill] sm:$0xff]  ;;  %v14562_v59 = vld [vmem:[#allocation47_spill] sm:$0xff] }
 0x373   :  { %v973_v23 = vsel %vm971_vm5, %v972_v55, %v970_v45  ;;  %v14563_v55 = vld [vmem:[#allocation48_spill] sm:$0xff]  ;;  %v14564_v45 = vld [vmem:[#allocation51_spill] sm:$0xff] }
 0x374   :  { %v975_v54 = vadd.f32 1e-07, %v973_v23  ;;  %vm974_vm6 = vcmp.gt.f32.partialorder %v973_v23, 0.1  ;;  %v14565_v23 = vld [vmem:[#allocation50_spill] sm:$0xff] }
 0x376   :  { %11847 = vrcp.f32 %v975_v54  ;;  %v14566_v54 = vld [vmem:[#allocation52_spill] sm:$0xff] }
 0x380   :  { %v11848_v40 = vpop.eup %11847 }
 0x381   :  { %v977_v5 = vmul.f32 0.1, %v11848_v40  ;;  %v14570_v40 = vld [vmem:[#allocation59_spill] sm:$0xff] }
 0x383   :  { %v978_v1 = vsel %vm974_vm6, %v977_v5, 1.0  ;;  %v14571_v5 = vld [vmem:[#allocation61_spill] sm:$0xff] }
 0x384   :  { %v986_v56 = vrot.slane %v978_v1, %v12864_v53  ;;  %v14572_v1 = vld [vmem:[#allocation63_spill] sm:$0xff] }
 0x386   :  { %v988_v2 = vmul.f32 %v986_v56, %v902_v27  ;;  %v989_v9 = vmul.f32 %v986_v56, %v903_v48  ;;  %v14573_v56 = vld [vmem:[#allocation64_spill] sm:$0xff] }
 0x388   :  { %v12868_v37 = vadd.f32 %v988_v2, %v12242_v31  ;;  %v12871_v4 = vadd.f32 %v989_v9, %v12466_v24  ;;  %v14574_v2 = vld [vmem:[#allocation66_spill] sm:$0xff]  ;;  %v14575_v9 = vld [vmem:[#allocation65_spill] sm:$0xff] }
 0x38a   :  { %v1001_v49 = vrot.slane %v12868_v37, %v12213_v19  ;;  %v994_v0 = vcombine.high %v12868_v37, %v12868_v37  ;;  %v1011_v32 = vcombine.high %v12871_v4, %v12871_v4  ;;  %v1018_v58 = vrot.slane %v12871_v4, %v12213_v19 }
 0x38c   :  { %v1009_v27 = vcombine.high %v1001_v49, %v1001_v49  ;;  %v1008_v48 = vrot.slane %v994_v0, %v12213_v19  ;;  %v1025_v31 = vrot.slane %v1011_v32, %v12213_v19  ;;  %v1026_v41 = vcombine.high %v1018_v58, %v1018_v58  ;;  %v14577_v0 = vld [vmem:[#allocation68_spill] sm:$0xff]  ;;  %v14578_v32 = vld [vmem:[#allocation70_spill] sm:$0xff] }
 0x38e   :  { %1100 = vmatprep.mubr.f32.mxu0 %v1009_v27  ;;  %v1010_v24 = vcombine.high %v1008_v48, %v1008_v48  ;;  %v1027_v46 = vcombine.high %v1025_v31, %v1025_v31  ;;  %v14579_v27 = vld [vmem:[#allocation69_spill] sm:$0xff] }
 0x38f   :  { %1101 = vmatmul.mubr.f32.vlgmr.msra.gmra.mrb[8].mxu0 %v1001_v49  ;;  %v14576_v49 = vld [vmem:[#allocation67_spill] sm:$0xff] }
 0x390   :  { %10334 = vmatpush3.bf16.msra.mxu0 %v12354_v30  ;;  %1170 = vmatprep.mubr.f32.mxu1 %v1010_v24  ;;  %v14581_v24 = vld [vmem:[#allocation72_spill] sm:$0xff] }
 0x391   :  { %1240 = vmatprep.mubr.f32.mxu0 %v1026_v41  ;;  %1171 = vmatmul.mubr.f32.vlgmr.msra.gmra.mrb[8].mxu1 %v1008_v48  ;;  %v14580_v48 = vld [vmem:[#allocation71_spill] sm:$0xff]  ;;  %v14582_v41 = vld [vmem:[#allocation74_spill] sm:$0xff] }
 0x392   :  { %10366 = vmatpush3.bf16.msra.mxu1 %v12358_v35  ;;  %10336 = vmatprep.subr.bf16.mxu0 %v12360_v36 }
 0x393   :  { %1310 = vmatprep.mubr.f32.mxu1 %v1027_v46  ;;  %10368 = vmatprep.subr.bf16.mxu1 %v12372_v44  ;;  %v14583_v46 = vld [vmem:[#allocation73_spill] sm:$0xff] }
 0x394   :  { %10338 = vmatpush3.bf16.msra.mxu0 %v12392_v60 }
 0x395   :  { %10340 = vmatprep.subr.bf16.mxu0 %v12398_v63 }
 0x396   :  { %10370 = vmatpush3.bf16.msra.mxu1 %v12396_v62 }
 0x397   :  { %10372 = vmatprep.subr.bf16.mxu1 %v14558_v28 }
 0x398   :  { %10342 = vmatpush3.bf16.msra.mxu0 %v14559_v15 }
 0x399   :  { %10344 = vmatprep.subr.bf16.mxu0 %v14560_v18 }
 0x39a   :  { %10374 = vmatpush3.bf16.msra.mxu1 %v14561_v13 }
 0x39b   :  { %10376 = vmatprep.subr.bf16.mxu1 %v14562_v59 }
 0x39c   :  { %10346 = vmatpush3.bf16.msra.mxu0 %v14563_v55 }
 0x39d   :  { %10348 = vmatprep.subr.bf16.mxu0 %v14564_v45 }
 0x39e   :  { %10378 = vmatpush3.bf16.msra.mxu1 %v14565_v23 }
 0x39f   :  { %10380 = vmatprep.subr.bf16.mxu1 %v14566_v54 }
 0x3a0   :  { %10350 = vmatpush3.bf16.msra.mxu0 %v14567_v42 }
 0x3a1   :  { %10352 = vmatprep.subr.bf16.mxu0 %v14568_v10 }
 0x3a2   :  { %10382 = vmatpush3.bf16.msra.mxu1 %v14569_v6 }
 0x3a3   :  { %10384 = vmatprep.subr.bf16.mxu1 %v14570_v40 }
 0x3a4   :  { %10354 = vmatpush3.bf16.msra.mxu0 %v12560_v22 }
 0x3a5   :  { %10356 = vmatprep.subr.bf16.mxu0 %v12566_v47 }
 0x3a6   :  { %10386 = vmatpush3.bf16.msra.mxu1 %v14571_v5 }
 0x3a7   :  { %10388 = vmatprep.subr.bf16.mxu1 %v14572_v1 }
 0x3a8   :  { %10358 = vmatpush3.bf16.msra.mxu0 %v14573_v56 }
 0x3a9   :  { %10360 = vmatprep.subr.bf16.mxu0 %v14574_v2 }
 0x3aa   :  { %10390 = vmatpush3.bf16.msra.mxu1 %v14575_v9 }
 0x3ab   :  { %10392 = vmatprep.subr.bf16.mxu1 %v14576_v49  ;;  %v14584_v49 = vld [vmem:[#allocation75_spill] sm:$0xff] }
 0x3ac   :  { %10362 = vmatpush3.bf16.msra.mxu0 %v14577_v0  ;;  %v14585_v0 = vld [vmem:[#allocation76_spill] sm:$0xff] }
 0x3ad   :  { %10396 = vmatprep.subr.bf16.mxu0 %v14578_v32  ;;  %v14586_v32 = vld [vmem:[#allocation78_spill] sm:$0xff] }
 0x3ae   :  { %10394 = vmatpush3.bf16.msra.mxu1 %v14579_v27 }
 0x3af   :  { %1241 = vmatmul.mubr.f32.vlgmr.msra.gmra.mrb[10].mxu0 %v1018_v58  ;;  %10404 = vmatprep.subr.bf16.mxu1 %v14580_v48  ;;  %v14587_v58 = vld [vmem:[#allocation77_spill] sm:$0xff]  ;;  %v14588_v48 = vld [vmem:[#allocation79_spill] sm:$0xff] }
 0x3b0   :  { %10398 = vmatpush1.bf16.msra.mxu0 %v14581_v24  ;;  %1385 = vmatprep.mubr.f32.mxu0 %v14557_v20 }
 0x3b1   :  { %1311 = vmatmul.mubr.f32.vlgmr.msra.gmra.mrb[10].mxu1 %v1025_v31  ;;  %10400 = vmatprep.subr.bf16.mxu0 %v14582_v41  ;;  %v14589_v41 = vld [vmem:[#allocation80_spill] sm:$0xff] }
 0x3b2   :  { %10406 = vmatpush1.bf16.msra.mxu1 %v14583_v46  ;;  %1456 = vmatprep.mubr.f32.mxu1 %v14557_v20 }
 0x3b3   :  { %10408 = vmatprep.subr.bf16.mxu1 %v14584_v49 }
 0x3b4   :  { %10402 = vmatpush1.bf16.msra.mxu0 %v14585_v0 }
 0x3b5   :  { %10412 = vmatprep.subr.bf16.mxu0 %v14586_v32 }
 0x3b6   :  { %10410 = vmatpush1.bf16.msra.mxu1 %v14587_v58 }
 0x3b7   :  { %10420 = vmatprep.subr.bf16.mxu1 %v14588_v48 }
 0x462   :  { %v8739_v24 = vpop.f32.mrb[8].mxu0 }
 0x463   :  { %v8740_v27 = vpop.f32.mrb[9].mxu0 }
 0x464   :  { %v8741_v9 = vadd.f32 %v8740_v27, %v8739_v24  ;;  %v8774_v31 = vpop.f32.mrb[8].mxu1  ;;  %v14602_v27 = vld [vmem:[#allocation35_spill] sm:$0xff]  ;;  %v14604_v24 = vld [vmem:[#allocation37_spill] sm:$0xff] }
 0x465   :  { %v8775_v2 = vpop.f32.mrb[9].mxu1 }
 0x466   :  { %v1103_v56 = vadd.f32 %v8741_v9, %v14589_v41  ;;  %v8776_v46 = vadd.f32 %v8775_v2, %v8774_v31  ;;  %v14597_v2 = vld [vmem:[#allocation27_spill] sm:$0xff]  ;;  %v14598_v9 = vld [vmem:[#allocation28_spill] sm:$0xff]  ;;  %v14607_v31 = vld [vmem:[#allocation41_spill] sm:$0xff] }
 0x468   :  { %v1173_v1 = vadd.f32 %v8776_v46, %v1103_v56  ;;  %v14596_v56 = vld [vmem:[#allocation26_spill] sm:$0xff]  ;;  %v14605_v46 = vld [vmem:[#allocation39_spill] sm:$0xff] }
 0x482   :  { %v8809_v5 = vpop.f32.mrb[10].mxu0 }
 0x483   :  { %v8810_v47 = vpop.f32.mrb[11].mxu0 }
 0x484   :  { %v8811_v49 = vadd.f32 %v8810_v47, %v8809_v5  ;;  %v8844_v22 = vpop.f32.mrb[10].mxu1  ;;  %v14590_v47 = vld [vmem:[#allocation20_spill] sm:$0xff] }
 0x485   :  { %v8845_v0 = vpop.f32.mrb[11].mxu1  ;;  %v14594_v5 = vld [vmem:[#allocation24_spill] sm:$0xff] }
 0x486   :  { %v1243_v40 = vadd.f32 %v8811_v49, %v1173_v1  ;;  %v8846_v32 = vadd.f32 %v8845_v0, %v8844_v22  ;;  %v14591_v22 = vld [vmem:[#allocation21_spill] sm:$0xff]  ;;  %v14600_v0 = vld [vmem:[#allocation30_spill] sm:$0xff] }
 0x487   :  { %v14595_v1 = vld [vmem:[#allocation25_spill] sm:$0xff] }
 0x488   :  { %v1313_v6 = vadd.f32 %v8846_v32, %v1243_v40  ;;  %v14593_v40 = vld [vmem:[#allocation23_spill] sm:$0xff]  ;;  %v14599_v49 = vld [vmem:[#allocation29_spill] sm:$0xff]  ;;  %v14601_v32 = vld [vmem:[#allocation32_spill] sm:$0xff] }
 0x48a   :  { %v1316_v58 = vsub.f32 %v1313_v6, %v12732_v50  ;;  %v14592_v6 = vld [vmem:[#allocation22_spill] sm:$0xff] }
 0x48c   :  { %v1317_v48 = vmul.f32 0.03125, %v1316_v58  ;;  %v14606_v58 = vld [vmem:[#allocation40_spill] sm:$0xff] }
 0x48e   :  { %8531 = vmatmul.mubr.msk.f32.vlgmr.msra.gmra.mrb[12].mxu0 %vm524_vm0, %v1317_v48  ;;  %8532 = vmatmul.mubr.msk.f32.vlgmr.msra.gmra.mrb[12].mxu1 %vm524_vm0, %v1317_v48 }
 0x48f   :  { %10414 = vmatpush1.bf16.msra.mxu0 %v12764_v57  ;;  %10422 = vmatpush1.bf16.msra.mxu1 %v12766_v11 }
 0x490   :  { %10416 = vmatprep.subr.bf16.mxu0 %v12772_v52  ;;  %10424 = vmatprep.subr.bf16.mxu1 %v12774_v29 }
 0x491   :  { %1527 = vmatprep.mubr.f32.mxu0 %v14557_v20  ;;  %1598 = vmatprep.mubr.f32.mxu1 %v14557_v20 }
 0x493   :  { %10418 = vmatpush1.bf16.msra.mxu0 %v12789_v14  ;;  %10426 = vmatpush1.bf16.msra.mxu1 %v12791_v61 }
 0x494   :  { %10428 = vmatprep.subr.bf16.mxu0 %v12007_v3  ;;  %10460 = vmatprep.subr.bf16.mxu1 %v12020_v8 }
 0x496   :  { %8533 = vmatmul.mubr.msk.f32.vlgmr.msra.gmra.mrb[14].mxu0 %vm524_vm0, %v1317_v48  ;;  %8534 = vmatmul.mubr.msk.f32.vlgmr.msra.gmra.mrb[14].mxu1 %vm524_vm0, %v1317_v48  ;;  %v14603_v48 = vld [vmem:[#allocation36_spill] sm:$0xff] }
 0x497   :  { %10430 = vmatpush3.bf16.msra.mxu0 %v12018_v7  ;;  %10462 = vmatpush3.bf16.msra.mxu1 %v12032_v12 }
 0x498   :  { %10432 = vmatprep.subr.bf16.mxu0 %v12045_v16  ;;  %10464 = vmatprep.subr.bf16.mxu1 %v12059_v21 }
 0x49b   :  { %10434 = vmatpush3.bf16.msra.mxu0 %v12047_v17  ;;  %10466 = vmatpush3.bf16.msra.mxu1 %v12071_v25 }
 0x49c   :  { %10436 = vmatprep.subr.bf16.mxu0 %v12073_v26  ;;  %10468 = vmatprep.subr.bf16.mxu1 %v12097_v34 }
 0x49f   :  { %10438 = vmatpush3.bf16.msra.mxu0 %v12095_v33  ;;  %10470 = vmatpush3.bf16.msra.mxu1 %v12110_v38 }
 0x4a0   :  { %10440 = vmatprep.subr.bf16.mxu0 %v12112_v39  ;;  %10472 = vmatprep.subr.bf16.mxu1 %v12124_v43 }
 0x4a3   :  { %10442 = vmatpush3.bf16.msra.mxu0 %v12139_v51  ;;  %10474 = vmatpush3.bf16.msra.mxu1 %v14590_v47 }
 0x4a4   :  { %10444 = vmatprep.subr.bf16.mxu0 %v14591_v22  ;;  %10476 = vmatprep.subr.bf16.mxu1 %v14592_v6 }
 0x4a7   :  { %10446 = vmatpush3.bf16.msra.mxu0 %v14593_v40  ;;  %10478 = vmatpush3.bf16.msra.mxu1 %v14594_v5 }
 0x4a8   :  { %10448 = vmatprep.subr.bf16.mxu0 %v14595_v1  ;;  %10480 = vmatprep.subr.bf16.mxu1 %v14596_v56 }
 0x4ab   :  { %10450 = vmatpush3.bf16.msra.mxu0 %v14597_v2  ;;  %10482 = vmatpush3.bf16.msra.mxu1 %v14598_v9  ;;  %v14608_v2 = vld [vmem:[#allocation42_spill] sm:$0xff] }
 0x4ac   :  { %10452 = vmatprep.subr.bf16.mxu0 %v14599_v49  ;;  %10484 = vmatprep.subr.bf16.mxu1 %v14600_v0 }
 0x4af   :  { %10454 = vmatpush3.bf16.msra.mxu0 %v14601_v32  ;;  %10486 = vmatpush3.bf16.msra.mxu1 %v14602_v27 }
 0x4b0   :  { %10456 = vmatprep.subr.bf16.mxu0 %v14603_v48  ;;  %10488 = vmatprep.subr.bf16.mxu1 %v14604_v24 }
 0x4b3   :  { %10458 = vmatpush3.bf16.msra.mxu0 %v14605_v46  ;;  %10490 = vmatpush3.bf16.msra.mxu1 %v14606_v58 }
 0x4b4   :  { %10492 = vmatprep.subr.bf16.mxu0 %v14607_v31  ;;  %10524 = vmatprep.subr.bf16.mxu1 %v14608_v2 }
 0x561   :  { %v1387_v9 = vpop.f32.mrb[12].mxu0  ;;  %v1458_v49 = vpop.f32.mrb[12].mxu1 }
 0x562   :  { %v1605_v56 = vmul.f32 %v1387_v9, %v1387_v9  ;;  %v1389_v0 = vpop.f32.mrb[13].mxu0  ;;  %v1460_v1 = vpop.f32.mrb[13].mxu1  ;;  %v1607_v32 = vmul.f32 %v1458_v49, %v1458_v49 }
 0x563   :  { %v1606_v5 = vmul.f32 %v1389_v0, %v1389_v0  ;;  %v1608_v24 = vmul.f32 %v1460_v1, %v1460_v1 }
 0x564   :  { %v1613_v27 = vsel %vm820_vm1, %v1605_v56, 0.0  ;;  %v1616_v46 = vsel %vm820_vm1, %v1607_v32, 0.0 }
 0x565   :  { %v1614_v48 = vsel %vm820_vm1, %v1606_v5, 0.0  ;;  %v1618_v31 = vsel %vm820_vm1, %v1608_v24, 0.0 }
 0x566   :  { %v1615_v40 = vadd.f32 %v1614_v48, %v1613_v27 }
 0x568   :  { %v1617_v58 = vadd.f32 %v1616_v46, %v1615_v40 }
 0x569   :  { %v1529_v6 = vpop.f32.mrb[14].mxu0  ;;  %v1600_v2 = vpop.f32.mrb[14].mxu1 }
 0x56a   :  { %v1619_v22 = vadd.f32 %v1618_v31, %v1617_v58  ;;  %v1609_v47 = vmul.f32 %v1529_v6, %v1529_v6  ;;  %v1531_v51 = vpop.f32.mrb[15].mxu0  ;;  %v1602_v43 = vpop.f32.mrb[15].mxu1  ;;  %v1611_v33 = vmul.f32 %v1600_v2, %v1600_v2 }
 0x56b   :  { %v1610_v39 = vmul.f32 %v1531_v51, %v1531_v51  ;;  %v1612_v34 = vmul.f32 %v1602_v43, %v1602_v43 }
 0x56c   :  { %v1620_v38 = vsel %vm820_vm1, %v1609_v47, 0.0  ;;  %v1624_v32 = vsel %vm820_vm1, %v1611_v33, 0.0 }
 0x56d   :  { %v1621_v56 = vadd.f32 %v1620_v38, %v1619_v22  ;;  %v1622_v5 = vsel %vm820_vm1, %v1610_v39, 0.0  ;;  %v1626_v48 = vsel %vm820_vm1, %v1612_v34, 0.0 }
 0x56f   :  { %v1623_v27 = vadd.f32 %v1622_v5, %v1621_v56 }
 0x571   :  { %v1625_v40 = vadd.f32 %v1624_v32, %v1623_v27 }
 0x573   :  { %v1627_v24 = vadd.f32 %v1626_v48, %v1625_v40 }
 0x575   :  { %1628 = vadd.xlane.f32.xlu1 %v1627_v24 }
 0x602   :  { %v1629_v46 = vpop.xlane.xlu1 %1628 }
 0x603   :  { %11849 = vrsqrt.f32 %v1629_v46  ;;  %vm1632_vm7 = vcmp.eq.f32.partialorder %v1629_v46, inf  ;;  %v1635_v26 = vand.u32 2147483648, %v1629_v46  ;;  %vm1634_vm8 = vcmp.eq.f32.partialorder %v1629_v46, 0.0 }
 0x60d   :  { %v11850_v58 = vpop.eup %11849 }
 0x60e   :  { %v1631_v31 = vmul.f32 %v11850_v58, %v1629_v46 }
 0x610   :  { %v1633_v47 = vsel %vm1632_vm7, %v1629_v46, %v1631_v31 }
 0x611   :  { %v1636_v38 = vsel %vm1634_vm8, %v1635_v26, %v1633_v47 }
 0x612   :  { %v1637_v22 = vadd.f32 1e-10, %v1636_v38 }
 0x614   :  { %11851 = vrcp.f32 %v1637_v22 }
 0x61e   :  { %v11852_v39 = vpop.eup %11851 }
 0x61f   :  { %v1639_v56 = vmul.f32 0.1, %v11852_v39 }
 0x621   :  { %v1640_v5 = vmul.f32 %v1639_v56, %v1387_v9  ;;  %v1641_v33 = vmul.f32 %v1639_v56, %v1389_v0  ;;  %v1642_v27 = vmul.f32 %v1639_v56, %v1458_v49  ;;  %v1643_v32 = vmul.f32 %v1639_v56, %v1460_v1 }
 0x622   :  { %v1644_v34 = vmul.f32 %v1639_v56, %v1529_v6  ;;  %v1645_v40 = vmul.f32 %v1639_v56, %v1531_v51  ;;  %v1646_v48 = vmul.f32 %v1639_v56, %v1600_v2  ;;  %v1647_v24 = vmul.f32 %v1639_v56, %v1602_v43  ;;  %v12990_v43 = vld [vmem:[%s14288_s0] sm:$0xff] }
 0x623   :  { %v1656_v25 = vcombine.low %v1640_v5, %v1641_v33  ;;  %v1657_v17 = vcombine.low %v1642_v27, %v1643_v32 }
 0x624   :  { %v1673_v58 = vcombine.low %v1644_v34, %v1645_v40  ;;  %v1674_v21 = vcombine.low %v1646_v48, %v1647_v24 }
 0x625   :  { %v1664_v31 = vrot.slane %v1656_v25, %v12213_v19  ;;  %v1671_v26 = vrot.slane %v1657_v17, %v12213_v19  ;;  %v12996_v17 = vld [vmem:[%s14288_s0 + $0x8] sm:$0xff] }
 0x626   :  { %v1681_v46 = vrot.slane %v1673_v58, %v12213_v19  ;;  %v1688_v47 = vrot.slane %v1674_v21, %v12213_v19 }
 0x627   :  { %v1672_v9 = vcombine.low %v1664_v31, %v1671_v26 }
 0x628   :  { %v1689_v0 = vcombine.low %v1681_v46, %v1688_v47 }
 0x629   :  { %v1692_v1 = vadd.f32 %v1672_v9, %v12868_v37 }
 0x62a   :  { %v1693_v51 = vadd.f32 %v1689_v0, %v12871_v4 }
 0x62b   :  { %v1694_v6 = vsub.f32 %v1692_v1, %v12990_v43 }
 0x62c   :  { %v1695_v21 = vsub.f32 %v1693_v51, %v12996_v17 }
 0x62d   :  { %v1696_v25 = vmul.f32 %v1694_v6, %v1694_v6 }
 0x62e   :  { %v1697_v2 = vmul.f32 %v1695_v21, %v1695_v21 }
 0x62f   :  { %v1700_v49 = vcombine.high %v1696_v25, %v1696_v25  ;;  %v1707_v37 = vrot.slane %v1696_v25, %v12213_v19 }
 0x630   :  { %v1717_v22 = vcombine.high %v1697_v2, %v1697_v2  ;;  %v1724_v56 = vrot.slane %v1697_v2, %v12213_v19 }
 0x631   :  { %v1714_v4 = vrot.slane %v1700_v49, %v12213_v19  ;;  %v1715_v38 = vcombine.high %v1707_v37, %v1707_v37  ;;  %v1742_v5 = vsel %vm820_vm1, %v1707_v37, 0.0 }
 0x632   :  { %v1731_v40 = vrot.slane %v1717_v22, %v12213_v19  ;;  %v1732_v48 = vcombine.high %v1724_v56, %v1724_v56  ;;  %v1749_v31 = vsel %vm820_vm1, %v1724_v56, 0.0 }
 0x633   :  { %v1716_v39 = vcombine.high %v1714_v4, %v1714_v4  ;;  %v1743_v33 = vsel %vm820_vm1, %v1715_v38, 0.0  ;;  %v1745_v32 = vsel %vm820_vm1, %v1714_v4, 0.0 }
 0x634   :  { %v1744_v27 = vadd.f32 %v1743_v33, %v1742_v5  ;;  %v1733_v46 = vcombine.high %v1731_v40, %v1731_v40  ;;  %v1751_v47 = vsel %vm820_vm1, %v1732_v48, 0.0  ;;  %v1753_v0 = vsel %vm820_vm1, %v1731_v40, 0.0 }
 0x635   :  { %v1747_v24 = vsel %vm820_vm1, %v1716_v39, 0.0 }
 0x636   :  { %v1746_v34 = vadd.f32 %v1745_v32, %v1744_v27  ;;  %v1755_v51 = vsel %vm820_vm1, %v1733_v46, 0.0 }
 0x638   :  { %v1748_v58 = vadd.f32 %v1747_v24, %v1746_v34 }
 0x63a   :  { %v1750_v26 = vadd.f32 %v1749_v31, %v1748_v58 }
 0x63c   :  { %v1752_v9 = vadd.f32 %v1751_v47, %v1750_v26 }
 0x63e   :  { %v1754_v1 = vadd.f32 %v1753_v0, %v1752_v9 }
 0x640   :  { %v1756_v25 = vadd.f32 %v1755_v51, %v1754_v1  ;;  %v14609_v1 = vld [vmem:[#allocation57_spill] sm:$0xff]  ;;  %v14610_v51 = vld [vmem:[#allocation59_spill] sm:$0xff] }
 0x642   :  { %1757 = vadd.xlane.f32.xlu1 %v1756_v25  ;;  %v14611_v25 = vld [vmem:[#allocation60_spill] sm:$0xff] }
 0x6cf   :  { %v1758_v2 = vpop.xlane.xlu1 %1757 }
 0x6d0   :  { %11853 = vrsqrt.f32 %v1758_v2  ;;  %vm1761_vm9 = vcmp.eq.f32.partialorder %v1758_v2, inf  ;;  %v1764_v4 = vand.u32 2147483648, %v1758_v2  ;;  %vm1763_vm10 = vcmp.eq.f32.partialorder %v1758_v2, 0.0 }
 0x6da   :  { %v11854_v49 = vpop.eup %11853 }
 0x6db   :  { %v1760_v37 = vmul.f32 %v11854_v49, %v1758_v2  ;;  %v14613_v49 = vld [vmem:[#allocation61_spill] sm:$0xff] }
 0x6dd   :  { %v1762_v38 = vsel %vm1761_vm9, %v1758_v2, %v1760_v37  ;;  %v14612_v2 = vld [vmem:[#allocation62_spill] sm:$0xff]  ;;  %v14614_v37 = vld [vmem:[#allocation63_spill] sm:$0xff] }
 0x6de   :  { %v1765_v22 = vsel %vm1763_vm10, %v1764_v4, %v1762_v38  ;;  %v14615_v4 = vld [vmem:[#allocation64_spill] sm:$0xff]  ;;  %v14616_v38 = vld [vmem:[#allocation66_spill] sm:$0xff] }
 0x6df   :  { %v1767_v39 = vadd.f32 1e-07, %v1765_v22  ;;  %vm1766_vm11 = vcmp.gt.f32.partialorder %v1765_v22, 0.1  ;;  %v14617_v22 = vld [vmem:[#allocation65_spill] sm:$0xff] }
 0x6e1   :  { %11855 = vrcp.f32 %v1767_v39  ;;  %v14618_v39 = vld [vmem:[#allocation67_spill] sm:$0xff] }
 0x6eb   :  { %v11856_v56 = vpop.eup %11855 }
 0x6ec   :  { %v1769_v5 = vmul.f32 0.1, %v11856_v56  ;;  %v14619_v56 = vld [vmem:[#allocation68_spill] sm:$0xff] }
 0x6ee   :  { %v1770_v33 = vsel %vm1766_vm11, %v1769_v5, 1.0  ;;  %v14620_v5 = vld [vmem:[#allocation70_spill] sm:$0xff] }
 0x6ef   :  { %v1778_v27 = vrot.slane %v1770_v33, %v12864_v53  ;;  %v14621_v33 = vld [vmem:[#allocation69_spill] sm:$0xff] }
 0x6f1   :  { %v1780_v32 = vmul.f32 %v1778_v27, %v1694_v6  ;;  %v1781_v34 = vmul.f32 %v1778_v27, %v1695_v21  ;;  %v14622_v27 = vld [vmem:[#allocation71_spill] sm:$0xff] }
 0x6f3   :  { %v13013_v40 = vadd.f32 %v12990_v43, %v1780_v32  ;;  %v13016_v48 = vadd.f32 %v12996_v17, %v1781_v34  ;;  %v14623_v32 = vld [vmem:[#allocation72_spill] sm:$0xff]  ;;  %v14624_v34 = vld [vmem:[#allocation74_spill] sm:$0xff] }
 0x6f5   :  { %v1793_v24 = vrot.slane %v13013_v40, %v12213_v19  ;;  %v1786_v58 = vcombine.high %v13013_v40, %v13013_v40  ;;  %v1803_v31 = vcombine.high %v13016_v48, %v13016_v48  ;;  %v1810_v26 = vrot.slane %v13016_v48, %v12213_v19 }
 0x6f7   :  { %v1801_v6 = vcombine.high %v1793_v24, %v1793_v24  ;;  %v1800_v21 = vrot.slane %v1786_v58, %v12213_v19  ;;  %v1817_v46 = vrot.slane %v1803_v31, %v12213_v19  ;;  %v1818_v9 = vcombine.high %v1810_v26, %v1810_v26  ;;  %v14626_v58 = vld [vmem:[#allocation75_spill] sm:$0xff]  ;;  %v14627_v31 = vld [vmem:[#allocation76_spill] sm:$0xff] }
 0x6f9   :  { %1892 = vmatprep.mubr.f32.mxu0 %v1801_v6  ;;  %v1802_v47 = vcombine.high %v1800_v21, %v1800_v21  ;;  %v1819_v0 = vcombine.high %v1817_v46, %v1817_v46  ;;  %v14628_v6 = vld [vmem:[#allocation78_spill] sm:$0xff] }
 0x6fa   :  { %1893 = vmatmul.mubr.f32.vlgmr.msra.gmra.mrb[16].mxu0 %v1793_v24  ;;  %v14625_v24 = vld [vmem:[#allocation73_spill] sm:$0xff] }
 0x6fb   :  { %10494 = vmatpush3.bf16.msra.mxu0 %v12354_v30  ;;  %1962 = vmatprep.mubr.f32.mxu1 %v1802_v47 }
 0x6fc   :  { %2032 = vmatprep.mubr.f32.mxu0 %v1818_v9  ;;  %1963 = vmatmul.mubr.f32.vlgmr.msra.gmra.mrb[16].mxu1 %v1800_v21  ;;  %v14630_v21 = vld [vmem:[#allocation79_spill] sm:$0xff] }
 0x6fd   :  { %10526 = vmatpush3.bf16.msra.mxu1 %v12358_v35  ;;  %10496 = vmatprep.subr.bf16.mxu0 %v12360_v36 }
 0x6fe   :  { %2102 = vmatprep.mubr.f32.mxu1 %v1819_v0  ;;  %10528 = vmatprep.subr.bf16.mxu1 %v12372_v44 }
 0x6ff   :  { %10498 = vmatpush3.bf16.msra.mxu0 %v12392_v60 }
 0x700   :  { %10500 = vmatprep.subr.bf16.mxu0 %v12398_v63 }
 0x701   :  { %10530 = vmatpush3.bf16.msra.mxu1 %v12396_v62 }
 0x702   :  { %10532 = vmatprep.subr.bf16.mxu1 %v14558_v28 }
 0x703   :  { %10502 = vmatpush3.bf16.msra.mxu0 %v14559_v15 }
 0x704   :  { %10504 = vmatprep.subr.bf16.mxu0 %v14560_v18 }
 0x705   :  { %10534 = vmatpush3.bf16.msra.mxu1 %v14561_v13 }
 0x706   :  { %10536 = vmatprep.subr.bf16.mxu1 %v14562_v59 }
 0x707   :  { %10506 = vmatpush3.bf16.msra.mxu0 %v14563_v55 }
 0x708   :  { %10508 = vmatprep.subr.bf16.mxu0 %v14564_v45 }
 0x709   :  { %10538 = vmatpush3.bf16.msra.mxu1 %v14565_v23 }
 0x70a   :  { %10540 = vmatprep.subr.bf16.mxu1 %v14566_v54 }
 0x70b   :  { %10510 = vmatpush3.bf16.msra.mxu0 %v14567_v42 }
 0x70c   :  { %10512 = vmatprep.subr.bf16.mxu0 %v14568_v10 }
 0x70d   :  { %10542 = vmatpush3.bf16.msra.mxu1 %v14609_v1 }
 0x70e   :  { %10544 = vmatprep.subr.bf16.mxu1 %v14610_v51 }
 0x70f   :  { %10514 = vmatpush3.bf16.msra.mxu0 %v14611_v25 }
 0x710   :  { %10516 = vmatprep.subr.bf16.mxu0 %v14612_v2 }
 0x711   :  { %10546 = vmatpush3.bf16.msra.mxu1 %v14613_v49 }
 0x712   :  { %10548 = vmatprep.subr.bf16.mxu1 %v14614_v37 }
 0x713   :  { %10518 = vmatpush3.bf16.msra.mxu0 %v14615_v4 }
 0x714   :  { %10520 = vmatprep.subr.bf16.mxu0 %v14616_v38 }
 0x715   :  { %10550 = vmatpush3.bf16.msra.mxu1 %v14617_v22 }
 0x716   :  { %10552 = vmatprep.subr.bf16.mxu1 %v14618_v39 }
 0x717   :  { %10522 = vmatpush3.bf16.msra.mxu0 %v14619_v56 }
 0x718   :  { %10556 = vmatprep.subr.bf16.mxu0 %v14620_v5 }
 0x719   :  { %10554 = vmatpush3.bf16.msra.mxu1 %v14621_v33 }
 0x71a   :  { %2033 = vmatmul.mubr.f32.vlgmr.msra.gmra.mrb[18].mxu0 %v1810_v26  ;;  %10564 = vmatprep.subr.bf16.mxu1 %v14622_v27  ;;  %v14629_v26 = vld [vmem:[#allocation77_spill] sm:$0xff] }
 0x71b   :  { %10558 = vmatpush1.bf16.msra.mxu0 %v14623_v32  ;;  %2177 = vmatprep.mubr.f32.mxu0 %v14557_v20 }
 0x71c   :  { %2103 = vmatmul.mubr.f32.vlgmr.msra.gmra.mrb[18].mxu1 %v1817_v46  ;;  %10560 = vmatprep.subr.bf16.mxu0 %v14624_v34 }
 0x71d   :  { %10566 = vmatpush1.bf16.msra.mxu1 %v14625_v24  ;;  %2248 = vmatprep.mubr.f32.mxu1 %v14557_v20 }
 0x71e   :  { %10568 = vmatprep.subr.bf16.mxu1 %v14626_v58 }
 0x71f   :  { %10562 = vmatpush1.bf16.msra.mxu0 %v14627_v31 }
 0x720   :  { %10572 = vmatprep.subr.bf16.mxu0 %v14628_v6 }
 0x721   :  { %10570 = vmatpush1.bf16.msra.mxu1 %v14629_v26 }
 0x722   :  { %10580 = vmatprep.subr.bf16.mxu1 %v14630_v21 }
 0x7cd   :  { %v8879_v47 = vpop.f32.mrb[16].mxu0 }
 0x7ce   :  { %v8880_v9 = vpop.f32.mrb[17].mxu0 }
 0x7cf   :  { %v8881_v0 = vadd.f32 %v8880_v9, %v8879_v47  ;;  %v8914_v46 = vpop.f32.mrb[16].mxu1  ;;  %v14647_v47 = vld [vmem:[#allocation26_spill] sm:$0xff]  ;;  %v14648_v9 = vld [vmem:[#allocation27_spill] sm:$0xff] }
 0x7d0   :  { %v8915_v32 = vpop.f32.mrb[17].mxu1 }
 0x7d1   :  { %v1895_v34 = vadd.f32 %v8881_v0, %v14589_v41  ;;  %v8916_v24 = vadd.f32 %v8915_v32, %v8914_v46  ;;  %v14632_v41 = vld [vmem:[#allocation10_spill] sm:$0xff]  ;;  %v14649_v0 = vld [vmem:[#allocation28_spill] sm:$0xff]  ;;  %v14650_v46 = vld [vmem:[#allocation29_spill] sm:$0xff] }
 0x7d2   :  { %v14639_v32 = vld [vmem:[#allocation18_spill] sm:$0xff] }
 0x7d3   :  { %v1965_v27 = vadd.f32 %v8916_v24, %v1895_v34  ;;  %v14640_v34 = vld [vmem:[#allocation19_spill] sm:$0xff]  ;;  %v14641_v24 = vld [vmem:[#allocation20_spill] sm:$0xff] }
 0x7ed   :  { %v8949_v33 = vpop.f32.mrb[18].mxu0 }
 0x7ee   :  { %v8950_v5 = vpop.f32.mrb[19].mxu0 }
 0x7ef   :  { %v8951_v58 = vadd.f32 %v8950_v5, %v8949_v33  ;;  %v8984_v56 = vpop.f32.mrb[18].mxu1  ;;  %v14636_v5 = vld [vmem:[#allocation14_spill] sm:$0xff]  ;;  %v14637_v33 = vld [vmem:[#allocation16_spill] sm:$0xff] }
 0x7f0   :  { %v8985_v31 = vpop.f32.mrb[19].mxu1 }
 0x7f1   :  { %v2035_v39 = vadd.f32 %v8951_v58, %v1965_v27  ;;  %v8986_v6 = vadd.f32 %v8985_v31, %v8984_v56  ;;  %v14635_v56 = vld [vmem:[#allocation15_spill] sm:$0xff]  ;;  %v14638_v27 = vld [vmem:[#allocation17_spill] sm:$0xff]  ;;  %v14643_v31 = vld [vmem:[#allocation22_spill] sm:$0xff] }
 0x7f2   :  { %v14642_v58 = vld [vmem:[#allocation21_spill] sm:$0xff] }
 0x7f3   :  { %v2105_v22 = vadd.f32 %v8986_v6, %v2035_v39  ;;  %v14634_v39 = vld [vmem:[#allocation13_spill] sm:$0xff]  ;;  %v14644_v6 = vld [vmem:[#allocation23_spill] sm:$0xff] }
 0x7f5   :  { %v2108_v26 = vsub.f32 %v2105_v22, %v12732_v50  ;;  %v14631_v50 = vld [vmem:[#allocation11_spill] sm:$0xff]  ;;  %v14633_v22 = vld [vmem:[#allocation12_spill] sm:$0xff] }
 0x7f7   :  { %v2109_v21 = vmul.f32 0.03125, %v2108_v26  ;;  %v14645_v26 = vld [vmem:[#allocation24_spill] sm:$0xff] }
 0x7f9   :  { %8535 = vmatmul.mubr.msk.f32.vlgmr.msra.gmra.mrb[20].mxu0 %vm524_vm0, %v2109_v21  ;;  %8536 = vmatmul.mubr.msk.f32.vlgmr.msra.gmra.mrb[20].mxu1 %vm524_vm0, %v2109_v21 }
 0x7fa   :  { %10574 = vmatpush1.bf16.msra.mxu0 %v12764_v57  ;;  %10582 = vmatpush1.bf16.msra.mxu1 %v12766_v11 }
 0x7fb   :  { %10576 = vmatprep.subr.bf16.mxu0 %v12772_v52  ;;  %10584 = vmatprep.subr.bf16.mxu1 %v12774_v29 }
 0x7fc   :  { %2319 = vmatprep.mubr.f32.mxu0 %v14557_v20  ;;  %2390 = vmatprep.mubr.f32.mxu1 %v14557_v20 }
 0x7fe   :  { %10578 = vmatpush1.bf16.msra.mxu0 %v12789_v14  ;;  %10586 = vmatpush1.bf16.msra.mxu1 %v12791_v61 }
 0x7ff   :  { %10588 = vmatprep.subr.bf16.mxu0 %v12007_v3  ;;  %10620 = vmatprep.subr.bf16.mxu1 %v12020_v8 }
 0x801   :  { %8537 = vmatmul.mubr.msk.f32.vlgmr.msra.gmra.mrb[22].mxu0 %vm524_vm0, %v2109_v21  ;;  %8538 = vmatmul.mubr.msk.f32.vlgmr.msra.gmra.mrb[22].mxu1 %vm524_vm0, %v2109_v21  ;;  %v14646_v21 = vld [vmem:[#allocation25_spill] sm:$0xff] }
 0x802   :  { %10590 = vmatpush3.bf16.msra.mxu0 %v12018_v7  ;;  %10622 = vmatpush3.bf16.msra.mxu1 %v12032_v12 }
 0x803   :  { %10592 = vmatprep.subr.bf16.mxu0 %v12045_v16  ;;  %10624 = vmatprep.subr.bf16.mxu1 %v14631_v50 }
 0x806   :  { %10594 = vmatpush3.bf16.msra.mxu0 %v14632_v41  ;;  %10626 = vmatpush3.bf16.msra.mxu1 %v14633_v22 }
 0x807   :  { %10596 = vmatprep.subr.bf16.mxu0 %v14634_v39  ;;  %10628 = vmatprep.subr.bf16.mxu1 %v14635_v56 }
 0x80a   :  { %10598 = vmatpush3.bf16.msra.mxu0 %v14636_v5  ;;  %10630 = vmatpush3.bf16.msra.mxu1 %v14637_v33 }
 0x80b   :  { %10600 = vmatprep.subr.bf16.mxu0 %v14638_v27  ;;  %10632 = vmatprep.subr.bf16.mxu1 %v14639_v32 }
 0x80e   :  { %10602 = vmatpush3.bf16.msra.mxu0 %v14640_v34  ;;  %10634 = vmatpush3.bf16.msra.mxu1 %v14641_v24  ;;  %v14651_v34 = vld [vmem:[#allocation30_spill] sm:$0xff]  ;;  %v14652_v24 = vld [vmem:[#allocation32_spill] sm:$0xff] }
 0x80f   :  { %10604 = vmatprep.subr.bf16.mxu0 %v14642_v58  ;;  %10636 = vmatprep.subr.bf16.mxu1 %v14643_v31  ;;  %v14653_v58 = vld [vmem:[#allocation35_spill] sm:$0xff]  ;;  %v14654_v31 = vld [vmem:[#allocation36_spill] sm:$0xff] }
 0x812   :  { %10606 = vmatpush3.bf16.msra.mxu0 %v14644_v6  ;;  %10638 = vmatpush3.bf16.msra.mxu1 %v14645_v26  ;;  %v14655_v6 = vld [vmem:[#allocation37_spill] sm:$0xff]  ;;  %v14656_v26 = vld [vmem:[#allocation39_spill] sm:$0xff] }
 0x813   :  { %10608 = vmatprep.subr.bf16.mxu0 %v14646_v21  ;;  %10640 = vmatprep.subr.bf16.mxu1 %v14647_v47  ;;  %v14657_v21 = vld [vmem:[#allocation40_spill] sm:$0xff]  ;;  %v14658_v47 = vld [vmem:[#allocation41_spill] sm:$0xff] }
 0x816   :  { %10610 = vmatpush3.bf16.msra.mxu0 %v14648_v9  ;;  %10642 = vmatpush3.bf16.msra.mxu1 %v14649_v0  ;;  %v14659_v9 = vld [vmem:[#allocation42_spill] sm:$0xff] }
 0x817   :  { %10612 = vmatprep.subr.bf16.mxu0 %v14650_v46  ;;  %10644 = vmatprep.subr.bf16.mxu1 %v14651_v34 }
 0x81a   :  { %10614 = vmatpush3.bf16.msra.mxu0 %v14652_v24  ;;  %10646 = vmatpush3.bf16.msra.mxu1 %v14653_v58 }
 0x81b   :  { %10616 = vmatprep.subr.bf16.mxu0 %v14654_v31  ;;  %10648 = vmatprep.subr.bf16.mxu1 %v14655_v6 }
 0x81e   :  { %10618 = vmatpush3.bf16.msra.mxu0 %v14656_v26  ;;  %10650 = vmatpush3.bf16.msra.mxu1 %v14657_v21 }
 0x81f   :  { %10652 = vmatprep.subr.bf16.mxu0 %v14658_v47  ;;  %10684 = vmatprep.subr.bf16.mxu1 %v14659_v9 }
 0x8cc   :  { %v2179_v0 = vpop.f32.mrb[20].mxu0  ;;  %v2250_v46 = vpop.f32.mrb[20].mxu1 }
 0x8cd   :  { %v2397_v32 = vmul.f32 %v2179_v0, %v2179_v0  ;;  %v2181_v34 = vpop.f32.mrb[21].mxu0  ;;  %v2252_v27 = vpop.f32.mrb[21].mxu1  ;;  %v2399_v24 = vmul.f32 %v2250_v46, %v2250_v46 }
 0x8ce   :  { %v2398_v33 = vmul.f32 %v2181_v34, %v2181_v34  ;;  %v2400_v6 = vmul.f32 %v2252_v27, %v2252_v27 }
 0x8cf   :  { %v2405_v58 = vsel %vm820_vm1, %v2397_v32, 0.0  ;;  %v2408_v26 = vsel %vm820_vm1, %v2399_v24, 0.0 }
 0x8d0   :  { %v2406_v31 = vsel %vm820_vm1, %v2398_v33, 0.0  ;;  %v2410_v47 = vsel %vm820_vm1, %v2400_v6, 0.0 }
 0x8d1   :  { %v2407_v5 = vadd.f32 %v2406_v31, %v2405_v58 }
 0x8d3   :  { %v2409_v21 = vadd.f32 %v2408_v26, %v2407_v5 }
 0x8d4   :  { %v2321_v56 = vpop.f32.mrb[22].mxu0  ;;  %v2392_v9 = vpop.f32.mrb[22].mxu1 }
 0x8d5   :  { %v2411_v39 = vadd.f32 %v2410_v47, %v2409_v21  ;;  %v2401_v22 = vmul.f32 %v2321_v56, %v2321_v56  ;;  %v2323_v41 = vpop.f32.mrb[23].mxu0  ;;  %v2394_v50 = vpop.f32.mrb[23].mxu1  ;;  %v2403_v7 = vmul.f32 %v2392_v9, %v2392_v9 }
 0x8d6   :  { %v2402_v16 = vmul.f32 %v2323_v41, %v2323_v41  ;;  %v2404_v8 = vmul.f32 %v2394_v50, %v2394_v50 }
 0x8d7   :  { %v2412_v12 = vsel %vm820_vm1, %v2401_v22, 0.0  ;;  %v2416_v24 = vsel %vm820_vm1, %v2403_v7, 0.0 }
 0x8d8   :  { %v2413_v32 = vadd.f32 %v2412_v12, %v2411_v39  ;;  %v2414_v33 = vsel %vm820_vm1, %v2402_v16, 0.0  ;;  %v2418_v31 = vsel %vm820_vm1, %v2404_v8, 0.0 }
 0x8da   :  { %v2415_v58 = vadd.f32 %v2414_v33, %v2413_v32 }
 0x8dc   :  { %v2417_v5 = vadd.f32 %v2416_v24, %v2415_v58 }
 0x8de   :  { %v2419_v6 = vadd.f32 %v2418_v31, %v2417_v5 }
 0x8e0   :  { %2420 = vadd.xlane.f32.xlu0 %v2419_v6 }
 0x96d   :  { %v2421_v26 = vpop.xlane.xlu0 %2420 }
 0x96e   :  { %11857 = vrsqrt.f32 %v2421_v26  ;;  %vm2424_vm12 = vcmp.eq.f32.partialorder %v2421_v26, inf  ;;  %v2427_v3 = vand.u32 2147483648, %v2421_v26  ;;  %vm2426_vm13 = vcmp.eq.f32.partialorder %v2421_v26, 0.0 }
 0x978   :  { %v11858_v21 = vpop.eup %11857 }
 0x979   :  { %v2423_v47 = vmul.f32 %v11858_v21, %v2421_v26 }
 0x97b   :  { %v2425_v22 = vsel %vm2424_vm12, %v2421_v26, %v2423_v47 }
 0x97c   :  { %v2428_v12 = vsel %vm2426_vm13, %v2427_v3, %v2425_v22 }
 0x97d   :  { %v2429_v39 = vadd.f32 1e-10, %v2428_v12 }
 0x97f   :  { %11859 = vrcp.f32 %v2429_v39 }
 0x989   :  { %v11860_v16 = vpop.eup %11859 }
 0x98a   :  { %v2431_v32 = vmul.f32 0.1, %v11860_v16 }
 0x98c   :  { %v2432_v33 = vmul.f32 %v2431_v32, %v2179_v0  ;;  %v2433_v7 = vmul.f32 %v2431_v32, %v2181_v34  ;;  %v2434_v58 = vmul.f32 %v2431_v32, %v2250_v46  ;;  %v2435_v24 = vmul.f32 %v2431_v32, %v2252_v27 }
 0x98d   :  { %v2436_v8 = vmul.f32 %v2431_v32, %v2321_v56  ;;  %v2437_v5 = vmul.f32 %v2431_v32, %v2323_v41  ;;  %v2438_v31 = vmul.f32 %v2431_v32, %v2392_v9  ;;  %v2439_v6 = vmul.f32 %v2431_v32, %v2394_v50 }
 0x98e   :  { %v2448_v61 = vcombine.low %v2432_v33, %v2433_v7  ;;  %v2449_v14 = vcombine.low %v2434_v58, %v2435_v24 }
 0x98f   :  { %v2465_v21 = vcombine.low %v2436_v8, %v2437_v5  ;;  %v2466_v29 = vcombine.low %v2438_v31, %v2439_v6 }
 0x990   :  { %v2456_v47 = vrot.slane %v2448_v61, %v12213_v19  ;;  %v2463_v3 = vrot.slane %v2449_v14, %v12213_v19 }
 0x991   :  { %v2473_v26 = vrot.slane %v2465_v21, %v12213_v19  ;;  %v2480_v22 = vrot.slane %v2466_v29, %v12213_v19 }
 0x992   :  { %v2464_v0 = vcombine.low %v2456_v47, %v2463_v3 }
 0x993   :  { %v2481_v34 = vcombine.low %v2473_v26, %v2480_v22 }
 0x994   :  { %v2484_v27 = vadd.f32 %v2464_v0, %v13013_v40 }
 0x995   :  { %v2485_v41 = vadd.f32 %v2481_v34, %v13016_v48 }
 0x996   :  { %v2486_v50 = vsub.f32 %v2484_v27, %v12990_v43 }
 0x997   :  { %v2487_v56 = vsub.f32 %v2485_v41, %v12996_v17 }
 0x998   :  { %v2488_v9 = vmul.f32 %v2486_v50, %v2486_v50 }
 0x999   :  { %v2489_v46 = vmul.f32 %v2487_v56, %v2487_v56 }
 0x99a   :  { %v2492_v12 = vcombine.high %v2488_v9, %v2488_v9  ;;  %v2499_v61 = vrot.slane %v2488_v9, %v12213_v19 }
 0x99b   :  { %v2509_v16 = vcombine.high %v2489_v46, %v2489_v46  ;;  %v2516_v32 = vrot.slane %v2489_v46, %v12213_v19 }
 0x99c   :  { %v2506_v14 = vrot.slane %v2492_v12, %v12213_v19  ;;  %v2507_v39 = vcombine.high %v2499_v61, %v2499_v61  ;;  %v2534_v40 = vsel %vm820_vm1, %v2499_v61, 0.0 }
 0x99d   :  { %v2523_v24 = vrot.slane %v2509_v16, %v12213_v19  ;;  %v2524_v8 = vcombine.high %v2516_v32, %v2516_v32  ;;  %v2541_v6 = vsel %vm820_vm1, %v2516_v32, 0.0 }
 0x99e   :  { %v2508_v29 = vcombine.high %v2506_v14, %v2506_v14  ;;  %v2535_v48 = vsel %vm820_vm1, %v2507_v39, 0.0  ;;  %v2537_v7 = vsel %vm820_vm1, %v2506_v14, 0.0 }
 0x99f   :  { %v2536_v33 = vadd.f32 %v2535_v48, %v2534_v40  ;;  %v2525_v47 = vcombine.high %v2523_v24, %v2523_v24  ;;  %v2543_v3 = vsel %vm820_vm1, %v2524_v8, 0.0  ;;  %v2545_v22 = vsel %vm820_vm1, %v2523_v24, 0.0 }
 0x9a0   :  { %v2539_v5 = vsel %vm820_vm1, %v2508_v29, 0.0 }
 0x9a1   :  { %v2538_v58 = vadd.f32 %v2537_v7, %v2536_v33  ;;  %v2547_v34 = vsel %vm820_vm1, %v2525_v47, 0.0 }
 0x9a3   :  { %v2540_v31 = vadd.f32 %v2539_v5, %v2538_v58 }
 0x9a5   :  { %v2542_v21 = vadd.f32 %v2541_v6, %v2540_v31 }
 0x9a7   :  { %v2544_v26 = vadd.f32 %v2543_v3, %v2542_v21 }
 0x9a9   :  { %v2546_v0 = vadd.f32 %v2545_v22, %v2544_v26  ;;  %v14660_v26 = vld [vmem:[#allocation65_spill] sm:$0xff]  ;;  %v14661_v22 = vld [vmem:[#allocation67_spill] sm:$0xff] }
 0x9ab   :  { %v2548_v27 = vadd.f32 %v2547_v34, %v2546_v0  ;;  %v14662_v0 = vld [vmem:[#allocation68_spill] sm:$0xff]  ;;  %v14663_v34 = vld [vmem:[#allocation70_spill] sm:$0xff] }
 0x9ad   :  { %2549 = vadd.xlane.f32.xlu1 %v2548_v27  ;;  %v14664_v27 = vld [vmem:[#allocation69_spill] sm:$0xff] }
 0xa3a   :  { %v2550_v41 = vpop.xlane.xlu1 %2549 }
 0xa3b   :  { %11861 = vrsqrt.f32 %v2550_v41  ;;  %vm2553_vm14 = vcmp.eq.f32.partialorder %v2550_v41, inf  ;;  %v2556_v12 = vand.u32 2147483648, %v2550_v41  ;;  %vm2555_vm15 = vcmp.eq.f32.partialorder %v2550_v41, 0.0 }
 0xa45   :  { %v11862_v9 = vpop.eup %11861 }
 0xa46   :  { %v2552_v46 = vmul.f32 %v11862_v9, %v2550_v41  ;;  %v14666_v9 = vld [vmem:[#allocation72_spill] sm:$0xff] }
 0xa48   :  { %v2554_v61 = vsel %vm2553_vm14, %v2550_v41, %v2552_v46  ;;  %v14665_v41 = vld [vmem:[#allocation71_spill] sm:$0xff]  ;;  %v14667_v46 = vld [vmem:[#allocation74_spill] sm:$0xff] }
 0xa49   :  { %v2557_v14 = vsel %vm2555_vm15, %v2556_v12, %v2554_v61  ;;  %v14668_v12 = vld [vmem:[#allocation73_spill] sm:$0xff]  ;;  %v14669_v61 = vld [vmem:[#allocation75_spill] sm:$0xff] }
 0xa4a   :  { %v2559_v39 = vadd.f32 1e-07, %v2557_v14  ;;  %vm2558_vm2 = vcmp.gt.f32.partialorder %v2557_v14, 0.1  ;;  %v14670_v14 = vld [vmem:[#allocation76_spill] sm:$0xff] }
 0xa4c   :  { %11863 = vrcp.f32 %v2559_v39  ;;  %v14671_v39 = vld [vmem:[#allocation78_spill] sm:$0xff] }
 0xa56   :  { %v11864_v16 = vpop.eup %11863 }
 0xa57   :  { %v2561_v29 = vmul.f32 0.1, %v11864_v16  ;;  %v14672_v16 = vld [vmem:[#allocation77_spill] sm:$0xff] }
 0xa59   :  { %v2562_v32 = vsel %vm2558_vm2, %v2561_v29, 1.0  ;;  %v14673_v29 = vld [vmem:[#allocation79_spill] sm:$0xff] }
 0xa5a   :  { %v2570_v40 = vrot.slane %v2562_v32, %v12864_v53 }
 0xa5c   :  { %v2572_v48 = vmul.f32 %v2570_v40, %v2486_v50  ;;  %v2573_v33 = vmul.f32 %v2570_v40, %v2487_v56 }
 0xa5e   :  { %v13148_v7 = vadd.f32 %v12990_v43, %v2572_v48  ;;  %v13151_v58 = vadd.f32 %v12996_v17, %v2573_v33 }
 0xa60   :  { %v2585_v24 = vrot.slane %v13148_v7, %v12213_v19  ;;  %v2578_v8 = vcombine.high %v13148_v7, %v13148_v7  ;;  %v2595_v5 = vcombine.high %v13151_v58, %v13151_v58  ;;  %v2602_v31 = vrot.slane %v13151_v58, %v12213_v19 }
 0xa62   :  { %v2593_v50 = vcombine.high %v2585_v24, %v2585_v24  ;;  %v2592_v56 = vrot.slane %v2578_v8, %v12213_v19  ;;  %v2609_v6 = vrot.slane %v2595_v5, %v12213_v19  ;;  %v2610_v47 = vcombine.high %v2602_v31, %v2602_v31  ;;  %v13208_v8 = vld [vmem:[%s14292_s4] ss:$0 sm:$0xff] }
 0xa63   :  { %14674 = vst [vmem:[#allocation43_spill] sm:$0xff] %v13208_v8 }
 0xa64   :  { %2684 = vmatprep.mubr.f32.mxu0 %v2593_v50  ;;  %v2594_v21 = vcombine.high %v2592_v56, %v2592_v56  ;;  %v2611_v3 = vcombine.high %v2609_v6, %v2609_v6 }
 0xa65   :  { %2685 = vmatmul.mubr.f32.vlgmr.msra.gmra.mrb[24].mxu0 %v2585_v24 }
 0xa66   :  { %10654 = vmatpush3.bf16.msra.mxu0 %v12354_v30  ;;  %2754 = vmatprep.mubr.f32.mxu1 %v2594_v21 }
 0xa67   :  { %2824 = vmatprep.mubr.f32.mxu0 %v2610_v47  ;;  %2755 = vmatmul.mubr.f32.vlgmr.msra.gmra.mrb[24].mxu1 %v2592_v56 }
 0xa68   :  { %10686 = vmatpush3.bf16.msra.mxu1 %v12358_v35  ;;  %10656 = vmatprep.subr.bf16.mxu0 %v12360_v36 }
 0xa69   :  { %2894 = vmatprep.mubr.f32.mxu1 %v2611_v3  ;;  %10688 = vmatprep.subr.bf16.mxu1 %v12372_v44 }
 0xa6a   :  { %10658 = vmatpush3.bf16.msra.mxu0 %v12392_v60 }
 0xa6b   :  { %10660 = vmatprep.subr.bf16.mxu0 %v12398_v63 }
 0xa6c   :  { %10690 = vmatpush3.bf16.msra.mxu1 %v12396_v62 }
 0xa6d   :  { %10692 = vmatprep.subr.bf16.mxu1 %v14558_v28 }
 0xa6e   :  { %10662 = vmatpush3.bf16.msra.mxu0 %v14559_v15 }
 0xa6f   :  { %10664 = vmatprep.subr.bf16.mxu0 %v14560_v18 }
 0xa70   :  { %10694 = vmatpush3.bf16.msra.mxu1 %v14561_v13 }
 0xa71   :  { %10696 = vmatprep.subr.bf16.mxu1 %v14562_v59 }
 0xa72   :  { %10666 = vmatpush3.bf16.msra.mxu0 %v14563_v55 }
 0xa73   :  { %10668 = vmatprep.subr.bf16.mxu0 %v14564_v45 }
 0xa74   :  { %10698 = vmatpush3.bf16.msra.mxu1 %v14565_v23 }
 0xa75   :  { %10700 = vmatprep.subr.bf16.mxu1 %v14566_v54 }
 0xa76   :  { %10670 = vmatpush3.bf16.msra.mxu0 %v14567_v42 }
 0xa77   :  { %10672 = vmatprep.subr.bf16.mxu0 %v14568_v10 }
 0xa78   :  { %10702 = vmatpush3.bf16.msra.mxu1 %v14609_v1 }
 0xa79   :  { %10704 = vmatprep.subr.bf16.mxu1 %v14610_v51 }
 0xa7a   :  { %10674 = vmatpush3.bf16.msra.mxu0 %v14611_v25 }
 0xa7b   :  { %10676 = vmatprep.subr.bf16.mxu0 %v14612_v2 }
 0xa7c   :  { %10706 = vmatpush3.bf16.msra.mxu1 %v14613_v49 }
 0xa7d   :  { %10708 = vmatprep.subr.bf16.mxu1 %v14614_v37 }
 0xa7e   :  { %10678 = vmatpush3.bf16.msra.mxu0 %v14615_v4 }
 0xa7f   :  { %10680 = vmatprep.subr.bf16.mxu0 %v14616_v38 }
 0xa80   :  { %10710 = vmatpush3.bf16.msra.mxu1 %v14660_v26 }
 0xa81   :  { %10712 = vmatprep.subr.bf16.mxu1 %v14661_v22 }
 0xa82   :  { %10682 = vmatpush3.bf16.msra.mxu0 %v14662_v0 }
 0xa83   :  { %10716 = vmatprep.subr.bf16.mxu0 %v14663_v34 }
 0xa84   :  { %10714 = vmatpush3.bf16.msra.mxu1 %v14664_v27 }
 0xa85   :  { %2825 = vmatmul.mubr.f32.vlgmr.msra.gmra.mrb[26].mxu0 %v2602_v31  ;;  %10724 = vmatprep.subr.bf16.mxu1 %v14665_v41 }
 0xa86   :  { %10718 = vmatpush1.bf16.msra.mxu0 %v14666_v9  ;;  %2969 = vmatprep.mubr.f32.mxu0 %v14557_v20 }
 0xa87   :  { %2895 = vmatmul.mubr.f32.vlgmr.msra.gmra.mrb[26].mxu1 %v2609_v6  ;;  %10720 = vmatprep.subr.bf16.mxu0 %v14667_v46 }
 0xa88   :  { %10726 = vmatpush1.bf16.msra.mxu1 %v14668_v12  ;;  %3040 = vmatprep.mubr.f32.mxu1 %v14557_v20 }
 0xa89   :  { %10728 = vmatprep.subr.bf16.mxu1 %v14669_v61 }
 0xa8a   :  { %10722 = vmatpush1.bf16.msra.mxu0 %v14670_v14 }
 0xa8b   :  { %10732 = vmatprep.subr.bf16.mxu0 %v14671_v39 }
 0xa8c   :  { %10730 = vmatpush1.bf16.msra.mxu1 %v14672_v16 }
 0xa8d   :  { %10740 = vmatprep.subr.bf16.mxu1 %v14673_v29 }
 0xb38   :  { %v9019_v32 = vpop.f32.mrb[24].mxu0 }
 0xb39   :  { %v9020_v40 = vpop.f32.mrb[25].mxu0 }
 0xb3a   :  { %v9021_v48 = vadd.f32 %v9020_v40, %v9019_v32  ;;  %v9054_v33 = vpop.f32.mrb[24].mxu1  ;;  %v13214_v32 = vld [vmem:[%s14289_s1] sm:$0x3] }
 0xb3b   :  { %v9055_v24 = vpop.f32.mrb[25].mxu1  ;;  %14675 = vst [vmem:[#allocation44_spill] sm:$0xff] %v13214_v32 }
 0xb3c   :  { %v2687_v5 = vadd.f32 %v13208_v8, %v9021_v48  ;;  %v9056_v31 = vadd.f32 %v9055_v24, %v9054_v33  ;;  %v14676_v48 = vld [vmem:[#allocation86_spill] sm:$0xff]  ;;  %v14680_v33 = vld [vmem:[#allocation7_spill] sm:$0xff] }
 0xb3d   :  { %v14681_v24 = vld [vmem:[#allocation6_spill] sm:$0xff] }
 0xb3e   :  { %v2757_v50 = vadd.f32 %v9056_v31, %v2687_v5  ;;  %v14682_v5 = vld [vmem:[#allocation8_spill] sm:$0xff]  ;;  %v14683_v31 = vld [vmem:[#allocation9_spill] sm:$0xff] }
 0xb58   :  { %v9089_v56 = vpop.f32.mrb[26].mxu0 }
 0xb59   :  { %v9090_v6 = vpop.f32.mrb[27].mxu0 }
 0xb5a   :  { %v9091_v21 = vadd.f32 %v9090_v6, %v9089_v56  ;;  %v9124_v47 = vpop.f32.mrb[26].mxu1  ;;  %v14685_v56 = vld [vmem:[#allocation10_spill] sm:$0xff]  ;;  %v14686_v6 = vld [vmem:[#allocation12_spill] sm:$0xff] }
 0xb5b   :  { %v9125_v3 = vpop.f32.mrb[27].mxu1 }
 0xb5c   :  { %v2827_v29 = vadd.f32 %v9091_v21, %v2757_v50  ;;  %v9126_v16 = vadd.f32 %v9125_v3, %v9124_v47  ;;  %v14684_v50 = vld [vmem:[#allocation11_spill] sm:$0xff]  ;;  %v14687_v21 = vld [vmem:[#allocation13_spill] sm:$0xff]  ;;  %v14689_v3 = vld [vmem:[#allocation14_spill] sm:$0xff] }
 0xb5d   :  { %v14688_v47 = vld [vmem:[#allocation15_spill] sm:$0xff] }
 0xb5e   :  { %v2897_v39 = vadd.f32 %v9126_v16, %v2827_v29  ;;  %v14677_v16 = vld [vmem:[#allocation87_spill] sm:$0xff]  ;;  %v14679_v29 = vld [vmem:[#allocation5_spill] sm:$0xff] }
 0xb60   :  { %v2900_v40 = vsub.f32 %v2897_v39, %v13214_v32  ;;  %v14678_v39 = vld [vmem:[#allocation88_spill] sm:$0xff] }
 0xb62   :  { %v2901_v14 = vmul.f32 0.03125, %v2900_v40  ;;  %v14690_v40 = vld [vmem:[#allocation16_spill] sm:$0xff] }
 0xb64   :  { %8539 = vmatmul.mubr.msk.f32.vlgmr.msra.gmra.mrb[28].mxu0 %vm524_vm0, %v2901_v14  ;;  %8540 = vmatmul.mubr.msk.f32.vlgmr.msra.gmra.mrb[28].mxu1 %vm524_vm0, %v2901_v14 }
 0xb65   :  { %10734 = vmatpush1.bf16.msra.mxu0 %v12764_v57  ;;  %10742 = vmatpush1.bf16.msra.mxu1 %v12766_v11 }
 0xb66   :  { %10736 = vmatprep.subr.bf16.mxu0 %v12772_v52  ;;  %10744 = vmatprep.subr.bf16.mxu1 %v14676_v48 }
 0xb67   :  { %3111 = vmatprep.mubr.f32.mxu0 %v14557_v20  ;;  %3182 = vmatprep.mubr.f32.mxu1 %v14557_v20 }
 0xb69   :  { %10738 = vmatpush1.bf16.msra.mxu0 %v14677_v16  ;;  %10746 = vmatpush1.bf16.msra.mxu1 %v14678_v39 }
 0xb6a   :  { %10748 = vmatprep.subr.bf16.mxu0 %v14679_v29  ;;  %10780 = vmatprep.subr.bf16.mxu1 %v14680_v33 }
 0xb6c   :  { %8541 = vmatmul.mubr.msk.f32.vlgmr.msra.gmra.mrb[30].mxu0 %vm524_vm0, %v2901_v14  ;;  %8542 = vmatmul.mubr.msk.f32.vlgmr.msra.gmra.mrb[30].mxu1 %vm524_vm0, %v2901_v14  ;;  %v14691_v14 = vld [vmem:[#allocation17_spill] sm:$0xff] }
 0xb6d   :  { %10750 = vmatpush3.bf16.msra.mxu0 %v14681_v24  ;;  %10782 = vmatpush3.bf16.msra.mxu1 %v14682_v5  ;;  %v14692_v24 = vld [vmem:[#allocation18_spill] sm:$0xff]  ;;  %v14693_v5 = vld [vmem:[#allocation19_spill] sm:$0xff] }
 0xb6e   :  { %10752 = vmatprep.subr.bf16.mxu0 %v14683_v31  ;;  %10784 = vmatprep.subr.bf16.mxu1 %v14684_v50  ;;  %v14694_v31 = vld [vmem:[#allocation20_spill] sm:$0xff]  ;;  %v14695_v50 = vld [vmem:[#allocation21_spill] sm:$0xff] }
 0xb71   :  { %10754 = vmatpush3.bf16.msra.mxu0 %v14685_v56  ;;  %10786 = vmatpush3.bf16.msra.mxu1 %v14686_v6  ;;  %v14696_v56 = vld [vmem:[#allocation22_spill] sm:$0xff]  ;;  %v14697_v6 = vld [vmem:[#allocation23_spill] sm:$0xff] }
 0xb72   :  { %10756 = vmatprep.subr.bf16.mxu0 %v14687_v21  ;;  %10788 = vmatprep.subr.bf16.mxu1 %v14688_v47  ;;  %v14698_v21 = vld [vmem:[#allocation24_spill] sm:$0xff]  ;;  %v14699_v47 = vld [vmem:[#allocation25_spill] sm:$0xff] }
 0xb75   :  { %10758 = vmatpush3.bf16.msra.mxu0 %v14689_v3  ;;  %10790 = vmatpush3.bf16.msra.mxu1 %v14690_v40  ;;  %v14700_v3 = vld [vmem:[#allocation26_spill] sm:$0xff]  ;;  %v14701_v40 = vld [vmem:[#allocation27_spill] sm:$0xff] }
 0xb76   :  { %10760 = vmatprep.subr.bf16.mxu0 %v14691_v14  ;;  %10792 = vmatprep.subr.bf16.mxu1 %v14692_v24  ;;  %v14702_v14 = vld [vmem:[#allocation28_spill] sm:$0xff]  ;;  %v14703_v24 = vld [vmem:[#allocation29_spill] sm:$0xff] }
 0xb79   :  { %10762 = vmatpush3.bf16.msra.mxu0 %v14693_v5  ;;  %10794 = vmatpush3.bf16.msra.mxu1 %v14694_v31  ;;  %v14704_v5 = vld [vmem:[#allocation30_spill] sm:$0xff]  ;;  %v14705_v31 = vld [vmem:[#allocation32_spill] sm:$0xff] }
 0xb7a   :  { %10764 = vmatprep.subr.bf16.mxu0 %v14695_v50  ;;  %10796 = vmatprep.subr.bf16.mxu1 %v14696_v56  ;;  %v14706_v50 = vld [vmem:[#allocation35_spill] sm:$0xff]  ;;  %v14707_v56 = vld [vmem:[#allocation36_spill] sm:$0xff] }
 0xb7d   :  { %10766 = vmatpush3.bf16.msra.mxu0 %v14697_v6  ;;  %10798 = vmatpush3.bf16.msra.mxu1 %v14698_v21  ;;  %v14708_v6 = vld [vmem:[#allocation37_spill] sm:$0xff]  ;;  %v14709_v21 = vld [vmem:[#allocation39_spill] sm:$0xff] }
 0xb7e   :  { %10768 = vmatprep.subr.bf16.mxu0 %v14699_v47  ;;  %10800 = vmatprep.subr.bf16.mxu1 %v14700_v3  ;;  %v14710_v47 = vld [vmem:[#allocation40_spill] sm:$0xff]  ;;  %v14711_v3 = vld [vmem:[#allocation41_spill] sm:$0xff] }
 0xb81   :  { %10770 = vmatpush3.bf16.msra.mxu0 %v14701_v40  ;;  %10802 = vmatpush3.bf16.msra.mxu1 %v14702_v14  ;;  %v14712_v40 = vld [vmem:[#allocation42_spill] sm:$0xff] }
 0xb82   :  { %10772 = vmatprep.subr.bf16.mxu0 %v14703_v24  ;;  %10804 = vmatprep.subr.bf16.mxu1 %v14704_v5 }
 0xb85   :  { %10774 = vmatpush3.bf16.msra.mxu0 %v14705_v31  ;;  %10806 = vmatpush3.bf16.msra.mxu1 %v14706_v50 }
 0xb86   :  { %10776 = vmatprep.subr.bf16.mxu0 %v14707_v56  ;;  %10808 = vmatprep.subr.bf16.mxu1 %v14708_v6 }
 0xb89   :  { %10778 = vmatpush3.bf16.msra.mxu0 %v14709_v21  ;;  %10810 = vmatpush3.bf16.msra.mxu1 %v14710_v47 }
 0xb8a   :  { %10812 = vmatprep.subr.bf16.mxu0 %v14711_v3  ;;  %10844 = vmatprep.subr.bf16.mxu1 %v14712_v40 }
 0xc37   :  { %v2971_v14 = vpop.f32.mrb[28].mxu0  ;;  %v3042_v24 = vpop.f32.mrb[28].mxu1 }
 0xc38   :  { %v3189_v33 = vmul.f32 %v2971_v14, %v2971_v14  ;;  %v2973_v5 = vpop.f32.mrb[29].mxu0  ;;  %v3044_v29 = vpop.f32.mrb[29].mxu1  ;;  %v3191_v31 = vmul.f32 %v3042_v24, %v3042_v24 }
 0xc39   :  { %v3190_v39 = vmul.f32 %v2973_v5, %v2973_v5  ;;  %v3192_v6 = vmul.f32 %v3044_v29, %v3044_v29 }
 0xc3a   :  { %v3197_v50 = vsel %vm820_vm1, %v3189_v33, 0.0  ;;  %v3200_v21 = vsel %vm820_vm1, %v3191_v31, 0.0 }
 0xc3b   :  { %v3198_v56 = vsel %vm820_vm1, %v3190_v39, 0.0  ;;  %v3202_v3 = vsel %vm820_vm1, %v3192_v6, 0.0 }
 0xc3c   :  { %v3199_v16 = vadd.f32 %v3198_v56, %v3197_v50 }
 0xc3e   :  { %v3201_v47 = vadd.f32 %v3200_v21, %v3199_v16 }
 0xc3f   :  { %v3113_v48 = vpop.f32.mrb[30].mxu0  ;;  %v3184_v40 = vpop.f32.mrb[30].mxu1 }
 0xc40   :  { %v3203_v52 = vadd.f32 %v3202_v3, %v3201_v47  ;;  %v3193_v11 = vmul.f32 %v3113_v48, %v3113_v48  ;;  %v3115_v57 = vpop.f32.mrb[31].mxu0  ;;  %v3186_v32 = vpop.f32.mrb[31].mxu1  ;;  %v3195_v12 = vmul.f32 %v3184_v40, %v3184_v40 }
 0xc41   :  { %v3194_v8 = vmul.f32 %v3115_v57, %v3115_v57  ;;  %v3196_v46 = vmul.f32 %v3186_v32, %v3186_v32 }
 0xc42   :  { %v3204_v61 = vsel %vm820_vm1, %v3193_v11, 0.0  ;;  %v3208_v31 = vsel %vm820_vm1, %v3195_v12, 0.0 }
 0xc43   :  { %v3205_v33 = vadd.f32 %v3204_v61, %v3203_v52  ;;  %v3206_v39 = vsel %vm820_vm1, %v3194_v8, 0.0  ;;  %v3210_v56 = vsel %vm820_vm1, %v3196_v46, 0.0 }
 0xc45   :  { %v3207_v50 = vadd.f32 %v3206_v39, %v3205_v33 }
 0xc47   :  { %v3209_v16 = vadd.f32 %v3208_v31, %v3207_v50 }
 0xc49   :  { %v3211_v6 = vadd.f32 %v3210_v56, %v3209_v16 }
 0xc4b   :  { %3212 = vadd.xlane.f32.xlu0 %v3211_v6 }
 0xcd8   :  { %v3213_v21 = vpop.xlane.xlu0 %3212 }
 0xcd9   :  { %11865 = vrsqrt.f32 %v3213_v21  ;;  %vm3216_vm3 = vcmp.eq.f32.partialorder %v3213_v21, inf  ;;  %v3219_v20 = vand.u32 2147483648, %v3213_v21  ;;  %vm3218_vm4 = vcmp.eq.f32.partialorder %v3213_v21, 0.0 }
 0xce3   :  { %v11866_v47 = vpop.eup %11865 }
 0xce4   :  { %v3215_v3 = vmul.f32 %v11866_v47, %v3213_v21 }
 0xce6   :  { %v3217_v11 = vsel %vm3216_vm3, %v3213_v21, %v3215_v3 }
 0xce7   :  { %v3220_v52 = vsel %vm3218_vm4, %v3219_v20, %v3217_v11 }
 0xce8   :  { %v3221_v61 = vadd.f32 1e-10, %v3220_v52 }
 0xcea   :  { %11867 = vrcp.f32 %v3221_v61 }
 0xcf4   :  { %v11868_v8 = vpop.eup %11867 }
 0xcf5   :  { %v3223_v33 = vmul.f32 0.1, %v11868_v8 }
 0xcf7   :  { %v3224_v39 = vmul.f32 %v3223_v33, %v2971_v14  ;;  %v3225_v12 = vmul.f32 %v3223_v33, %v2973_v5  ;;  %v3226_v50 = vmul.f32 %v3223_v33, %v3042_v24  ;;  %v3227_v31 = vmul.f32 %v3223_v33, %v3044_v29 }
 0xcf8   :  { %v3228_v46 = vmul.f32 %v3223_v33, %v3113_v48  ;;  %v3229_v16 = vmul.f32 %v3223_v33, %v3115_v57  ;;  %v3230_v56 = vmul.f32 %v3223_v33, %v3184_v40  ;;  %v3231_v6 = vmul.f32 %v3223_v33, %v3186_v32 }
 0xcf9   :  { %v3240_v9 = vcombine.low %v3224_v39, %v3225_v12  ;;  %v3241_v41 = vcombine.low %v3226_v50, %v3227_v31 }
 0xcfa   :  { %v3257_v47 = vcombine.low %v3228_v46, %v3229_v16  ;;  %v3258_v27 = vcombine.low %v3230_v56, %v3231_v6 }
 0xcfb   :  { %v3248_v3 = vrot.slane %v3240_v9, %v12213_v19  ;;  %v3255_v20 = vrot.slane %v3241_v41, %v12213_v19 }
 0xcfc   :  { %v3265_v21 = vrot.slane %v3257_v47, %v12213_v19  ;;  %v3272_v11 = vrot.slane %v3258_v27, %v12213_v19 }
 0xcfd   :  { %v3256_v14 = vcombine.low %v3248_v3, %v3255_v20 }
 0xcfe   :  { %v3273_v5 = vcombine.low %v3265_v21, %v3272_v11 }
 0xcff   :  { %v3276_v29 = vadd.f32 %v3256_v14, %v13148_v7 }
 0xd00   :  { %v3277_v57 = vadd.f32 %v3273_v5, %v13151_v58 }
 0xd01   :  { %v3278_v32 = vsub.f32 %v3276_v29, %v12990_v43 }
 0xd02   :  { %v3279_v48 = vsub.f32 %v3277_v57, %v12996_v17 }
 0xd03   :  { %v3280_v24 = vmul.f32 %v3278_v32, %v3278_v32 }
 0xd04   :  { %v3281_v40 = vmul.f32 %v3279_v48, %v3279_v48 }
 0xd05   :  { %v3284_v52 = vcombine.high %v3280_v24, %v3280_v24  ;;  %v3291_v9 = vrot.slane %v3280_v24, %v12213_v19 }
 0xd06   :  { %v3301_v8 = vcombine.high %v3281_v40, %v3281_v40  ;;  %v3308_v33 = vrot.slane %v3281_v40, %v12213_v19 }
 0xd07   :  { %v3298_v41 = vrot.slane %v3284_v52, %v12213_v19  ;;  %v3299_v61 = vcombine.high %v3291_v9, %v3291_v9  ;;  %v3326_v7 = vsel %vm820_vm1, %v3291_v9, 0.0 }
 0xd08   :  { %v3315_v12 = vrot.slane %v3301_v8, %v12213_v19  ;;  %v3316_v50 = vcombine.high %v3308_v33, %v3308_v33  ;;  %v3333_v16 = vsel %vm820_vm1, %v3308_v33, 0.0 }
 0xd09   :  { %v3300_v27 = vcombine.high %v3298_v41, %v3298_v41  ;;  %v3327_v58 = vsel %vm820_vm1, %v3299_v61, 0.0  ;;  %v3329_v43 = vsel %vm820_vm1, %v3298_v41, 0.0 }
 0xd0a   :  { %v3328_v39 = vadd.f32 %v3327_v58, %v3326_v7  ;;  %v3317_v6 = vcombine.high %v3315_v12, %v3315_v12  ;;  %v3335_v47 = vsel %vm820_vm1, %v3316_v50, 0.0  ;;  %v3337_v20 = vsel %vm820_vm1, %v3315_v12, 0.0  ;;  %v13295_v58 = vld [vmem:[%s14288_s0] sm:$0xff] }
 0xd0b   :  { %v3331_v31 = vsel %vm820_vm1, %v3300_v27, 0.0 }
 0xd0c   :  { %v3330_v17 = vadd.f32 %v3329_v43, %v3328_v39  ;;  %v3339_v11 = vsel %vm820_vm1, %v3317_v6, 0.0  ;;  %v13303_v43 = vld [vmem:[%s14288_s0 + $0x8] sm:$0xff] }
 0xd0e   :  { %v3332_v46 = vadd.f32 %v3331_v31, %v3330_v17 }
 0xd10   :  { %v3334_v56 = vadd.f32 %v3333_v16, %v3332_v46 }
 0xd12   :  { %v3336_v3 = vadd.f32 %v3335_v47, %v3334_v56 }
 0xd14   :  { %v3338_v21 = vadd.f32 %v3337_v20, %v3336_v3  ;;  %v14713_v3 = vld [vmem:[#allocation69_spill] sm:$0xff]  ;;  %v14714_v20 = vld [vmem:[#allocation71_spill] sm:$0xff] }
 0xd16   :  { %v3340_v14 = vadd.f32 %v3339_v11, %v3338_v21  ;;  %v14715_v21 = vld [vmem:[#allocation72_spill] sm:$0xff]  ;;  %v14716_v11 = vmov 0.0  }
 0xd18   :  { %3341 = vadd.xlane.f32.xlu1 %v3340_v14  ;;  %v14717_v14 = vld [vmem:[#allocation74_spill] sm:$0xff] }
 0xda5   :  { %v3342_v5 = vpop.xlane.xlu1 %3341 }
 0xda6   :  { %11869 = vrsqrt.f32 %v3342_v5  ;;  %vm3345_vm5 = vcmp.eq.f32.partialorder %v3342_v5, inf  ;;  %v3348_v24 = vand.u32 2147483648, %v3342_v5  ;;  %vm3347_vm6 = vcmp.eq.f32.partialorder %v3342_v5, 0.0 }
 0xdb0   :  { %v11870_v29 = vpop.eup %11869 }
 0xdb1   :  { %v3344_v57 = vmul.f32 %v11870_v29, %v3342_v5  ;;  %v14719_v29 = vld [vmem:[#allocation75_spill] sm:$0xff] }
 0xdb3   :  { %v3346_v40 = vsel %vm3345_vm5, %v3342_v5, %v3344_v57  ;;  %v14718_v5 = vld [vmem:[#allocation73_spill] sm:$0xff]  ;;  %v14720_v57 = vld [vmem:[#allocation76_spill] sm:$0xff] }
 0xdb4   :  { %v3349_v52 = vsel %vm3347_vm6, %v3348_v24, %v3346_v40  ;;  %v14721_v24 = vld [vmem:[#allocation78_spill] sm:$0xff]  ;;  %v14722_v40 = vld [vmem:[#allocation77_spill] sm:$0xff] }
 0xdb5   :  { %v3351_v9 = vadd.f32 1e-07, %v3349_v52  ;;  %vm3350_vm7 = vcmp.gt.f32.partialorder %v3349_v52, 0.1  ;;  %v14723_v52 = vld [vmem:[#allocation79_spill] sm:$0xff] }
 0xdb7   :  { %11871 = vrcp.f32 %v3351_v9 }
 0xdc1   :  { %v11872_v41 = vpop.eup %11871 }
 0xdc2   :  { %v3353_v61 = vmul.f32 0.1, %v11872_v41 }
 0xdc4   :  { %v3354_v8 = vsel %vm3350_vm7, %v3353_v61, 1.0 }
 0xdc5   :  { %v3362_v27 = vrot.slane %v3354_v8, %v12864_v53 }
 0xdc7   :  { %v3364_v33 = vmul.f32 %v3362_v27, %v3278_v32  ;;  %v3365_v7 = vmul.f32 %v3362_v27, %v3279_v48 }
 0xdc9   :  { %v13298_v39 = vadd.f32 %v13295_v58, %v3364_v33  ;;  %v13306_v17 = vadd.f32 %v13303_v43, %v3365_v7  ;;  %v14724_v33 = vld [vmem:[#allocation43_spill] sm:$0xff] }
 0xdcb   :  { %v3377_v32 = vrot.slane %v13298_v39, %v12213_v19  ;;  %v3370_v48 = vcombine.high %v13298_v39, %v13298_v39  ;;  %v3387_v12 = vcombine.high %v13306_v17, %v13306_v17  ;;  %v3394_v50 = vrot.slane %v13306_v17, %v12213_v19 }
 0xdcd   :  { %v3385_v31 = vcombine.high %v3377_v32, %v3377_v32  ;;  %v3384_v46 = vrot.slane %v3370_v48, %v12213_v19  ;;  %v3401_v16 = vrot.slane %v3387_v12, %v12213_v19  ;;  %v3402_v6 = vcombine.high %v3394_v50, %v3394_v50 }
 0xdcf   :  { %3476 = vmatprep.mubr.f32.mxu0 %v3385_v31  ;;  %v3386_v56 = vcombine.high %v3384_v46, %v3384_v46  ;;  %v3403_v47 = vcombine.high %v3401_v16, %v3401_v16 }
 0xdd0   :  { %3477 = vmatmul.mubr.f32.vlgmr.msra.gmra.mrb[32].mxu0 %v3377_v32 }
 0xdd1   :  { %10814 = vmatpush3.bf16.msra.mxu0 %v12354_v30  ;;  %3546 = vmatprep.mubr.f32.mxu1 %v3386_v56 }
 0xdd2   :  { %3616 = vmatprep.mubr.f32.mxu0 %v3402_v6  ;;  %3547 = vmatmul.mubr.f32.vlgmr.msra.gmra.mrb[32].mxu1 %v3384_v46 }
 0xdd3   :  { %10846 = vmatpush3.bf16.msra.mxu1 %v12358_v35  ;;  %10816 = vmatprep.subr.bf16.mxu0 %v12360_v36 }
 0xdd4   :  { %3686 = vmatprep.mubr.f32.mxu1 %v3403_v47  ;;  %10848 = vmatprep.subr.bf16.mxu1 %v12372_v44 }
 0xdd5   :  { %10818 = vmatpush3.bf16.msra.mxu0 %v12392_v60 }
 0xdd6   :  { %10820 = vmatprep.subr.bf16.mxu0 %v12398_v63 }
 0xdd7   :  { %10850 = vmatpush3.bf16.msra.mxu1 %v12396_v62 }
 0xdd8   :  { %10852 = vmatprep.subr.bf16.mxu1 %v14558_v28 }
 0xdd9   :  { %10822 = vmatpush3.bf16.msra.mxu0 %v14559_v15 }
 0xdda   :  { %10824 = vmatprep.subr.bf16.mxu0 %v14560_v18 }
 0xddb   :  { %10854 = vmatpush3.bf16.msra.mxu1 %v14561_v13 }
 0xddc   :  { %10856 = vmatprep.subr.bf16.mxu1 %v14562_v59 }
 0xddd   :  { %10826 = vmatpush3.bf16.msra.mxu0 %v14563_v55 }
 0xdde   :  { %10828 = vmatprep.subr.bf16.mxu0 %v14564_v45 }
 0xddf   :  { %10858 = vmatpush3.bf16.msra.mxu1 %v14565_v23 }
 0xde0   :  { %10860 = vmatprep.subr.bf16.mxu1 %v14566_v54 }
 0xde1   :  { %10830 = vmatpush3.bf16.msra.mxu0 %v14567_v42 }
 0xde2   :  { %10832 = vmatprep.subr.bf16.mxu0 %v14568_v10 }
 0xde3   :  { %10862 = vmatpush3.bf16.msra.mxu1 %v14609_v1 }
 0xde4   :  { %10864 = vmatprep.subr.bf16.mxu1 %v14610_v51 }
 0xde5   :  { %10834 = vmatpush3.bf16.msra.mxu0 %v14611_v25 }
 0xde6   :  { %10836 = vmatprep.subr.bf16.mxu0 %v14612_v2 }
 0xde7   :  { %10866 = vmatpush3.bf16.msra.mxu1 %v14613_v49 }
 0xde8   :  { %10868 = vmatprep.subr.bf16.mxu1 %v14614_v37 }
 0xde9   :  { %10838 = vmatpush3.bf16.msra.mxu0 %v14615_v4 }
 0xdea   :  { %10840 = vmatprep.subr.bf16.mxu0 %v14616_v38 }
 0xdeb   :  { %10870 = vmatpush3.bf16.msra.mxu1 %v14660_v26 }
 0xdec   :  { %10872 = vmatprep.subr.bf16.mxu1 %v14661_v22 }
 0xded   :  { %10842 = vmatpush3.bf16.msra.mxu0 %v14662_v0 }
 0xdee   :  { %10876 = vmatprep.subr.bf16.mxu0 %v14663_v34 }
 0xdef   :  { %10874 = vmatpush3.bf16.msra.mxu1 %v14713_v3 }
 0xdf0   :  { %3617 = vmatmul.mubr.f32.vlgmr.msra.gmra.mrb[34].mxu0 %v3394_v50  ;;  %10884 = vmatprep.subr.bf16.mxu1 %v14714_v20 }
 0xdf1   :  { %10878 = vmatpush1.bf16.msra.mxu0 %v14715_v21  ;;  %3761 = vmatprep.mubr.f32.mxu0 %v14716_v11 }
 0xdf2   :  { %3687 = vmatmul.mubr.f32.vlgmr.msra.gmra.mrb[34].mxu1 %v3401_v16  ;;  %10880 = vmatprep.subr.bf16.mxu0 %v14717_v14 }
 0xdf3   :  { %10886 = vmatpush1.bf16.msra.mxu1 %v14718_v5  ;;  %3832 = vmatprep.mubr.f32.mxu1 %v14716_v11 }
 0xdf4   :  { %10888 = vmatprep.subr.bf16.mxu1 %v14719_v29 }
 0xdf5   :  { %10882 = vmatpush1.bf16.msra.mxu0 %v14720_v57 }
 0xdf6   :  { %10892 = vmatprep.subr.bf16.mxu0 %v14721_v24 }
 0xdf7   :  { %10890 = vmatpush1.bf16.msra.mxu1 %v14722_v40  ;;  %v14725_v40 = vld [vmem:[#allocation44_spill] sm:$0xff] }
 0xdf8   :  { %10900 = vmatprep.subr.bf16.mxu1 %v14723_v52 }
 0xea3   :  { %v9159_v9 = vpop.f32.mrb[32].mxu0 }
 0xea4   :  { %v9160_v41 = vpop.f32.mrb[33].mxu0 }
 0xea5   :  { %v9161_v61 = vadd.f32 %v9160_v41, %v9159_v9  ;;  %v9194_v8 = vpop.f32.mrb[32].mxu1  ;;  %v14726_v9 = vld [vmem:[#allocation83_spill] sm:$0xff]  ;;  %v14727_v41 = vld [vmem:[#allocation84_spill] sm:$0xff] }
 0xea6   :  { %v9195_v27 = vpop.f32.mrb[33].mxu1 }
 0xea7   :  { %v3479_v7 = vadd.f32 %v14724_v33, %v9161_v61  ;;  %v9196_v32 = vadd.f32 %v9195_v27, %v9194_v8  ;;  %v14728_v61 = vld [vmem:[#allocation85_spill] sm:$0xff]  ;;  %v14729_v8 = vld [vmem:[#allocation86_spill] sm:$0xff]  ;;  %v14730_v27 = vld [vmem:[#allocation87_spill] sm:$0xff] }
 0xea9   :  { %v3549_v48 = vadd.f32 %v9196_v32, %v3479_v7  ;;  %v14731_v7 = vld [vmem:[#allocation88_spill] sm:$0xff]  ;;  %v14733_v32 = vld [vmem:[#allocation7_spill] sm:$0xff] }
 0xec3   :  { %v9229_v12 = vpop.f32.mrb[34].mxu0 }
 0xec4   :  { %v9230_v50 = vpop.f32.mrb[35].mxu0 }
 0xec5   :  { %v9231_v31 = vadd.f32 %v9230_v50, %v9229_v12  ;;  %v9264_v46 = vpop.f32.mrb[34].mxu1  ;;  %v14735_v12 = vld [vmem:[#allocation8_spill] sm:$0xff]  ;;  %v14736_v50 = vld [vmem:[#allocation9_spill] sm:$0xff] }
 0xec6   :  { %v9265_v16 = vpop.f32.mrb[35].mxu1 }
 0xec7   :  { %v3619_v56 = vadd.f32 %v9231_v31, %v3549_v48  ;;  %v9266_v6 = vadd.f32 %v9265_v16, %v9264_v46  ;;  %v14734_v48 = vld [vmem:[#allocation6_spill] sm:$0xff]  ;;  %v14737_v31 = vld [vmem:[#allocation11_spill] sm:$0xff]  ;;  %v14739_v16 = vld [vmem:[#allocation12_spill] sm:$0xff] }
 0xec8   :  { %v14738_v46 = vld [vmem:[#allocation10_spill] sm:$0xff] }
 0xec9   :  { %v3689_v47 = vadd.f32 %v9266_v6, %v3619_v56  ;;  %v14740_v56 = vld [vmem:[#allocation13_spill] sm:$0xff]  ;;  %v14741_v6 = vld [vmem:[#allocation15_spill] sm:$0xff] }
 0xecb   :  { %v3692_v24 = vsub.f32 %v3689_v47, %v14725_v40  ;;  %v14742_v47 = vld [vmem:[#allocation14_spill] sm:$0xff] }
 0xecd   :  { %v3693_v52 = vmul.f32 0.03125, %v3692_v24  ;;  %v14732_v24 = vld [vmem:[#allocation5_spill] sm:$0xff] }
 0xecf   :  { %8543 = vmatmul.mubr.msk.f32.vlgmr.msra.gmra.mrb[36].mxu0 %vm524_vm0, %v3693_v52  ;;  %8544 = vmatmul.mubr.msk.f32.vlgmr.msra.gmra.mrb[36].mxu1 %vm524_vm0, %v3693_v52 }
 0xed0   :  { %10894 = vmatpush1.bf16.msra.mxu0 %v14726_v9  ;;  %10902 = vmatpush1.bf16.msra.mxu1 %v14727_v41 }
 0xed1   :  { %10896 = vmatprep.subr.bf16.mxu0 %v14728_v61  ;;  %10904 = vmatprep.subr.bf16.mxu1 %v14729_v8 }
 0xed2   :  { %3903 = vmatprep.mubr.f32.mxu0 %v14716_v11  ;;  %3974 = vmatprep.mubr.f32.mxu1 %v14716_v11 }
 0xed4   :  { %10898 = vmatpush1.bf16.msra.mxu0 %v14730_v27  ;;  %10906 = vmatpush1.bf16.msra.mxu1 %v14731_v7 }
 0xed5   :  { %10908 = vmatprep.subr.bf16.mxu0 %v14732_v24  ;;  %10940 = vmatprep.subr.bf16.mxu1 %v14733_v32  ;;  %v14743_v32 = vld [vmem:[#allocation16_spill] sm:$0xff] }
 0xed7   :  { %8545 = vmatmul.mubr.msk.f32.vlgmr.msra.gmra.mrb[38].mxu0 %vm524_vm0, %v3693_v52  ;;  %8546 = vmatmul.mubr.msk.f32.vlgmr.msra.gmra.mrb[38].mxu1 %vm524_vm0, %v3693_v52  ;;  %v14744_v52 = vld [vmem:[#allocation17_spill] sm:$0xff] }
 0xed8   :  { %10910 = vmatpush3.bf16.msra.mxu0 %v14734_v48  ;;  %10942 = vmatpush3.bf16.msra.mxu1 %v14735_v12  ;;  %v14745_v48 = vld [vmem:[#allocation18_spill] sm:$0xff]  ;;  %v14746_v12 = vld [vmem:[#allocation19_spill] sm:$0xff] }
 0xed9   :  { %10912 = vmatprep.subr.bf16.mxu0 %v14736_v50  ;;  %10944 = vmatprep.subr.bf16.mxu1 %v14737_v31  ;;  %v14747_v50 = vld [vmem:[#allocation20_spill] sm:$0xff]  ;;  %v14748_v31 = vld [vmem:[#allocation21_spill] sm:$0xff] }
 0xedc   :  { %10914 = vmatpush3.bf16.msra.mxu0 %v14738_v46  ;;  %10946 = vmatpush3.bf16.msra.mxu1 %v14739_v16  ;;  %v14749_v46 = vld [vmem:[#allocation22_spill] sm:$0xff]  ;;  %v14750_v16 = vld [vmem:[#allocation23_spill] sm:$0xff] }
 0xedd   :  { %10916 = vmatprep.subr.bf16.mxu0 %v14740_v56  ;;  %10948 = vmatprep.subr.bf16.mxu1 %v14741_v6  ;;  %v14751_v56 = vld [vmem:[#allocation24_spill] sm:$0xff]  ;;  %v14752_v6 = vld [vmem:[#allocation25_spill] sm:$0xff] }
 0xee0   :  { %10918 = vmatpush3.bf16.msra.mxu0 %v14742_v47  ;;  %10950 = vmatpush3.bf16.msra.mxu1 %v14743_v32  ;;  %v14753_v47 = vld [vmem:[#allocation26_spill] sm:$0xff]  ;;  %v14754_v32 = vld [vmem:[#allocation27_spill] sm:$0xff] }
 0xee1   :  { %10920 = vmatprep.subr.bf16.mxu0 %v14744_v52  ;;  %10952 = vmatprep.subr.bf16.mxu1 %v14745_v48  ;;  %v14755_v52 = vld [vmem:[#allocation28_spill] sm:$0xff]  ;;  %v14756_v48 = vld [vmem:[#allocation29_spill] sm:$0xff] }
 0xee4   :  { %10922 = vmatpush3.bf16.msra.mxu0 %v14746_v12  ;;  %10954 = vmatpush3.bf16.msra.mxu1 %v14747_v50  ;;  %v14757_v12 = vld [vmem:[#allocation30_spill] sm:$0xff]  ;;  %v14758_v50 = vld [vmem:[#allocation32_spill] sm:$0xff] }
 0xee5   :  { %10924 = vmatprep.subr.bf16.mxu0 %v14748_v31  ;;  %10956 = vmatprep.subr.bf16.mxu1 %v14749_v46  ;;  %v14759_v31 = vld [vmem:[#allocation35_spill] sm:$0xff]  ;;  %v14760_v46 = vld [vmem:[#allocation36_spill] sm:$0xff] }
 0xee8   :  { %10926 = vmatpush3.bf16.msra.mxu0 %v14750_v16  ;;  %10958 = vmatpush3.bf16.msra.mxu1 %v14751_v56  ;;  %v14761_v16 = vld [vmem:[#allocation37_spill] sm:$0xff]  ;;  %v14762_v56 = vld [vmem:[#allocation39_spill] sm:$0xff] }
 0xee9   :  { %10928 = vmatprep.subr.bf16.mxu0 %v14752_v6  ;;  %10960 = vmatprep.subr.bf16.mxu1 %v14753_v47  ;;  %v14763_v6 = vld [vmem:[#allocation40_spill] sm:$0xff]  ;;  %v14764_v47 = vld [vmem:[#allocation41_spill] sm:$0xff] }
 0xeec   :  { %10930 = vmatpush3.bf16.msra.mxu0 %v14754_v32  ;;  %10962 = vmatpush3.bf16.msra.mxu1 %v14755_v52  ;;  %v14765_v32 = vld [vmem:[#allocation42_spill] sm:$0xff] }
 0xeed   :  { %10932 = vmatprep.subr.bf16.mxu0 %v14756_v48  ;;  %10964 = vmatprep.subr.bf16.mxu1 %v14757_v12 }
 0xef0   :  { %10934 = vmatpush3.bf16.msra.mxu0 %v14758_v50  ;;  %10966 = vmatpush3.bf16.msra.mxu1 %v14759_v31 }
 0xef1   :  { %10936 = vmatprep.subr.bf16.mxu0 %v14760_v46  ;;  %10968 = vmatprep.subr.bf16.mxu1 %v14761_v16 }
 0xef4   :  { %10938 = vmatpush3.bf16.msra.mxu0 %v14762_v56  ;;  %10970 = vmatpush3.bf16.msra.mxu1 %v14763_v6 }
 0xef5   :  { %10972 = vmatprep.subr.bf16.mxu0 %v14764_v47  ;;  %11004 = vmatprep.subr.bf16.mxu1 %v14765_v32 }
 0xfa2   :  { %v3763_v52 = vpop.f32.mrb[36].mxu0  ;;  %v3834_v48 = vpop.f32.mrb[36].mxu1 }
 0xfa3   :  { %v3981_v24 = vmul.f32 %v3763_v52, %v3763_v52  ;;  %v3765_v12 = vpop.f32.mrb[37].mxu0  ;;  %v3836_v7 = vpop.f32.mrb[37].mxu1  ;;  %v3983_v50 = vmul.f32 %v3834_v48, %v3834_v48 }
 0xfa4   :  { %v3982_v27 = vmul.f32 %v3765_v12, %v3765_v12  ;;  %v3984_v16 = vmul.f32 %v3836_v7, %v3836_v7 }
 0xfa5   :  { %v3989_v31 = vsel %vm820_vm1, %v3981_v24, 0.0  ;;  %v3992_v56 = vsel %vm820_vm1, %v3983_v50, 0.0 }
 0xfa6   :  { %v3990_v46 = vsel %vm820_vm1, %v3982_v27, 0.0  ;;  %v3994_v47 = vsel %vm820_vm1, %v3984_v16, 0.0 }
 0xfa7   :  { %v3991_v8 = vadd.f32 %v3990_v46, %v3989_v31 }
 0xfa9   :  { %v3993_v6 = vadd.f32 %v3992_v56, %v3991_v8 }
 0xfaa   :  { %v3905_v61 = vpop.f32.mrb[38].mxu0  ;;  %v3976_v32 = vpop.f32.mrb[38].mxu1 }
 0xfab   :  { %v3995_v41 = vadd.f32 %v3994_v47, %v3993_v6  ;;  %v3985_v9 = vmul.f32 %v3905_v61, %v3905_v61  ;;  %v3907_v40 = vpop.f32.mrb[39].mxu0  ;;  %v3978_v33 = vpop.f32.mrb[39].mxu1  ;;  %v3987_v5 = vmul.f32 %v3976_v32, %v3976_v32 }
 0xfac   :  { %v3986_v57 = vmul.f32 %v3907_v40, %v3907_v40  ;;  %v3988_v14 = vmul.f32 %v3978_v33, %v3978_v33 }
 0xfad   :  { %v3996_v29 = vsel %vm820_vm1, %v3985_v9, 0.0  ;;  %v4000_v50 = vsel %vm820_vm1, %v3987_v5, 0.0 }
 0xfae   :  { %v3997_v24 = vadd.f32 %v3996_v29, %v3995_v41  ;;  %v3998_v27 = vsel %vm820_vm1, %v3986_v57, 0.0  ;;  %v4002_v46 = vsel %vm820_vm1, %v3988_v14, 0.0 }
 0xfb0   :  { %v3999_v31 = vadd.f32 %v3998_v27, %v3997_v24 }
 0xfb2   :  { %v4001_v8 = vadd.f32 %v4000_v50, %v3999_v31 }
 0xfb4   :  { %v4003_v16 = vadd.f32 %v4002_v46, %v4001_v8 }
 0xfb6   :  { %4004 = vadd.xlane.f32.xlu0 %v4003_v16 }
0x1043   :  { %v4005_v56 = vpop.xlane.xlu0 %4004 }
0x1044   :  { %11873 = vrsqrt.f32 %v4005_v56  ;;  %vm4008_vm8 = vcmp.eq.f32.partialorder %v4005_v56, inf  ;;  %v4011_v11 = vand.u32 2147483648, %v4005_v56  ;;  %vm4010_vm9 = vcmp.eq.f32.partialorder %v4005_v56, 0.0 }
0x104e   :  { %v11874_v6 = vpop.eup %11873 }
0x104f   :  { %v4007_v47 = vmul.f32 %v11874_v6, %v4005_v56 }
0x1051   :  { %v4009_v9 = vsel %vm4008_vm8, %v4005_v56, %v4007_v47 }
0x1052   :  { %v4012_v29 = vsel %vm4010_vm9, %v4011_v11, %v4009_v9 }
0x1053   :  { %v4013_v41 = vadd.f32 1e-10, %v4012_v29 }
0x1055   :  { %11875 = vrcp.f32 %v4013_v41 }
0x105f   :  { %v11876_v57 = vpop.eup %11875 }
0x1060   :  { %v4015_v24 = vmul.f32 0.1, %v11876_v57 }
0x1062   :  { %v4016_v27 = vmul.f32 %v4015_v24, %v3763_v52  ;;  %v4017_v5 = vmul.f32 %v4015_v24, %v3765_v12  ;;  %v4018_v31 = vmul.f32 %v4015_v24, %v3834_v48  ;;  %v4019_v50 = vmul.f32 %v4015_v24, %v3836_v7 }
0x1063   :  { %v4020_v14 = vmul.f32 %v4015_v24, %v3905_v61  ;;  %v4021_v8 = vmul.f32 %v4015_v24, %v3907_v40  ;;  %v4022_v46 = vmul.f32 %v4015_v24, %v3976_v32  ;;  %v4023_v16 = vmul.f32 %v4015_v24, %v3978_v33 }
0x1064   :  { %v4032_v21 = vcombine.low %v4016_v27, %v4017_v5  ;;  %v4033_v20 = vcombine.low %v4018_v31, %v4019_v50 }
0x1065   :  { %v4049_v6 = vcombine.low %v4020_v14, %v4021_v8  ;;  %v4050_v3 = vcombine.low %v4022_v46, %v4023_v16 }
0x1066   :  { %v4040_v47 = vrot.slane %v4032_v21, %v12213_v19  ;;  %v4047_v11 = vrot.slane %v4033_v20, %v12213_v19 }
0x1067   :  { %v4057_v56 = vrot.slane %v4049_v6, %v12213_v19  ;;  %v4064_v9 = vrot.slane %v4050_v3, %v12213_v19 }
0x1068   :  { %v4048_v52 = vcombine.low %v4040_v47, %v4047_v11 }
0x1069   :  { %v4065_v12 = vcombine.low %v4057_v56, %v4064_v9 }
0x106a   :  { %v4068_v7 = vadd.f32 %v4048_v52, %v13298_v39 }
0x106b   :  { %v4069_v40 = vadd.f32 %v4065_v12, %v13306_v17 }
0x106c   :  { %v4070_v33 = vsub.f32 %v4068_v7, %v13295_v58 }
0x106d   :  { %v4071_v61 = vsub.f32 %v4069_v40, %v13303_v43 }
0x106e   :  { %v4072_v32 = vmul.f32 %v4070_v33, %v4070_v33 }
0x106f   :  { %v4073_v48 = vmul.f32 %v4071_v61, %v4071_v61 }
0x1070   :  { %v4076_v29 = vcombine.high %v4072_v32, %v4072_v32  ;;  %v4083_v21 = vrot.slane %v4072_v32, %v12213_v19 }
0x1071   :  { %v4093_v57 = vcombine.high %v4073_v48, %v4073_v48  ;;  %v4100_v24 = vrot.slane %v4073_v48, %v12213_v19 }
0x1072   :  { %v4090_v20 = vrot.slane %v4076_v29, %v12213_v19  ;;  %v4091_v41 = vcombine.high %v4083_v21, %v4083_v21  ;;  %v4118_v39 = vsel %vm820_vm1, %v4083_v21, 0.0 }
0x1073   :  { %v4107_v50 = vrot.slane %v4093_v57, %v12213_v19  ;;  %v4108_v14 = vcombine.high %v4100_v24, %v4100_v24  ;;  %v4125_v16 = vsel %vm820_vm1, %v4100_v24, 0.0 }
0x1074   :  { %v4092_v3 = vcombine.high %v4090_v20, %v4090_v20  ;;  %v4119_v17 = vsel %vm820_vm1, %v4091_v41, 0.0  ;;  %v4121_v5 = vsel %vm820_vm1, %v4090_v20, 0.0 }
0x1075   :  { %v4120_v27 = vadd.f32 %v4119_v17, %v4118_v39  ;;  %v4109_v47 = vcombine.high %v4107_v50, %v4107_v50  ;;  %v4127_v11 = vsel %vm820_vm1, %v4108_v14, 0.0  ;;  %v4129_v9 = vsel %vm820_vm1, %v4107_v50, 0.0 }
0x1076   :  { %v4123_v8 = vsel %vm820_vm1, %v4092_v3, 0.0 }
0x1077   :  { %v4122_v31 = vadd.f32 %v4121_v5, %v4120_v27  ;;  %v4131_v12 = vsel %vm820_vm1, %v4109_v47, 0.0 }
0x1079   :  { %v4124_v46 = vadd.f32 %v4123_v8, %v4122_v31 }
0x107b   :  { %v4126_v6 = vadd.f32 %v4125_v16, %v4124_v46 }
0x107d   :  { %v4128_v56 = vadd.f32 %v4127_v11, %v4126_v6 }
0x107f   :  { %v4130_v52 = vadd.f32 %v4129_v9, %v4128_v56  ;;  %v14766_v56 = vld [vmem:[#allocation69_spill] sm:$0xff]  ;;  %v14767_v9 = vld [vmem:[#allocation71_spill] sm:$0xff] }
0x1081   :  { %v4132_v7 = vadd.f32 %v4131_v12, %v4130_v52  ;;  %v14768_v52 = vld [vmem:[#allocation72_spill] sm:$0xff]  ;;  %v14769_v12 = vmov 0.0  }
0x1083   :  { %4133 = vadd.xlane.f32.xlu1 %v4132_v7  ;;  %v14770_v7 = vld [vmem:[#allocation74_spill] sm:$0xff] }
0x1110   :  { %v4134_v40 = vpop.xlane.xlu1 %4133 }
0x1111   :  { %11877 = vrsqrt.f32 %v4134_v40  ;;  %vm4137_vm10 = vcmp.eq.f32.partialorder %v4134_v40, inf  ;;  %v4140_v29 = vand.u32 2147483648, %v4134_v40  ;;  %vm4139_vm11 = vcmp.eq.f32.partialorder %v4134_v40, 0.0 }
0x111b   :  { %v11878_v32 = vpop.eup %11877 }
0x111c   :  { %v4136_v48 = vmul.f32 %v11878_v32, %v4134_v40  ;;  %v14772_v32 = vld [vmem:[#allocation75_spill] sm:$0xff] }
0x111e   :  { %v4138_v21 = vsel %vm4137_vm10, %v4134_v40, %v4136_v48  ;;  %v14771_v40 = vld [vmem:[#allocation73_spill] sm:$0xff]  ;;  %v14773_v48 = vld [vmem:[#allocation76_spill] sm:$0xff] }
0x111f   :  { %v4141_v20 = vsel %vm4139_vm11, %v4140_v29, %v4138_v21  ;;  %v14774_v29 = vld [vmem:[#allocation78_spill] sm:$0xff]  ;;  %v14775_v21 = vld [vmem:[#allocation77_spill] sm:$0xff] }
0x1120   :  { %v4143_v41 = vadd.f32 1e-07, %v4141_v20  ;;  %vm4142_vm12 = vcmp.gt.f32.partialorder %v4141_v20, 0.1  ;;  %v14776_v20 = vld [vmem:[#allocation79_spill] sm:$0xff] }
0x1122   :  { %11879 = vrcp.f32 %v4143_v41 }
0x112c   :  { %v11880_v57 = vpop.eup %11879 }
0x112d   :  { %v4145_v3 = vmul.f32 0.1, %v11880_v57 }
0x112f   :  { %v4146_v24 = vsel %vm4142_vm12, %v4145_v3, 1.0 }
0x1130   :  { %v4154_v39 = vrot.slane %v4146_v24, %v12864_v53 }
0x1132   :  { %v4156_v17 = vmul.f32 %v4154_v39, %v4070_v33  ;;  %v4157_v27 = vmul.f32 %v4154_v39, %v4071_v61 }
0x1134   :  { %v13438_v5 = vadd.f32 %v13295_v58, %v4156_v17  ;;  %v13441_v31 = vadd.f32 %v13303_v43, %v4157_v27  ;;  %v14777_v17 = vld [vmem:[#allocation43_spill] sm:$0xff] }
0x1136   :  { %v4169_v50 = vrot.slane %v13438_v5, %v12213_v19  ;;  %v4162_v14 = vcombine.high %v13438_v5, %v13438_v5  ;;  %v4179_v8 = vcombine.high %v13441_v31, %v13441_v31  ;;  %v4186_v46 = vrot.slane %v13441_v31, %v12213_v19 }
0x1138   :  { %v4177_v33 = vcombine.high %v4169_v50, %v4169_v50  ;;  %v4176_v61 = vrot.slane %v4162_v14, %v12213_v19  ;;  %v4193_v16 = vrot.slane %v4179_v8, %v12213_v19  ;;  %v4194_v47 = vcombine.high %v4186_v46, %v4186_v46 }
0x113a   :  { %4268 = vmatprep.mubr.f32.mxu0 %v4177_v33  ;;  %v4178_v6 = vcombine.high %v4176_v61, %v4176_v61  ;;  %v4195_v11 = vcombine.high %v4193_v16, %v4193_v16 }
0x113b   :  { %4269 = vmatmul.mubr.f32.vlgmr.msra.gmra.mrb[40].mxu0 %v4169_v50 }
0x113c   :  { %10974 = vmatpush3.bf16.msra.mxu0 %v12354_v30  ;;  %4338 = vmatprep.mubr.f32.mxu1 %v4178_v6 }
0x113d   :  { %4408 = vmatprep.mubr.f32.mxu0 %v4194_v47  ;;  %4339 = vmatmul.mubr.f32.vlgmr.msra.gmra.mrb[40].mxu1 %v4176_v61 }
0x113e   :  { %11006 = vmatpush3.bf16.msra.mxu1 %v12358_v35  ;;  %10976 = vmatprep.subr.bf16.mxu0 %v12360_v36 }
0x113f   :  { %4478 = vmatprep.mubr.f32.mxu1 %v4195_v11  ;;  %11008 = vmatprep.subr.bf16.mxu1 %v12372_v44 }
0x1140   :  { %10978 = vmatpush3.bf16.msra.mxu0 %v12392_v60 }
0x1141   :  { %10980 = vmatprep.subr.bf16.mxu0 %v12398_v63 }
0x1142   :  { %11010 = vmatpush3.bf16.msra.mxu1 %v12396_v62 }
0x1143   :  { %11012 = vmatprep.subr.bf16.mxu1 %v14558_v28 }
0x1144   :  { %10982 = vmatpush3.bf16.msra.mxu0 %v14559_v15 }
0x1145   :  { %10984 = vmatprep.subr.bf16.mxu0 %v14560_v18 }
0x1146   :  { %11014 = vmatpush3.bf16.msra.mxu1 %v14561_v13 }
0x1147   :  { %11016 = vmatprep.subr.bf16.mxu1 %v14562_v59 }
0x1148   :  { %10986 = vmatpush3.bf16.msra.mxu0 %v14563_v55 }
0x1149   :  { %10988 = vmatprep.subr.bf16.mxu0 %v14564_v45 }
0x114a   :  { %11018 = vmatpush3.bf16.msra.mxu1 %v14565_v23 }
0x114b   :  { %11020 = vmatprep.subr.bf16.mxu1 %v14566_v54 }
0x114c   :  { %10990 = vmatpush3.bf16.msra.mxu0 %v14567_v42 }
0x114d   :  { %10992 = vmatprep.subr.bf16.mxu0 %v14568_v10 }
0x114e   :  { %11022 = vmatpush3.bf16.msra.mxu1 %v14609_v1 }
0x114f   :  { %11024 = vmatprep.subr.bf16.mxu1 %v14610_v51 }
0x1150   :  { %10994 = vmatpush3.bf16.msra.mxu0 %v14611_v25 }
0x1151   :  { %10996 = vmatprep.subr.bf16.mxu0 %v14612_v2 }
0x1152   :  { %11026 = vmatpush3.bf16.msra.mxu1 %v14613_v49 }
0x1153   :  { %11028 = vmatprep.subr.bf16.mxu1 %v14614_v37 }
0x1154   :  { %10998 = vmatpush3.bf16.msra.mxu0 %v14615_v4 }
0x1155   :  { %11000 = vmatprep.subr.bf16.mxu0 %v14616_v38 }
0x1156   :  { %11030 = vmatpush3.bf16.msra.mxu1 %v14660_v26 }
0x1157   :  { %11032 = vmatprep.subr.bf16.mxu1 %v14661_v22 }
0x1158   :  { %11002 = vmatpush3.bf16.msra.mxu0 %v14662_v0 }
0x1159   :  { %11036 = vmatprep.subr.bf16.mxu0 %v14663_v34 }
0x115a   :  { %11034 = vmatpush3.bf16.msra.mxu1 %v14766_v56 }
0x115b   :  { %4409 = vmatmul.mubr.f32.vlgmr.msra.gmra.mrb[42].mxu0 %v4186_v46  ;;  %11044 = vmatprep.subr.bf16.mxu1 %v14767_v9 }
0x115c   :  { %11038 = vmatpush1.bf16.msra.mxu0 %v14768_v52  ;;  %4553 = vmatprep.mubr.f32.mxu0 %v14769_v12 }
0x115d   :  { %4479 = vmatmul.mubr.f32.vlgmr.msra.gmra.mrb[42].mxu1 %v4193_v16  ;;  %11040 = vmatprep.subr.bf16.mxu0 %v14770_v7 }
0x115e   :  { %11046 = vmatpush1.bf16.msra.mxu1 %v14771_v40  ;;  %4624 = vmatprep.mubr.f32.mxu1 %v14769_v12 }
0x115f   :  { %11048 = vmatprep.subr.bf16.mxu1 %v14772_v32 }
0x1160   :  { %11042 = vmatpush1.bf16.msra.mxu0 %v14773_v48 }
0x1161   :  { %11052 = vmatprep.subr.bf16.mxu0 %v14774_v29 }
0x1162   :  { %11050 = vmatpush1.bf16.msra.mxu1 %v14775_v21  ;;  %v14778_v21 = vld [vmem:[#allocation44_spill] sm:$0xff] }
0x1163   :  { %11060 = vmatprep.subr.bf16.mxu1 %v14776_v20 }
0x120e   :  { %v9299_v41 = vpop.f32.mrb[40].mxu0 }
0x120f   :  { %v9300_v57 = vpop.f32.mrb[41].mxu0 }
0x1210   :  { %v9301_v3 = vadd.f32 %v9300_v57, %v9299_v41  ;;  %v9334_v24 = vpop.f32.mrb[40].mxu1  ;;  %v14779_v41 = vld [vmem:[#allocation83_spill] sm:$0xff]  ;;  %v14780_v57 = vld [vmem:[#allocation84_spill] sm:$0xff] }
0x1211   :  { %v9335_v39 = vpop.f32.mrb[41].mxu1 }
0x1212   :  { %v4271_v27 = vadd.f32 %v14777_v17, %v9301_v3  ;;  %v9336_v50 = vadd.f32 %v9335_v39, %v9334_v24  ;;  %v14781_v3 = vld [vmem:[#allocation85_spill] sm:$0xff]  ;;  %v14782_v24 = vld [vmem:[#allocation86_spill] sm:$0xff]  ;;  %v14783_v39 = vld [vmem:[#allocation87_spill] sm:$0xff] }
0x1213   :  { %v14786_v17 = vld [vmem:[#allocation7_spill] sm:$0xff] }
0x1214   :  { %v4341_v14 = vadd.f32 %v9336_v50, %v4271_v27  ;;  %v14787_v27 = vld [vmem:[#allocation6_spill] sm:$0xff]  ;;  %v14788_v50 = vld [vmem:[#allocation8_spill] sm:$0xff] }
0x122e   :  { %v9369_v8 = vpop.f32.mrb[42].mxu0 }
0x122f   :  { %v9370_v46 = vpop.f32.mrb[43].mxu0 }
0x1230   :  { %v9371_v33 = vadd.f32 %v9370_v46, %v9369_v8  ;;  %v9404_v61 = vpop.f32.mrb[42].mxu1  ;;  %v14790_v8 = vld [vmem:[#allocation11_spill] sm:$0xff]  ;;  %v14791_v46 = vld [vmem:[#allocation10_spill] sm:$0xff] }
0x1231   :  { %v9405_v16 = vpop.f32.mrb[43].mxu1 }
0x1232   :  { %v4411_v6 = vadd.f32 %v9371_v33, %v4341_v14  ;;  %v9406_v47 = vadd.f32 %v9405_v16, %v9404_v61  ;;  %v14789_v14 = vld [vmem:[#allocation9_spill] sm:$0xff]  ;;  %v14792_v33 = vld [vmem:[#allocation12_spill] sm:$0xff]  ;;  %v14794_v16 = vld [vmem:[#allocation15_spill] sm:$0xff] }
0x1233   :  { %v14793_v61 = vld [vmem:[#allocation13_spill] sm:$0xff] }
0x1234   :  { %v4481_v11 = vadd.f32 %v9406_v47, %v4411_v6  ;;  %v14795_v6 = vld [vmem:[#allocation14_spill] sm:$0xff]  ;;  %v14796_v47 = vld [vmem:[#allocation16_spill] sm:$0xff] }
0x1236   :  { %v4484_v29 = vsub.f32 %v4481_v11, %v14778_v21  ;;  %v14784_v21 = vld [vmem:[#allocation88_spill] sm:$0xff]  ;;  %v14798_v11 = vld [vmem:[#allocation18_spill] sm:$0xff] }
0x1238   :  { %v4485_v20 = vmul.f32 0.03125, %v4484_v29  ;;  %v14785_v29 = vld [vmem:[#allocation5_spill] sm:$0xff] }
0x123a   :  { %8547 = vmatmul.mubr.msk.f32.vlgmr.msra.gmra.mrb[44].mxu0 %vm524_vm0, %v4485_v20  ;;  %8548 = vmatmul.mubr.msk.f32.vlgmr.msra.gmra.mrb[44].mxu1 %vm524_vm0, %v4485_v20 }
0x123b   :  { %11054 = vmatpush1.bf16.msra.mxu0 %v14779_v41  ;;  %11062 = vmatpush1.bf16.msra.mxu1 %v14780_v57 }
0x123c   :  { %11056 = vmatprep.subr.bf16.mxu0 %v14781_v3  ;;  %11064 = vmatprep.subr.bf16.mxu1 %v14782_v24 }
0x123d   :  { %4695 = vmatprep.mubr.f32.mxu0 %v14769_v12  ;;  %4766 = vmatprep.mubr.f32.mxu1 %v14769_v12 }
0x123f   :  { %11058 = vmatpush1.bf16.msra.mxu0 %v14783_v39  ;;  %11066 = vmatpush1.bf16.msra.mxu1 %v14784_v21 }
0x1240   :  { %11068 = vmatprep.subr.bf16.mxu0 %v14785_v29  ;;  %11100 = vmatprep.subr.bf16.mxu1 %v14786_v17 }
0x1242   :  { %8549 = vmatmul.mubr.msk.f32.vlgmr.msra.gmra.mrb[46].mxu0 %vm524_vm0, %v4485_v20  ;;  %8550 = vmatmul.mubr.msk.f32.vlgmr.msra.gmra.mrb[46].mxu1 %vm524_vm0, %v4485_v20  ;;  %v14797_v20 = vld [vmem:[#allocation17_spill] sm:$0xff] }
0x1243   :  { %11070 = vmatpush3.bf16.msra.mxu0 %v14787_v27  ;;  %11102 = vmatpush3.bf16.msra.mxu1 %v14788_v50  ;;  %v14799_v50 = vld [vmem:[#allocation19_spill] sm:$0xff] }
0x1244   :  { %11072 = vmatprep.subr.bf16.mxu0 %v14789_v14  ;;  %11104 = vmatprep.subr.bf16.mxu1 %v14790_v8  ;;  %v14800_v14 = vld [vmem:[#allocation20_spill] sm:$0xff]  ;;  %v14801_v8 = vld [vmem:[#allocation21_spill] sm:$0xff] }
0x1247   :  { %11074 = vmatpush3.bf16.msra.mxu0 %v14791_v46  ;;  %11106 = vmatpush3.bf16.msra.mxu1 %v14792_v33  ;;  %v14802_v46 = vld [vmem:[#allocation22_spill] sm:$0xff]  ;;  %v14803_v33 = vld [vmem:[#allocation23_spill] sm:$0xff] }
0x1248   :  { %11076 = vmatprep.subr.bf16.mxu0 %v14793_v61  ;;  %11108 = vmatprep.subr.bf16.mxu1 %v14794_v16  ;;  %v14804_v61 = vld [vmem:[#allocation24_spill] sm:$0xff]  ;;  %v14805_v16 = vld [vmem:[#allocation25_spill] sm:$0xff] }
0x124b   :  { %11078 = vmatpush3.bf16.msra.mxu0 %v14795_v6  ;;  %11110 = vmatpush3.bf16.msra.mxu1 %v14796_v47  ;;  %v14806_v6 = vld [vmem:[#allocation26_spill] sm:$0xff]  ;;  %v14807_v47 = vld [vmem:[#allocation27_spill] sm:$0xff] }
0x124c   :  { %11080 = vmatprep.subr.bf16.mxu0 %v14797_v20  ;;  %11112 = vmatprep.subr.bf16.mxu1 %v14798_v11  ;;  %v14808_v20 = vld [vmem:[#allocation28_spill] sm:$0xff]  ;;  %v14809_v11 = vld [vmem:[#allocation29_spill] sm:$0xff] }
0x124f   :  { %11082 = vmatpush3.bf16.msra.mxu0 %v14799_v50  ;;  %11114 = vmatpush3.bf16.msra.mxu1 %v14800_v14  ;;  %v14810_v50 = vld [vmem:[#allocation30_spill] sm:$0xff]  ;;  %v14811_v14 = vld [vmem:[#allocation32_spill] sm:$0xff] }
0x1250   :  { %11084 = vmatprep.subr.bf16.mxu0 %v14801_v8  ;;  %11116 = vmatprep.subr.bf16.mxu1 %v14802_v46  ;;  %v14812_v8 = vld [vmem:[#allocation35_spill] sm:$0xff]  ;;  %v14813_v46 = vld [vmem:[#allocation36_spill] sm:$0xff] }
0x1253   :  { %11086 = vmatpush3.bf16.msra.mxu0 %v14803_v33  ;;  %11118 = vmatpush3.bf16.msra.mxu1 %v14804_v61  ;;  %v14814_v33 = vld [vmem:[#allocation37_spill] sm:$0xff]  ;;  %v14815_v61 = vld [vmem:[#allocation39_spill] sm:$0xff] }
0x1254   :  { %11088 = vmatprep.subr.bf16.mxu0 %v14805_v16  ;;  %11120 = vmatprep.subr.bf16.mxu1 %v14806_v6  ;;  %v14816_v16 = vld [vmem:[#allocation40_spill] sm:$0xff]  ;;  %v14817_v6 = vld [vmem:[#allocation41_spill] sm:$0xff] }
0x1257   :  { %11090 = vmatpush3.bf16.msra.mxu0 %v14807_v47  ;;  %11122 = vmatpush3.bf16.msra.mxu1 %v14808_v20  ;;  %v14818_v47 = vld [vmem:[#allocation42_spill] sm:$0xff] }
0x1258   :  { %11092 = vmatprep.subr.bf16.mxu0 %v14809_v11  ;;  %11124 = vmatprep.subr.bf16.mxu1 %v14810_v50 }
0x125b   :  { %11094 = vmatpush3.bf16.msra.mxu0 %v14811_v14  ;;  %11126 = vmatpush3.bf16.msra.mxu1 %v14812_v8 }
0x125c   :  { %11096 = vmatprep.subr.bf16.mxu0 %v14813_v46  ;;  %11128 = vmatprep.subr.bf16.mxu1 %v14814_v33 }
0x125f   :  { %11098 = vmatpush3.bf16.msra.mxu0 %v14815_v61  ;;  %11130 = vmatpush3.bf16.msra.mxu1 %v14816_v16 }
0x1260   :  { %11132 = vmatprep.subr.bf16.mxu0 %v14817_v6  ;;  %11164 = vmatprep.subr.bf16.mxu1 %v14818_v47 }
0x130d   :  { %v4555_v20 = vpop.f32.mrb[44].mxu0  ;;  %v4626_v11 = vpop.f32.mrb[44].mxu1 }
0x130e   :  { %v4773_v27 = vmul.f32 %v4555_v20, %v4555_v20  ;;  %v4557_v50 = vpop.f32.mrb[45].mxu0  ;;  %v4628_v17 = vpop.f32.mrb[45].mxu1  ;;  %v4775_v14 = vmul.f32 %v4626_v11, %v4626_v11 }
0x130f   :  { %v4774_v29 = vmul.f32 %v4557_v50, %v4557_v50  ;;  %v4776_v33 = vmul.f32 %v4628_v17, %v4628_v17 }
0x1310   :  { %v4781_v8 = vsel %vm820_vm1, %v4773_v27, 0.0  ;;  %v4784_v61 = vsel %vm820_vm1, %v4775_v14, 0.0 }
0x1311   :  { %v4782_v46 = vsel %vm820_vm1, %v4774_v29, 0.0  ;;  %v4786_v6 = vsel %vm820_vm1, %v4776_v33, 0.0 }
0x1312   :  { %v4783_v21 = vadd.f32 %v4782_v46, %v4781_v8 }
0x1314   :  { %v4785_v16 = vadd.f32 %v4784_v61, %v4783_v21 }
0x1315   :  { %v4697_v39 = vpop.f32.mrb[46].mxu0  ;;  %v4768_v47 = vpop.f32.mrb[46].mxu1 }
0x1316   :  { %v4787_v24 = vadd.f32 %v4786_v6, %v4785_v16  ;;  %v4777_v3 = vmul.f32 %v4697_v39, %v4697_v39  ;;  %v4699_v57 = vpop.f32.mrb[47].mxu0  ;;  %v4770_v41 = vpop.f32.mrb[47].mxu1  ;;  %v4779_v40 = vmul.f32 %v4768_v47, %v4768_v47 }
0x1317   :  { %v4778_v48 = vmul.f32 %v4699_v57, %v4699_v57  ;;  %v4780_v7 = vmul.f32 %v4770_v41, %v4770_v41 }
0x1318   :  { %v4788_v32 = vsel %vm820_vm1, %v4777_v3, 0.0  ;;  %v4792_v14 = vsel %vm820_vm1, %v4779_v40, 0.0 }
0x1319   :  { %v4789_v27 = vadd.f32 %v4788_v32, %v4787_v24  ;;  %v4790_v29 = vsel %vm820_vm1, %v4778_v48, 0.0  ;;  %v4794_v46 = vsel %vm820_vm1, %v4780_v7, 0.0 }
0x131b   :  { %v4791_v8 = vadd.f32 %v4790_v29, %v4789_v27 }
0x131d   :  { %v4793_v21 = vadd.f32 %v4792_v14, %v4791_v8 }
0x131f   :  { %v4795_v33 = vadd.f32 %v4794_v46, %v4793_v21 }
0x1321   :  { %4796 = vadd.xlane.f32.xlu0 %v4795_v33 }
0x13ae   :  { %v4797_v61 = vpop.xlane.xlu0 %4796 }
0x13af   :  { %11881 = vrsqrt.f32 %v4797_v61  ;;  %vm4800_vm13 = vcmp.eq.f32.partialorder %v4797_v61, inf  ;;  %v4803_v12 = vand.u32 2147483648, %v4797_v61  ;;  %vm4802_vm14 = vcmp.eq.f32.partialorder %v4797_v61, 0.0 }
0x13b9   :  { %v11882_v16 = vpop.eup %11881 }
0x13ba   :  { %v4799_v6 = vmul.f32 %v11882_v16, %v4797_v61 }
0x13bc   :  { %v4801_v3 = vsel %vm4800_vm13, %v4797_v61, %v4799_v6 }
0x13bd   :  { %v4804_v32 = vsel %vm4802_vm14, %v4803_v12, %v4801_v3 }
0x13be   :  { %v4805_v24 = vadd.f32 1e-10, %v4804_v32 }
0x13c0   :  { %11883 = vrcp.f32 %v4805_v24 }
0x13ca   :  { %v11884_v48 = vpop.eup %11883 }
0x13cb   :  { %v4807_v27 = vmul.f32 0.1, %v11884_v48 }
0x13cd   :  { %v4808_v29 = vmul.f32 %v4807_v27, %v4555_v20  ;;  %v4809_v40 = vmul.f32 %v4807_v27, %v4557_v50  ;;  %v4810_v8 = vmul.f32 %v4807_v27, %v4626_v11  ;;  %v4811_v14 = vmul.f32 %v4807_v27, %v4628_v17 }
0x13ce   :  { %v4812_v7 = vmul.f32 %v4807_v27, %v4697_v39  ;;  %v4813_v21 = vmul.f32 %v4807_v27, %v4699_v57  ;;  %v4814_v46 = vmul.f32 %v4807_v27, %v4768_v47  ;;  %v4815_v33 = vmul.f32 %v4807_v27, %v4770_v41 }
0x13cf   :  { %v4824_v52 = vcombine.low %v4808_v29, %v4809_v40  ;;  %v4825_v9 = vcombine.low %v4810_v8, %v4811_v14 }
0x13d0   :  { %v4841_v16 = vcombine.low %v4812_v7, %v4813_v21  ;;  %v4842_v56 = vcombine.low %v4814_v46, %v4815_v33 }
0x13d1   :  { %v4832_v6 = vrot.slane %v4824_v52, %v12213_v19  ;;  %v4839_v12 = vrot.slane %v4825_v9, %v12213_v19 }
0x13d2   :  { %v4849_v61 = vrot.slane %v4841_v16, %v12213_v19  ;;  %v4856_v3 = vrot.slane %v4842_v56, %v12213_v19 }
0x13d3   :  { %v4840_v20 = vcombine.low %v4832_v6, %v4839_v12 }
0x13d4   :  { %v4857_v50 = vcombine.low %v4849_v61, %v4856_v3 }
0x13d5   :  { %v4860_v17 = vadd.f32 %v4840_v20, %v13438_v5 }
0x13d6   :  { %v4861_v57 = vadd.f32 %v4857_v50, %v13441_v31 }
0x13d7   :  { %v4862_v41 = vsub.f32 %v4860_v17, %v13295_v58 }
0x13d8   :  { %v4863_v39 = vsub.f32 %v4861_v57, %v13303_v43 }
0x13d9   :  { %v4864_v47 = vmul.f32 %v4862_v41, %v4862_v41 }
0x13da   :  { %v4865_v11 = vmul.f32 %v4863_v39, %v4863_v39 }
0x13db   :  { %v4868_v32 = vcombine.high %v4864_v47, %v4864_v47  ;;  %v4875_v52 = vrot.slane %v4864_v47, %v12213_v19 }
0x13dc   :  { %v4885_v48 = vcombine.high %v4865_v11, %v4865_v11  ;;  %v4892_v27 = vrot.slane %v4865_v11, %v12213_v19 }
0x13dd   :  { %v4882_v9 = vrot.slane %v4868_v32, %v12213_v19  ;;  %v4883_v24 = vcombine.high %v4875_v52, %v4875_v52  ;;  %v4910_v5 = vsel %vm820_vm1, %v4875_v52, 0.0 }
0x13de   :  { %v4899_v14 = vrot.slane %v4885_v48, %v12213_v19  ;;  %v4900_v7 = vcombine.high %v4892_v27, %v4892_v27  ;;  %v4917_v33 = vsel %vm820_vm1, %v4892_v27, 0.0 }
0x13df   :  { %v4884_v56 = vcombine.high %v4882_v9, %v4882_v9  ;;  %v4911_v31 = vsel %vm820_vm1, %v4883_v24, 0.0  ;;  %v4913_v40 = vsel %vm820_vm1, %v4882_v9, 0.0 }
0x13e0   :  { %v4912_v29 = vadd.f32 %v4911_v31, %v4910_v5  ;;  %v4901_v6 = vcombine.high %v4899_v14, %v4899_v14  ;;  %v4919_v12 = vsel %vm820_vm1, %v4900_v7, 0.0  ;;  %v4921_v3 = vsel %vm820_vm1, %v4899_v14, 0.0 }
0x13e1   :  { %v4915_v21 = vsel %vm820_vm1, %v4884_v56, 0.0 }
0x13e2   :  { %v4914_v8 = vadd.f32 %v4913_v40, %v4912_v29  ;;  %v4923_v50 = vsel %vm820_vm1, %v4901_v6, 0.0  ;;  %v14819_v6 = vld [vmem:[#allocation69_spill] sm:$0xff] }
0x13e4   :  { %v4916_v46 = vadd.f32 %v4915_v21, %v4914_v8 }
0x13e6   :  { %v4918_v16 = vadd.f32 %v4917_v33, %v4916_v46 }
0x13e8   :  { %v4920_v61 = vadd.f32 %v4919_v12, %v4918_v16  ;;  %v14820_v12 = vld [vmem:[#allocation71_spill] sm:$0xff] }
0x13ea   :  { %v4922_v20 = vadd.f32 %v4921_v3, %v4920_v61  ;;  %v14821_v61 = vld [vmem:[#allocation72_spill] sm:$0xff]  ;;  %v14822_v3 = vmov 0.0  }
0x13ec   :  { %v4924_v17 = vadd.f32 %v4923_v50, %v4922_v20  ;;  %v14823_v20 = vld [vmem:[#allocation74_spill] sm:$0xff]  ;;  %v14824_v50 = vld [vmem:[#allocation73_spill] sm:$0xff] }
0x13ee   :  { %4925 = vadd.xlane.f32.xlu1 %v4924_v17  ;;  %v14825_v17 = vld [vmem:[#allocation75_spill] sm:$0xff] }
0x147b   :  { %v4926_v57 = vpop.xlane.xlu1 %4925 }
0x147c   :  { %11885 = vrsqrt.f32 %v4926_v57  ;;  %vm4929_vm15 = vcmp.eq.f32.partialorder %v4926_v57, inf  ;;  %v4932_v32 = vand.u32 2147483648, %v4926_v57  ;;  %vm4931_vm2 = vcmp.eq.f32.partialorder %v4926_v57, 0.0 }
0x1486   :  { %v11886_v47 = vpop.eup %11885 }
0x1487   :  { %v4928_v11 = vmul.f32 %v11886_v47, %v4926_v57  ;;  %v14827_v47 = vld [vmem:[#allocation78_spill] sm:$0xff] }
0x1489   :  { %v4930_v52 = vsel %vm4929_vm15, %v4926_v57, %v4928_v11  ;;  %v14826_v57 = vld [vmem:[#allocation76_spill] sm:$0xff]  ;;  %v14828_v11 = vld [vmem:[#allocation77_spill] sm:$0xff] }
0x148a   :  { %v4933_v9 = vsel %vm4931_vm2, %v4932_v32, %v4930_v52  ;;  %v14829_v32 = vld [vmem:[#allocation79_spill] sm:$0xff] }
0x148b   :  { %v4935_v24 = vadd.f32 1e-07, %v4933_v9  ;;  %vm4934_vm3 = vcmp.gt.f32.partialorder %v4933_v9, 0.1 }
0x148d   :  { %11887 = vrcp.f32 %v4935_v24 }
0x1497   :  { %v11888_v48 = vpop.eup %11887 }
0x1498   :  { %v4937_v56 = vmul.f32 0.1, %v11888_v48 }
0x149a   :  { %v4938_v27 = vsel %vm4934_vm3, %v4937_v56, 1.0 }
0x149b   :  { %v4946_v5 = vrot.slane %v4938_v27, %v12864_v53  ;;  %v13633_v27 = vld [vmem:[%s14292_s4] ss:$0 sm:$0xff] }
0x149c   :  { %14830 = vst [vmem:[#allocation46_spill] sm:$0xff] %v13633_v27 }
0x149d   :  { %v4948_v31 = vmul.f32 %v4946_v5, %v4862_v41  ;;  %v4949_v29 = vmul.f32 %v4946_v5, %v4863_v39 }
0x149f   :  { %v13573_v40 = vadd.f32 %v13295_v58, %v4948_v31  ;;  %v13576_v8 = vadd.f32 %v13303_v43, %v4949_v29 }
0x14a1   :  { %v4961_v14 = vrot.slane %v13573_v40, %v12213_v19  ;;  %v4954_v7 = vcombine.high %v13573_v40, %v13573_v40  ;;  %v4971_v21 = vcombine.high %v13576_v8, %v13576_v8  ;;  %v4978_v46 = vrot.slane %v13576_v8, %v12213_v19 }
0x14a3   :  { %v4969_v41 = vcombine.high %v4961_v14, %v4961_v14  ;;  %v4968_v39 = vrot.slane %v4954_v7, %v12213_v19  ;;  %v4985_v58 = vrot.slane %v4971_v21, %v12213_v19  ;;  %v4986_v33 = vcombine.high %v4978_v46, %v4978_v46 }
0x14a5   :  { %5060 = vmatprep.mubr.f32.mxu0 %v4969_v41  ;;  %v4970_v43 = vcombine.high %v4968_v39, %v4968_v39  ;;  %v4987_v16 = vcombine.high %v4985_v58, %v4985_v58 }
0x14a6   :  { %5061 = vmatmul.mubr.f32.vlgmr.msra.gmra.mrb[48].mxu0 %v4961_v14 }
0x14a7   :  { %11134 = vmatpush3.bf16.msra.mxu0 %v12354_v30  ;;  %5130 = vmatprep.mubr.f32.mxu1 %v4970_v43 }
0x14a8   :  { %5200 = vmatprep.mubr.f32.mxu0 %v4986_v33  ;;  %5131 = vmatmul.mubr.f32.vlgmr.msra.gmra.mrb[48].mxu1 %v4968_v39  ;;  %v13639_v33 = vld [vmem:[%s14289_s1] sm:$0x3] }
0x14a9   :  { %11166 = vmatpush3.bf16.msra.mxu1 %v12358_v35  ;;  %11136 = vmatprep.subr.bf16.mxu0 %v12360_v36  ;;  %14831 = vst [vmem:[#allocation45_spill] sm:$0xff] %v13639_v33 }
0x14aa   :  { %5270 = vmatprep.mubr.f32.mxu1 %v4987_v16  ;;  %11168 = vmatprep.subr.bf16.mxu1 %v12372_v44 }
0x14ab   :  { %11138 = vmatpush3.bf16.msra.mxu0 %v12392_v60 }
0x14ac   :  { %11140 = vmatprep.subr.bf16.mxu0 %v12398_v63 }
0x14ad   :  { %11170 = vmatpush3.bf16.msra.mxu1 %v12396_v62 }
0x14ae   :  { %11172 = vmatprep.subr.bf16.mxu1 %v14558_v28 }
0x14af   :  { %11142 = vmatpush3.bf16.msra.mxu0 %v14559_v15 }
0x14b0   :  { %11144 = vmatprep.subr.bf16.mxu0 %v14560_v18 }
0x14b1   :  { %11174 = vmatpush3.bf16.msra.mxu1 %v14561_v13 }
0x14b2   :  { %11176 = vmatprep.subr.bf16.mxu1 %v14562_v59 }
0x14b3   :  { %11146 = vmatpush3.bf16.msra.mxu0 %v14563_v55 }
0x14b4   :  { %11148 = vmatprep.subr.bf16.mxu0 %v14564_v45 }
0x14b5   :  { %11178 = vmatpush3.bf16.msra.mxu1 %v14565_v23 }
0x14b6   :  { %11180 = vmatprep.subr.bf16.mxu1 %v14566_v54 }
0x14b7   :  { %11150 = vmatpush3.bf16.msra.mxu0 %v14567_v42 }
0x14b8   :  { %11152 = vmatprep.subr.bf16.mxu0 %v14568_v10 }
0x14b9   :  { %11182 = vmatpush3.bf16.msra.mxu1 %v14609_v1 }
0x14ba   :  { %11184 = vmatprep.subr.bf16.mxu1 %v14610_v51 }
0x14bb   :  { %11154 = vmatpush3.bf16.msra.mxu0 %v14611_v25 }
0x14bc   :  { %11156 = vmatprep.subr.bf16.mxu0 %v14612_v2 }
0x14bd   :  { %11186 = vmatpush3.bf16.msra.mxu1 %v14613_v49 }
0x14be   :  { %11188 = vmatprep.subr.bf16.mxu1 %v14614_v37 }
0x14bf   :  { %11158 = vmatpush3.bf16.msra.mxu0 %v14615_v4 }
0x14c0   :  { %11160 = vmatprep.subr.bf16.mxu0 %v14616_v38 }
0x14c1   :  { %11190 = vmatpush3.bf16.msra.mxu1 %v14660_v26 }
0x14c2   :  { %11192 = vmatprep.subr.bf16.mxu1 %v14661_v22 }
0x14c3   :  { %11162 = vmatpush3.bf16.msra.mxu0 %v14662_v0 }
0x14c4   :  { %11196 = vmatprep.subr.bf16.mxu0 %v14663_v34 }
0x14c5   :  { %11194 = vmatpush3.bf16.msra.mxu1 %v14819_v6 }
0x14c6   :  { %5201 = vmatmul.mubr.f32.vlgmr.msra.gmra.mrb[50].mxu0 %v4978_v46  ;;  %11204 = vmatprep.subr.bf16.mxu1 %v14820_v12 }
0x14c7   :  { %11198 = vmatpush1.bf16.msra.mxu0 %v14821_v61  ;;  %5345 = vmatprep.mubr.f32.mxu0 %v14822_v3 }
0x14c8   :  { %5271 = vmatmul.mubr.f32.vlgmr.msra.gmra.mrb[50].mxu1 %v4985_v58  ;;  %11200 = vmatprep.subr.bf16.mxu0 %v14823_v20 }
0x14c9   :  { %11206 = vmatpush1.bf16.msra.mxu1 %v14824_v50  ;;  %5416 = vmatprep.mubr.f32.mxu1 %v14822_v3 }
0x14ca   :  { %11208 = vmatprep.subr.bf16.mxu1 %v14825_v17 }
0x14cb   :  { %11202 = vmatpush1.bf16.msra.mxu0 %v14826_v57 }
0x14cc   :  { %11212 = vmatprep.subr.bf16.mxu0 %v14827_v47 }
0x14cd   :  { %11210 = vmatpush1.bf16.msra.mxu1 %v14828_v11 }
0x14ce   :  { %11220 = vmatprep.subr.bf16.mxu1 %v14829_v32 }
0x1579   :  { %v9439_v52 = vpop.f32.mrb[48].mxu0 }
0x157a   :  { %v9440_v9 = vpop.f32.mrb[49].mxu0 }
0x157b   :  { %v9441_v24 = vadd.f32 %v9440_v9, %v9439_v52  ;;  %v9474_v48 = vpop.f32.mrb[48].mxu1  ;;  %v14832_v9 = vld [vmem:[#allocation83_spill] sm:$0xff] }
0x157c   :  { %v9475_v56 = vpop.f32.mrb[49].mxu1 }
0x157d   :  { %v5063_v5 = vadd.f32 %v13633_v27, %v9441_v24  ;;  %v9476_v31 = vadd.f32 %v9475_v56, %v9474_v48  ;;  %v14833_v24 = vld [vmem:[#allocation84_spill] sm:$0xff]  ;;  %v14834_v48 = vld [vmem:[#allocation85_spill] sm:$0xff]  ;;  %v14835_v56 = vld [vmem:[#allocation86_spill] sm:$0xff] }
0x157f   :  { %v5133_v29 = vadd.f32 %v9476_v31, %v5063_v5  ;;  %v14836_v5 = vld [vmem:[#allocation87_spill] sm:$0xff]  ;;  %v14837_v31 = vld [vmem:[#allocation88_spill] sm:$0xff] }
0x1599   :  { %v9509_v14 = vpop.f32.mrb[50].mxu0 }
0x159a   :  { %v9510_v7 = vpop.f32.mrb[51].mxu0 }
0x159b   :  { %v9511_v21 = vadd.f32 %v9510_v7, %v9509_v14  ;;  %v9544_v46 = vpop.f32.mrb[50].mxu1  ;;  %v14839_v14 = vld [vmem:[#allocation7_spill] sm:$0xff]  ;;  %v14840_v7 = vld [vmem:[#allocation6_spill] sm:$0xff] }
0x159c   :  { %v9545_v41 = vpop.f32.mrb[51].mxu1 }
0x159d   :  { %v5203_v39 = vadd.f32 %v9511_v21, %v5133_v29  ;;  %v9546_v58 = vadd.f32 %v9545_v41, %v9544_v46  ;;  %v14838_v29 = vld [vmem:[#allocation5_spill] sm:$0xff]  ;;  %v14841_v21 = vld [vmem:[#allocation8_spill] sm:$0xff]  ;;  %v14843_v41 = vld [vmem:[#allocation11_spill] sm:$0xff] }
0x159e   :  { %v14842_v46 = vld [vmem:[#allocation9_spill] sm:$0xff] }
0x159f   :  { %v5273_v43 = vadd.f32 %v9546_v58, %v5203_v39  ;;  %v14844_v39 = vld [vmem:[#allocation10_spill] sm:$0xff]  ;;  %v14845_v58 = vld [vmem:[#allocation12_spill] sm:$0xff] }
0x15a1   :  { %v5276_v16 = vsub.f32 %v5273_v43, %v13639_v33  ;;  %v14846_v43 = vld [vmem:[#allocation13_spill] sm:$0xff] }
0x15a3   :  { %v5277_v52 = vmul.f32 0.03125, %v5276_v16  ;;  %v14847_v16 = vld [vmem:[#allocation15_spill] sm:$0xff] }
0x15a5   :  { %8551 = vmatmul.mubr.msk.f32.vlgmr.msra.gmra.mrb[52].mxu0 %vm524_vm0, %v5277_v52  ;;  %8552 = vmatmul.mubr.msk.f32.vlgmr.msra.gmra.mrb[52].mxu1 %vm524_vm0, %v5277_v52 }
0x15a6   :  { %11214 = vmatpush1.bf16.msra.mxu0 %v14832_v9  ;;  %11222 = vmatpush1.bf16.msra.mxu1 %v14833_v24 }
0x15a7   :  { %11216 = vmatprep.subr.bf16.mxu0 %v14834_v48  ;;  %11224 = vmatprep.subr.bf16.mxu1 %v14835_v56 }
0x15a8   :  { %5487 = vmatprep.mubr.f32.mxu0 %v14822_v3  ;;  %5558 = vmatprep.mubr.f32.mxu1 %v14822_v3 }
0x15aa   :  { %11218 = vmatpush1.bf16.msra.mxu0 %v14836_v5  ;;  %11226 = vmatpush1.bf16.msra.mxu1 %v14837_v31 }
0x15ab   :  { %11228 = vmatprep.subr.bf16.mxu0 %v14838_v29  ;;  %11260 = vmatprep.subr.bf16.mxu1 %v14839_v14  ;;  %v14848_v14 = vld [vmem:[#allocation14_spill] sm:$0xff]  ;;  %v14849_v29 = vld [vmem:[#allocation16_spill] sm:$0xff] }
0x15ad   :  { %8553 = vmatmul.mubr.msk.f32.vlgmr.msra.gmra.mrb[54].mxu0 %vm524_vm0, %v5277_v52  ;;  %8554 = vmatmul.mubr.msk.f32.vlgmr.msra.gmra.mrb[54].mxu1 %vm524_vm0, %v5277_v52  ;;  %v14850_v52 = vld [vmem:[#allocation17_spill] sm:$0xff] }
0x15ae   :  { %11230 = vmatpush3.bf16.msra.mxu0 %v14840_v7  ;;  %11262 = vmatpush3.bf16.msra.mxu1 %v14841_v21  ;;  %v14851_v7 = vld [vmem:[#allocation18_spill] sm:$0xff]  ;;  %v14852_v21 = vld [vmem:[#allocation19_spill] sm:$0xff] }
0x15af   :  { %11232 = vmatprep.subr.bf16.mxu0 %v14842_v46  ;;  %11264 = vmatprep.subr.bf16.mxu1 %v14843_v41  ;;  %v14853_v46 = vld [vmem:[#allocation20_spill] sm:$0xff]  ;;  %v14854_v41 = vld [vmem:[#allocation21_spill] sm:$0xff] }
0x15b2   :  { %11234 = vmatpush3.bf16.msra.mxu0 %v14844_v39  ;;  %11266 = vmatpush3.bf16.msra.mxu1 %v14845_v58  ;;  %v14855_v39 = vld [vmem:[#allocation22_spill] sm:$0xff]  ;;  %v14856_v58 = vld [vmem:[#allocation23_spill] sm:$0xff] }
0x15b3   :  { %11236 = vmatprep.subr.bf16.mxu0 %v14846_v43  ;;  %11268 = vmatprep.subr.bf16.mxu1 %v14847_v16  ;;  %v14857_v43 = vld [vmem:[#allocation24_spill] sm:$0xff]  ;;  %v14858_v16 = vld [vmem:[#allocation25_spill] sm:$0xff] }
0x15b6   :  { %11238 = vmatpush3.bf16.msra.mxu0 %v14848_v14  ;;  %11270 = vmatpush3.bf16.msra.mxu1 %v14849_v29  ;;  %v14859_v14 = vld [vmem:[#allocation26_spill] sm:$0xff]  ;;  %v14860_v29 = vld [vmem:[#allocation27_spill] sm:$0xff] }
0x15b7   :  { %11240 = vmatprep.subr.bf16.mxu0 %v14850_v52  ;;  %11272 = vmatprep.subr.bf16.mxu1 %v14851_v7  ;;  %v14861_v52 = vld [vmem:[#allocation28_spill] sm:$0xff]  ;;  %v14862_v7 = vld [vmem:[#allocation29_spill] sm:$0xff] }
0x15ba   :  { %11242 = vmatpush3.bf16.msra.mxu0 %v14852_v21  ;;  %11274 = vmatpush3.bf16.msra.mxu1 %v14853_v46  ;;  %v14863_v21 = vld [vmem:[#allocation30_spill] sm:$0xff]  ;;  %v14864_v46 = vld [vmem:[#allocation32_spill] sm:$0xff] }
0x15bb   :  { %11244 = vmatprep.subr.bf16.mxu0 %v14854_v41  ;;  %11276 = vmatprep.subr.bf16.mxu1 %v14855_v39  ;;  %v14865_v41 = vld [vmem:[#allocation35_spill] sm:$0xff]  ;;  %v14866_v39 = vld [vmem:[#allocation36_spill] sm:$0xff] }
0x15be   :  { %11246 = vmatpush3.bf16.msra.mxu0 %v14856_v58  ;;  %11278 = vmatpush3.bf16.msra.mxu1 %v14857_v43  ;;  %v14867_v58 = vld [vmem:[#allocation37_spill] sm:$0xff]  ;;  %v14868_v43 = vld [vmem:[#allocation39_spill] sm:$0xff] }
0x15bf   :  { %11248 = vmatprep.subr.bf16.mxu0 %v14858_v16  ;;  %11280 = vmatprep.subr.bf16.mxu1 %v14859_v14  ;;  %v14869_v16 = vld [vmem:[#allocation40_spill] sm:$0xff]  ;;  %v14870_v14 = vld [vmem:[#allocation41_spill] sm:$0xff] }
0x15c2   :  { %11250 = vmatpush3.bf16.msra.mxu0 %v14860_v29  ;;  %11282 = vmatpush3.bf16.msra.mxu1 %v14861_v52  ;;  %v14871_v29 = vld [vmem:[#allocation42_spill] sm:$0xff] }
0x15c3   :  { %11252 = vmatprep.subr.bf16.mxu0 %v14862_v7  ;;  %11284 = vmatprep.subr.bf16.mxu1 %v14863_v21 }
0x15c6   :  { %11254 = vmatpush3.bf16.msra.mxu0 %v14864_v46  ;;  %11286 = vmatpush3.bf16.msra.mxu1 %v14865_v41 }
0x15c7   :  { %11256 = vmatprep.subr.bf16.mxu0 %v14866_v39  ;;  %11288 = vmatprep.subr.bf16.mxu1 %v14867_v58 }
0x15ca   :  { %11258 = vmatpush3.bf16.msra.mxu0 %v14868_v43  ;;  %11290 = vmatpush3.bf16.msra.mxu1 %v14869_v16 }
0x15cb   :  { %11292 = vmatprep.subr.bf16.mxu0 %v14870_v14  ;;  %11324 = vmatprep.subr.bf16.mxu1 %v14871_v29 }
0x1678   :  { %v5347_v52 = vpop.f32.mrb[52].mxu0  ;;  %v5418_v7 = vpop.f32.mrb[52].mxu1 }
0x1679   :  { %v5565_v31 = vmul.f32 %v5347_v52, %v5347_v52  ;;  %v5349_v21 = vpop.f32.mrb[53].mxu0  ;;  %v5420_v5 = vpop.f32.mrb[53].mxu1  ;;  %v5567_v46 = vmul.f32 %v5418_v7, %v5418_v7 }
0x167a   :  { %v5566_v56 = vmul.f32 %v5349_v21, %v5349_v21  ;;  %v5568_v58 = vmul.f32 %v5420_v5, %v5420_v5 }
0x167b   :  { %v5573_v41 = vsel %vm820_vm1, %v5565_v31, 0.0  ;;  %v5576_v43 = vsel %vm820_vm1, %v5567_v46, 0.0 }
0x167c   :  { %v5574_v39 = vsel %vm820_vm1, %v5566_v56, 0.0  ;;  %v5578_v14 = vsel %vm820_vm1, %v5568_v58, 0.0 }
0x167d   :  { %v5575_v48 = vadd.f32 %v5574_v39, %v5573_v41 }
0x167f   :  { %v5577_v16 = vadd.f32 %v5576_v43, %v5575_v48 }
0x1680   :  { %v5489_v24 = vpop.f32.mrb[54].mxu0  ;;  %v5560_v29 = vpop.f32.mrb[54].mxu1 }
0x1681   :  { %v5579_v9 = vadd.f32 %v5578_v14, %v5577_v16  ;;  %v5569_v33 = vmul.f32 %v5489_v24, %v5489_v24  ;;  %v5491_v27 = vpop.f32.mrb[55].mxu0  ;;  %v5562_v32 = vpop.f32.mrb[55].mxu1  ;;  %v5571_v57 = vmul.f32 %v5560_v29, %v5560_v29 }
0x1682   :  { %v5570_v11 = vmul.f32 %v5491_v27, %v5491_v27  ;;  %v5572_v17 = vmul.f32 %v5562_v32, %v5562_v32 }
0x1683   :  { %v5580_v47 = vsel %vm820_vm1, %v5569_v33, 0.0  ;;  %v5584_v46 = vsel %vm820_vm1, %v5571_v57, 0.0 }
0x1684   :  { %v5581_v31 = vadd.f32 %v5580_v47, %v5579_v9  ;;  %v5582_v56 = vsel %vm820_vm1, %v5570_v11, 0.0  ;;  %v5586_v39 = vsel %vm820_vm1, %v5572_v17, 0.0 }
0x1686   :  { %v5583_v41 = vadd.f32 %v5582_v56, %v5581_v31 }
0x1688   :  { %v5585_v48 = vadd.f32 %v5584_v46, %v5583_v41 }
0x168a   :  { %v5587_v58 = vadd.f32 %v5586_v39, %v5585_v48 }
0x168c   :  { %5588 = vadd.xlane.f32.xlu0 %v5587_v58 }
0x1719   :  { %v5589_v14 = vpop.xlane.xlu0 %5588 }
0x171a   :  { %11889 = vrsqrt.f32 %v5589_v14  ;;  %vm5592_vm4 = vcmp.eq.f32.partialorder %v5589_v14, inf  ;;  %v5595_v50 = vand.u32 2147483648, %v5589_v14  ;;  %vm5594_vm5 = vcmp.eq.f32.partialorder %v5589_v14, 0.0 }
0x1724   :  { %v11890_v43 = vpop.eup %11889 }
0x1725   :  { %v5591_v16 = vmul.f32 %v11890_v43, %v5589_v14 }
0x1727   :  { %v5593_v33 = vsel %vm5592_vm4, %v5589_v14, %v5591_v16 }
0x1728   :  { %v5596_v47 = vsel %vm5594_vm5, %v5595_v50, %v5593_v33 }
0x1729   :  { %v5597_v9 = vadd.f32 1e-10, %v5596_v47 }
0x172b   :  { %11891 = vrcp.f32 %v5597_v9 }
0x1735   :  { %v11892_v11 = vpop.eup %11891 }
0x1736   :  { %v5599_v31 = vmul.f32 0.1, %v11892_v11 }
0x1738   :  { %v5600_v56 = vmul.f32 %v5599_v31, %v5347_v52  ;;  %v5601_v57 = vmul.f32 %v5599_v31, %v5349_v21  ;;  %v5602_v41 = vmul.f32 %v5599_v31, %v5418_v7  ;;  %v5603_v46 = vmul.f32 %v5599_v31, %v5420_v5 }
0x1739   :  { %v5604_v17 = vmul.f32 %v5599_v31, %v5489_v24  ;;  %v5605_v48 = vmul.f32 %v5599_v31, %v5491_v27  ;;  %v5606_v39 = vmul.f32 %v5599_v31, %v5560_v29  ;;  %v5607_v58 = vmul.f32 %v5599_v31, %v5562_v32  ;;  %v13705_v32 = vld [vmem:[%s14288_s0] sm:$0xff] }
0x173a   :  { %v5616_v20 = vcombine.low %v5600_v56, %v5601_v57  ;;  %v5617_v3 = vcombine.low %v5602_v41, %v5603_v46 }
0x173b   :  { %v5633_v43 = vcombine.low %v5604_v17, %v5605_v48  ;;  %v5634_v61 = vcombine.low %v5606_v39, %v5607_v58 }
0x173c   :  { %v5624_v16 = vrot.slane %v5616_v20, %v12213_v19  ;;  %v5631_v50 = vrot.slane %v5617_v3, %v12213_v19  ;;  %v13711_v3 = vld [vmem:[%s14288_s0 + $0x8] sm:$0xff] }
0x173d   :  { %v5641_v14 = vrot.slane %v5633_v43, %v12213_v19  ;;  %v5648_v33 = vrot.slane %v5634_v61, %v12213_v19 }
0x173e   :  { %v5632_v52 = vcombine.low %v5624_v16, %v5631_v50 }
0x173f   :  { %v5649_v21 = vcombine.low %v5641_v14, %v5648_v33 }
0x1740   :  { %v5652_v5 = vadd.f32 %v5632_v52, %v13573_v40 }
0x1741   :  { %v5653_v27 = vadd.f32 %v5649_v21, %v13576_v8 }
0x1742   :  { %v5654_v24 = vsub.f32 %v5652_v5, %v13705_v32 }
0x1743   :  { %v5655_v61 = vsub.f32 %v5653_v27, %v13711_v3 }
0x1744   :  { %v5656_v20 = vmul.f32 %v5654_v24, %v5654_v24 }
0x1745   :  { %v5657_v29 = vmul.f32 %v5655_v61, %v5655_v61 }
0x1746   :  { %v5660_v7 = vcombine.high %v5656_v20, %v5656_v20  ;;  %v5667_v40 = vrot.slane %v5656_v20, %v12213_v19 }
0x1747   :  { %v5677_v9 = vcombine.high %v5657_v29, %v5657_v29  ;;  %v5684_v31 = vrot.slane %v5657_v29, %v12213_v19 }
0x1748   :  { %v5674_v8 = vrot.slane %v5660_v7, %v12213_v19  ;;  %v5675_v47 = vcombine.high %v5667_v40, %v5667_v40  ;;  %v5702_v56 = vsel %vm820_vm1, %v5667_v40, 0.0 }
0x1749   :  { %v5691_v48 = vrot.slane %v5677_v9, %v12213_v19  ;;  %v5692_v39 = vcombine.high %v5684_v31, %v5684_v31  ;;  %v5709_v16 = vsel %vm820_vm1, %v5684_v31, 0.0 }
0x174a   :  { %v5676_v11 = vcombine.high %v5674_v8, %v5674_v8  ;;  %v5703_v57 = vsel %vm820_vm1, %v5675_v47, 0.0  ;;  %v5705_v46 = vsel %vm820_vm1, %v5674_v8, 0.0 }
0x174b   :  { %v5704_v41 = vadd.f32 %v5703_v57, %v5702_v56  ;;  %v5693_v14 = vcombine.high %v5691_v48, %v5691_v48  ;;  %v5711_v33 = vsel %vm820_vm1, %v5692_v39, 0.0  ;;  %v5713_v21 = vsel %vm820_vm1, %v5691_v48, 0.0 }
0x174c   :  { %v5707_v58 = vsel %vm820_vm1, %v5676_v11, 0.0 }
0x174d   :  { %v5706_v17 = vadd.f32 %v5705_v46, %v5704_v41  ;;  %v5715_v27 = vsel %vm820_vm1, %v5693_v14, 0.0 }
0x174f   :  { %v5708_v43 = vadd.f32 %v5707_v58, %v5706_v17 }
0x1751   :  { %v5710_v50 = vadd.f32 %v5709_v16, %v5708_v43 }
0x1753   :  { %v5712_v52 = vadd.f32 %v5711_v33, %v5710_v50 }
0x1755   :  { %v5714_v5 = vadd.f32 %v5713_v21, %v5712_v52 }
0x1757   :  { %v5716_v20 = vadd.f32 %v5715_v27, %v5714_v5  ;;  %v14872_v5 = vld [vmem:[#allocation72_spill] sm:$0xff]  ;;  %v14873_v27 = vmov 0.0  }
0x1759   :  { %5717 = vadd.xlane.f32.xlu1 %v5716_v20  ;;  %v14874_v20 = vld [vmem:[#allocation74_spill] sm:$0xff] }
0x17e6   :  { %v5718_v29 = vpop.xlane.xlu1 %5717 }
0x17e7   :  { %11893 = vrsqrt.f32 %v5718_v29  ;;  %vm5721_vm6 = vcmp.eq.f32.partialorder %v5718_v29, inf  ;;  %v5724_v8 = vand.u32 2147483648, %v5718_v29  ;;  %vm5723_vm7 = vcmp.eq.f32.partialorder %v5718_v29, 0.0 }
0x17f1   :  { %v11894_v7 = vpop.eup %11893 }
0x17f2   :  { %v5720_v40 = vmul.f32 %v11894_v7, %v5718_v29  ;;  %v14876_v7 = vld [vmem:[#allocation75_spill] sm:$0xff] }
0x17f4   :  { %v5722_v47 = vsel %vm5721_vm6, %v5718_v29, %v5720_v40  ;;  %v14875_v29 = vld [vmem:[#allocation73_spill] sm:$0xff]  ;;  %v14877_v40 = vld [vmem:[#allocation76_spill] sm:$0xff] }
0x17f5   :  { %v5725_v9 = vsel %vm5723_vm7, %v5724_v8, %v5722_v47  ;;  %v14878_v8 = vld [vmem:[#allocation78_spill] sm:$0xff]  ;;  %v14879_v47 = vld [vmem:[#allocation77_spill] sm:$0xff] }
0x17f6   :  { %v5727_v11 = vadd.f32 1e-07, %v5725_v9  ;;  %vm5726_vm8 = vcmp.gt.f32.partialorder %v5725_v9, 0.1  ;;  %v14880_v9 = vld [vmem:[#allocation79_spill] sm:$0xff] }
0x17f8   :  { %11895 = vrcp.f32 %v5727_v11 }
0x1802   :  { %v11896_v31 = vpop.eup %11895 }
0x1803   :  { %v5729_v56 = vmul.f32 0.1, %v11896_v31 }
0x1805   :  { %v5730_v57 = vsel %vm5726_vm8, %v5729_v56, 1.0 }
0x1806   :  { %v5738_v41 = vrot.slane %v5730_v57, %v12864_v53 }
0x1808   :  { %v5740_v46 = vmul.f32 %v5738_v41, %v5654_v24  ;;  %v5741_v17 = vmul.f32 %v5738_v41, %v5655_v61 }
0x180a   :  { %v13728_v48 = vadd.f32 %v13705_v32, %v5740_v46  ;;  %v13731_v39 = vadd.f32 %v13711_v3, %v5741_v17  ;;  %v14881_v46 = vld [vmem:[#allocation46_spill] sm:$0xff] }
0x180c   :  { %v5753_v58 = vrot.slane %v13728_v48, %v12213_v19  ;;  %v5746_v43 = vcombine.high %v13728_v48, %v13728_v48  ;;  %v5763_v16 = vcombine.high %v13731_v39, %v13731_v39  ;;  %v5770_v50 = vrot.slane %v13731_v39, %v12213_v19 }
0x180e   :  { %v5761_v24 = vcombine.high %v5753_v58, %v5753_v58  ;;  %v5760_v61 = vrot.slane %v5746_v43, %v12213_v19  ;;  %v5777_v14 = vrot.slane %v5763_v16, %v12213_v19  ;;  %v5778_v52 = vcombine.high %v5770_v50, %v5770_v50 }
0x1810   :  { %5852 = vmatprep.mubr.f32.mxu0 %v5761_v24  ;;  %v5762_v33 = vcombine.high %v5760_v61, %v5760_v61  ;;  %v5779_v21 = vcombine.high %v5777_v14, %v5777_v14 }
0x1811   :  { %5853 = vmatmul.mubr.f32.vlgmr.msra.gmra.mrb[56].mxu0 %v5753_v58 }
0x1812   :  { %11294 = vmatpush3.bf16.msra.mxu0 %v12354_v30  ;;  %5922 = vmatprep.mubr.f32.mxu1 %v5762_v33 }
0x1813   :  { %5992 = vmatprep.mubr.f32.mxu0 %v5778_v52  ;;  %5923 = vmatmul.mubr.f32.vlgmr.msra.gmra.mrb[56].mxu1 %v5760_v61 }
0x1814   :  { %11326 = vmatpush3.bf16.msra.mxu1 %v12358_v35  ;;  %11296 = vmatprep.subr.bf16.mxu0 %v12360_v36 }
0x1815   :  { %6062 = vmatprep.mubr.f32.mxu1 %v5779_v21  ;;  %11328 = vmatprep.subr.bf16.mxu1 %v12372_v44 }
0x1816   :  { %11298 = vmatpush3.bf16.msra.mxu0 %v12392_v60 }
0x1817   :  { %11300 = vmatprep.subr.bf16.mxu0 %v12398_v63 }
0x1818   :  { %11330 = vmatpush3.bf16.msra.mxu1 %v12396_v62 }
0x1819   :  { %11332 = vmatprep.subr.bf16.mxu1 %v14558_v28 }
0x181a   :  { %11302 = vmatpush3.bf16.msra.mxu0 %v14559_v15 }
0x181b   :  { %11304 = vmatprep.subr.bf16.mxu0 %v14560_v18 }
0x181c   :  { %11334 = vmatpush3.bf16.msra.mxu1 %v14561_v13 }
0x181d   :  { %11336 = vmatprep.subr.bf16.mxu1 %v14562_v59 }
0x181e   :  { %11306 = vmatpush3.bf16.msra.mxu0 %v14563_v55 }
0x181f   :  { %11308 = vmatprep.subr.bf16.mxu0 %v14564_v45 }
0x1820   :  { %11338 = vmatpush3.bf16.msra.mxu1 %v14565_v23 }
0x1821   :  { %11340 = vmatprep.subr.bf16.mxu1 %v14566_v54 }
0x1822   :  { %11310 = vmatpush3.bf16.msra.mxu0 %v14567_v42 }
0x1823   :  { %11312 = vmatprep.subr.bf16.mxu0 %v14568_v10 }
0x1824   :  { %11342 = vmatpush3.bf16.msra.mxu1 %v14609_v1 }
0x1825   :  { %11344 = vmatprep.subr.bf16.mxu1 %v14610_v51 }
0x1826   :  { %11314 = vmatpush3.bf16.msra.mxu0 %v14611_v25 }
0x1827   :  { %11316 = vmatprep.subr.bf16.mxu0 %v14612_v2 }
0x1828   :  { %11346 = vmatpush3.bf16.msra.mxu1 %v14613_v49 }
0x1829   :  { %11348 = vmatprep.subr.bf16.mxu1 %v14614_v37 }
0x182a   :  { %11318 = vmatpush3.bf16.msra.mxu0 %v14615_v4 }
0x182b   :  { %11320 = vmatprep.subr.bf16.mxu0 %v14616_v38 }
0x182c   :  { %11350 = vmatpush3.bf16.msra.mxu1 %v14660_v26 }
0x182d   :  { %11352 = vmatprep.subr.bf16.mxu1 %v14661_v22 }
0x182e   :  { %11322 = vmatpush3.bf16.msra.mxu0 %v14662_v0 }
0x182f   :  { %11356 = vmatprep.subr.bf16.mxu0 %v14663_v34 }
0x1830   :  { %11354 = vmatpush3.bf16.msra.mxu1 %v14819_v6 }
0x1831   :  { %5993 = vmatmul.mubr.f32.vlgmr.msra.gmra.mrb[58].mxu0 %v5770_v50  ;;  %11364 = vmatprep.subr.bf16.mxu1 %v14820_v12 }
0x1832   :  { %11358 = vmatpush1.bf16.msra.mxu0 %v14872_v5  ;;  %6137 = vmatprep.mubr.f32.mxu0 %v14873_v27 }
0x1833   :  { %6063 = vmatmul.mubr.f32.vlgmr.msra.gmra.mrb[58].mxu1 %v5777_v14  ;;  %11360 = vmatprep.subr.bf16.mxu0 %v14874_v20 }
0x1834   :  { %11366 = vmatpush1.bf16.msra.mxu1 %v14875_v29  ;;  %6208 = vmatprep.mubr.f32.mxu1 %v14873_v27 }
0x1835   :  { %11368 = vmatprep.subr.bf16.mxu1 %v14876_v7 }
0x1836   :  { %11362 = vmatpush1.bf16.msra.mxu0 %v14877_v40 }
0x1837   :  { %11372 = vmatprep.subr.bf16.mxu0 %v14878_v8 }
0x1838   :  { %11370 = vmatpush1.bf16.msra.mxu1 %v14879_v47  ;;  %v14882_v47 = vld [vmem:[#allocation45_spill] sm:$0xff] }
0x1839   :  { %11380 = vmatprep.subr.bf16.mxu1 %v14880_v9 }
0x18e4   :  { %v9579_v11 = vpop.f32.mrb[56].mxu0 }
0x18e5   :  { %v9580_v31 = vpop.f32.mrb[57].mxu0 }
0x18e6   :  { %v9581_v56 = vadd.f32 %v9580_v31, %v9579_v11  ;;  %v9614_v57 = vpop.f32.mrb[56].mxu1  ;;  %v14883_v11 = vld [vmem:[#allocation83_spill] sm:$0xff]  ;;  %v14884_v31 = vld [vmem:[#allocation84_spill] sm:$0xff] }
0x18e7   :  { %v9615_v41 = vpop.f32.mrb[57].mxu1 }
0x18e8   :  { %v5855_v17 = vadd.f32 %v14881_v46, %v9581_v56  ;;  %v9616_v58 = vadd.f32 %v9615_v41, %v9614_v57  ;;  %v14885_v56 = vld [vmem:[#allocation85_spill] sm:$0xff]  ;;  %v14886_v57 = vld [vmem:[#allocation86_spill] sm:$0xff]  ;;  %v14887_v41 = vld [vmem:[#allocation87_spill] sm:$0xff] }
0x18ea   :  { %v5925_v43 = vadd.f32 %v9616_v58, %v5855_v17  ;;  %v14888_v17 = vld [vmem:[#allocation88_spill] sm:$0xff]  ;;  %v14890_v58 = vld [vmem:[#allocation7_spill] sm:$0xff] }
0x1904   :  { %v9649_v16 = vpop.f32.mrb[58].mxu0 }
0x1905   :  { %v9650_v50 = vpop.f32.mrb[59].mxu0 }
0x1906   :  { %v9651_v24 = vadd.f32 %v9650_v50, %v9649_v16  ;;  %v9684_v61 = vpop.f32.mrb[58].mxu1  ;;  %v14892_v16 = vld [vmem:[#allocation8_spill] sm:$0xff]  ;;  %v14893_v50 = vld [vmem:[#allocation9_spill] sm:$0xff] }
0x1907   :  { %v9685_v14 = vpop.f32.mrb[59].mxu1 }
0x1908   :  { %v5995_v33 = vadd.f32 %v9651_v24, %v5925_v43  ;;  %v9686_v52 = vadd.f32 %v9685_v14, %v9684_v61  ;;  %v14891_v43 = vld [vmem:[#allocation6_spill] sm:$0xff]  ;;  %v14894_v24 = vld [vmem:[#allocation11_spill] sm:$0xff]  ;;  %v14896_v14 = vld [vmem:[#allocation12_spill] sm:$0xff] }
0x1909   :  { %v14895_v61 = vld [vmem:[#allocation10_spill] sm:$0xff] }
0x190a   :  { %v6065_v21 = vadd.f32 %v9686_v52, %v5995_v33  ;;  %v14897_v33 = vld [vmem:[#allocation13_spill] sm:$0xff]  ;;  %v14898_v52 = vld [vmem:[#allocation15_spill] sm:$0xff] }
0x190c   :  { %v6068_v8 = vsub.f32 %v6065_v21, %v14882_v47  ;;  %v14899_v21 = vld [vmem:[#allocation14_spill] sm:$0xff] }
0x190e   :  { %v6069_v9 = vmul.f32 0.03125, %v6068_v8  ;;  %v14889_v8 = vld [vmem:[#allocation5_spill] sm:$0xff] }
0x1910   :  { %8555 = vmatmul.mubr.msk.f32.vlgmr.msra.gmra.mrb[60].mxu0 %vm524_vm0, %v6069_v9  ;;  %8556 = vmatmul.mubr.msk.f32.vlgmr.msra.gmra.mrb[60].mxu1 %vm524_vm0, %v6069_v9 }
0x1911   :  { %11374 = vmatpush1.bf16.msra.mxu0 %v14883_v11  ;;  %11382 = vmatpush1.bf16.msra.mxu1 %v14884_v31 }
0x1912   :  { %11376 = vmatprep.subr.bf16.mxu0 %v14885_v56  ;;  %11384 = vmatprep.subr.bf16.mxu1 %v14886_v57 }
0x1913   :  { %6279 = vmatprep.mubr.f32.mxu0 %v14873_v27  ;;  %6350 = vmatprep.mubr.f32.mxu1 %v14873_v27 }
0x1915   :  { %11378 = vmatpush1.bf16.msra.mxu0 %v14887_v41  ;;  %11386 = vmatpush1.bf16.msra.mxu1 %v14888_v17 }
0x1916   :  { %11388 = vmatprep.subr.bf16.mxu0 %v14889_v8  ;;  %11420 = vmatprep.subr.bf16.mxu1 %v14890_v58  ;;  %v14900_v58 = vld [vmem:[#allocation16_spill] sm:$0xff] }
0x1918   :  { %8557 = vmatmul.mubr.msk.f32.vlgmr.msra.gmra.mrb[62].mxu0 %vm524_vm0, %v6069_v9  ;;  %8558 = vmatmul.mubr.msk.f32.vlgmr.msra.gmra.mrb[62].mxu1 %vm524_vm0, %v6069_v9  ;;  %v14901_v9 = vld [vmem:[#allocation17_spill] sm:$0xff] }
0x1919   :  { %11390 = vmatpush3.bf16.msra.mxu0 %v14891_v43  ;;  %11422 = vmatpush3.bf16.msra.mxu1 %v14892_v16  ;;  %v14902_v43 = vld [vmem:[#allocation18_spill] sm:$0xff]  ;;  %v14903_v16 = vld [vmem:[#allocation19_spill] sm:$0xff] }
0x191a   :  { %11392 = vmatprep.subr.bf16.mxu0 %v14893_v50  ;;  %11424 = vmatprep.subr.bf16.mxu1 %v14894_v24  ;;  %v14904_v50 = vld [vmem:[#allocation20_spill] sm:$0xff]  ;;  %v14905_v24 = vld [vmem:[#allocation21_spill] sm:$0xff] }
0x191d   :  { %11394 = vmatpush3.bf16.msra.mxu0 %v14895_v61  ;;  %11426 = vmatpush3.bf16.msra.mxu1 %v14896_v14  ;;  %v14906_v61 = vld [vmem:[#allocation22_spill] sm:$0xff]  ;;  %v14907_v14 = vld [vmem:[#allocation23_spill] sm:$0xff] }
0x191e   :  { %11396 = vmatprep.subr.bf16.mxu0 %v14897_v33  ;;  %11428 = vmatprep.subr.bf16.mxu1 %v14898_v52  ;;  %v14908_v33 = vld [vmem:[#allocation24_spill] sm:$0xff]  ;;  %v14909_v52 = vld [vmem:[#allocation25_spill] sm:$0xff] }
0x1921   :  { %11398 = vmatpush3.bf16.msra.mxu0 %v14899_v21  ;;  %11430 = vmatpush3.bf16.msra.mxu1 %v14900_v58  ;;  %v14910_v21 = vld [vmem:[#allocation26_spill] sm:$0xff]  ;;  %v14911_v58 = vld [vmem:[#allocation27_spill] sm:$0xff] }
0x1922   :  { %11400 = vmatprep.subr.bf16.mxu0 %v14901_v9  ;;  %11432 = vmatprep.subr.bf16.mxu1 %v14902_v43  ;;  %v14912_v9 = vld [vmem:[#allocation28_spill] sm:$0xff]  ;;  %v14913_v43 = vld [vmem:[#allocation29_spill] sm:$0xff] }
0x1925   :  { %11402 = vmatpush3.bf16.msra.mxu0 %v14903_v16  ;;  %11434 = vmatpush3.bf16.msra.mxu1 %v14904_v50  ;;  %v14914_v16 = vld [vmem:[#allocation30_spill] sm:$0xff]  ;;  %v14915_v50 = vld [vmem:[#allocation32_spill] sm:$0xff] }
0x1926   :  { %11404 = vmatprep.subr.bf16.mxu0 %v14905_v24  ;;  %11436 = vmatprep.subr.bf16.mxu1 %v14906_v61  ;;  %v14916_v24 = vld [vmem:[#allocation35_spill] sm:$0xff]  ;;  %v14917_v61 = vld [vmem:[#allocation36_spill] sm:$0xff] }
0x1929   :  { %11406 = vmatpush3.bf16.msra.mxu0 %v14907_v14  ;;  %11438 = vmatpush3.bf16.msra.mxu1 %v14908_v33  ;;  %v14918_v14 = vld [vmem:[#allocation37_spill] sm:$0xff]  ;;  %v14919_v33 = vld [vmem:[#allocation39_spill] sm:$0xff] }
0x192a   :  { %11408 = vmatprep.subr.bf16.mxu0 %v14909_v52  ;;  %11440 = vmatprep.subr.bf16.mxu1 %v14910_v21  ;;  %v14920_v52 = vld [vmem:[#allocation40_spill] sm:$0xff]  ;;  %v14921_v21 = vld [vmem:[#allocation41_spill] sm:$0xff] }
0x192d   :  { %11410 = vmatpush3.bf16.msra.mxu0 %v14911_v58  ;;  %11442 = vmatpush3.bf16.msra.mxu1 %v14912_v9  ;;  %v14922_v58 = vld [vmem:[#allocation42_spill] sm:$0xff] }
0x192e   :  { %11412 = vmatprep.subr.bf16.mxu0 %v14913_v43  ;;  %11444 = vmatprep.subr.bf16.mxu1 %v14914_v16 }
0x1931   :  { %11414 = vmatpush3.bf16.msra.mxu0 %v14915_v50  ;;  %11446 = vmatpush3.bf16.msra.mxu1 %v14916_v24 }
0x1932   :  { %11416 = vmatprep.subr.bf16.mxu0 %v14917_v61  ;;  %11448 = vmatprep.subr.bf16.mxu1 %v14918_v14 }
0x1935   :  { %11418 = vmatpush3.bf16.msra.mxu0 %v14919_v33  ;;  %11450 = vmatpush3.bf16.msra.mxu1 %v14920_v52 }
0x1936   :  { %11452 = vmatprep.subr.bf16.mxu0 %v14921_v21  ;;  %11484 = vmatprep.subr.bf16.mxu1 %v14922_v58 }
0x19e3   :  { %v6139_v9 = vpop.f32.mrb[60].mxu0  ;;  %v6210_v43 = vpop.f32.mrb[60].mxu1 }
0x19e4   :  { %v6357_v8 = vmul.f32 %v6139_v9, %v6139_v9  ;;  %v6141_v16 = vpop.f32.mrb[61].mxu0  ;;  %v6212_v17 = vpop.f32.mrb[61].mxu1  ;;  %v6359_v50 = vmul.f32 %v6210_v43, %v6210_v43 }
0x19e5   :  { %v6358_v41 = vmul.f32 %v6141_v16, %v6141_v16  ;;  %v6360_v14 = vmul.f32 %v6212_v17, %v6212_v17 }
0x19e6   :  { %v6365_v24 = vsel %vm820_vm1, %v6357_v8, 0.0  ;;  %v6368_v33 = vsel %vm820_vm1, %v6359_v50, 0.0 }
0x19e7   :  { %v6366_v61 = vsel %vm820_vm1, %v6358_v41, 0.0  ;;  %v6370_v21 = vsel %vm820_vm1, %v6360_v14, 0.0 }
0x19e8   :  { %v6367_v57 = vadd.f32 %v6366_v61, %v6365_v24 }
0x19ea   :  { %v6369_v52 = vadd.f32 %v6368_v33, %v6367_v57 }
0x19eb   :  { %v6281_v56 = vpop.f32.mrb[62].mxu0  ;;  %v6352_v58 = vpop.f32.mrb[62].mxu1 }
0x19ec   :  { %v6371_v31 = vadd.f32 %v6370_v21, %v6369_v52  ;;  %v6361_v11 = vmul.f32 %v6281_v56, %v6281_v56  ;;  %v6283_v47 = vpop.f32.mrb[63].mxu0  ;;  %v6354_v46 = vpop.f32.mrb[63].mxu1  ;;  %v6363_v29 = vmul.f32 %v6352_v58, %v6352_v58 }
0x19ed   :  { %v6362_v40 = vmul.f32 %v6283_v47, %v6283_v47  ;;  %v6364_v20 = vmul.f32 %v6354_v46, %v6354_v46 }
0x19ee   :  { %v6372_v7 = vsel %vm820_vm1, %v6361_v11, 0.0  ;;  %v6376_v50 = vsel %vm820_vm1, %v6363_v29, 0.0 }
0x19ef   :  { %v6373_v8 = vadd.f32 %v6372_v7, %v6371_v31  ;;  %v6374_v41 = vsel %vm820_vm1, %v6362_v40, 0.0  ;;  %v6378_v61 = vsel %vm820_vm1, %v6364_v20, 0.0 }
0x19f1   :  { %v6375_v24 = vadd.f32 %v6374_v41, %v6373_v8 }
0x19f3   :  { %v6377_v57 = vadd.f32 %v6376_v50, %v6375_v24 }
0x19f5   :  { %v6379_v14 = vadd.f32 %v6378_v61, %v6377_v57 }
0x19f7   :  { %6380 = vadd.xlane.f32.xlu0 %v6379_v14 }
0x1a84   :  { %v6381_v33 = vpop.xlane.xlu0 %6380 }
0x1a85   :  { %11897 = vrsqrt.f32 %v6381_v33  ;;  %vm6384_vm9 = vcmp.eq.f32.partialorder %v6381_v33, inf  ;;  %v6387_v27 = vand.u32 2147483648, %v6381_v33  ;;  %vm6386_vm10 = vcmp.eq.f32.partialorder %v6381_v33, 0.0 }
0x1a8f   :  { %v11898_v52 = vpop.eup %11897 }
0x1a90   :  { %v6383_v21 = vmul.f32 %v11898_v52, %v6381_v33 }
0x1a92   :  { %v6385_v11 = vsel %vm6384_vm9, %v6381_v33, %v6383_v21 }
0x1a93   :  { %v6388_v7 = vsel %vm6386_vm10, %v6387_v27, %v6385_v11 }
0x1a94   :  { %v6389_v31 = vadd.f32 1e-10, %v6388_v7 }
0x1a96   :  { %11899 = vrcp.f32 %v6389_v31 }
0x1aa0   :  { %v11900_v40 = vpop.eup %11899 }
0x1aa1   :  { %v6391_v8 = vmul.f32 0.1, %v11900_v40 }
0x1aa3   :  { %v6392_v41 = vmul.f32 %v6391_v8, %v6139_v9  ;;  %v6393_v29 = vmul.f32 %v6391_v8, %v6141_v16  ;;  %v6394_v24 = vmul.f32 %v6391_v8, %v6210_v43  ;;  %v6395_v50 = vmul.f32 %v6391_v8, %v6212_v17 }
0x1aa4   :  { %v6396_v20 = vmul.f32 %v6391_v8, %v6281_v56  ;;  %v6397_v57 = vmul.f32 %v6391_v8, %v6283_v47  ;;  %v6398_v61 = vmul.f32 %v6391_v8, %v6352_v58  ;;  %v6399_v14 = vmul.f32 %v6391_v8, %v6354_v46 }
0x1aa5   :  { %v6408_v5 = vcombine.low %v6392_v41, %v6393_v29  ;;  %v6409_v12 = vcombine.low %v6394_v24, %v6395_v50 }
0x1aa6   :  { %v6425_v52 = vcombine.low %v6396_v20, %v6397_v57  ;;  %v6426_v6 = vcombine.low %v6398_v61, %v6399_v14 }
0x1aa7   :  { %v6416_v21 = vrot.slane %v6408_v5, %v12213_v19  ;;  %v6423_v27 = vrot.slane %v6409_v12, %v12213_v19 }
0x1aa8   :  { %v6433_v33 = vrot.slane %v6425_v52, %v12213_v19  ;;  %v6440_v11 = vrot.slane %v6426_v6, %v12213_v19 }
0x1aa9   :  { %v6424_v9 = vcombine.low %v6416_v21, %v6423_v27 }
0x1aaa   :  { %v6441_v16 = vcombine.low %v6433_v33, %v6440_v11 }
0x1aab   :  { %v6444_v17 = vadd.f32 %v6424_v9, %v13728_v48 }
0x1aac   :  { %v6445_v47 = vadd.f32 %v6441_v16, %v13731_v39 }
0x1aad   :  { %v6446_v46 = vsub.f32 %v6444_v17, %v13705_v32 }
0x1aae   :  { %v6447_v56 = vsub.f32 %v6445_v47, %v13711_v3 }
0x1aaf   :  { %v6448_v58 = vmul.f32 %v6446_v46, %v6446_v46 }
0x1ab0   :  { %v6449_v43 = vmul.f32 %v6447_v56, %v6447_v56 }
0x1ab1   :  { %v6452_v7 = vcombine.high %v6448_v58, %v6448_v58  ;;  %v6459_v5 = vrot.slane %v6448_v58, %v12213_v19 }
0x1ab2   :  { %v6469_v40 = vcombine.high %v6449_v43, %v6449_v43  ;;  %v6476_v8 = vrot.slane %v6449_v43, %v12213_v19 }
0x1ab3   :  { %v6466_v12 = vrot.slane %v6452_v7, %v12213_v19  ;;  %v6467_v31 = vcombine.high %v6459_v5, %v6459_v5  ;;  %v6494_v48 = vsel %vm820_vm1, %v6459_v5, 0.0 }
0x1ab4   :  { %v6483_v50 = vrot.slane %v6469_v40, %v12213_v19  ;;  %v6484_v20 = vcombine.high %v6476_v8, %v6476_v8  ;;  %v6501_v14 = vsel %vm820_vm1, %v6476_v8, 0.0 }
0x1ab5   :  { %v6468_v6 = vcombine.high %v6466_v12, %v6466_v12  ;;  %v6495_v39 = vsel %vm820_vm1, %v6467_v31, 0.0  ;;  %v6497_v29 = vsel %vm820_vm1, %v6466_v12, 0.0 }
0x1ab6   :  { %v6496_v41 = vadd.f32 %v6495_v39, %v6494_v48  ;;  %v6485_v21 = vcombine.high %v6483_v50, %v6483_v50  ;;  %v6503_v27 = vsel %vm820_vm1, %v6484_v20, 0.0  ;;  %v6505_v11 = vsel %vm820_vm1, %v6483_v50, 0.0 }
0x1ab7   :  { %v6499_v57 = vsel %vm820_vm1, %v6468_v6, 0.0 }
0x1ab8   :  { %v6498_v24 = vadd.f32 %v6497_v29, %v6496_v41  ;;  %v6507_v16 = vsel %vm820_vm1, %v6485_v21, 0.0 }
0x1aba   :  { %v6500_v61 = vadd.f32 %v6499_v57, %v6498_v24 }
0x1abc   :  { %v6502_v52 = vadd.f32 %v6501_v14, %v6500_v61 }
0x1abe   :  { %v6504_v33 = vadd.f32 %v6503_v27, %v6502_v52 }
0x1ac0   :  { %v6506_v9 = vadd.f32 %v6505_v11, %v6504_v33  ;;  %v14923_v33 = vld [vmem:[#allocation69_spill] sm:$0xff]  ;;  %v14924_v11 = vld [vmem:[#allocation71_spill] sm:$0xff] }
0x1ac2   :  { %v6508_v17 = vadd.f32 %v6507_v16, %v6506_v9  ;;  %v14925_v9 = vld [vmem:[#allocation72_spill] sm:$0xff]  ;;  %v14926_v16 = vmov 0.0  }
0x1ac4   :  { %6509 = vadd.xlane.f32.xlu1 %v6508_v17  ;;  %v14927_v17 = vld [vmem:[#allocation74_spill] sm:$0xff] }
0x1b51   :  { %v6510_v47 = vpop.xlane.xlu1 %6509 }
0x1b52   :  { %11901 = vrsqrt.f32 %v6510_v47  ;;  %vm6513_vm11 = vcmp.eq.f32.partialorder %v6510_v47, inf  ;;  %v6516_v7 = vand.u32 2147483648, %v6510_v47  ;;  %vm6515_vm12 = vcmp.eq.f32.partialorder %v6510_v47, 0.0 }
0x1b5c   :  { %v11902_v58 = vpop.eup %11901 }
0x1b5d   :  { %v6512_v43 = vmul.f32 %v11902_v58, %v6510_v47  ;;  %v14929_v58 = vld [vmem:[#allocation75_spill] sm:$0xff] }
0x1b5f   :  { %v6514_v5 = vsel %vm6513_vm11, %v6510_v47, %v6512_v43  ;;  %v14928_v47 = vld [vmem:[#allocation73_spill] sm:$0xff]  ;;  %v14930_v43 = vld [vmem:[#allocation76_spill] sm:$0xff] }
0x1b60   :  { %v6517_v12 = vsel %vm6515_vm12, %v6516_v7, %v6514_v5  ;;  %v14931_v7 = vld [vmem:[#allocation78_spill] sm:$0xff]  ;;  %v14932_v5 = vld [vmem:[#allocation77_spill] sm:$0xff] }
0x1b61   :  { %v6519_v31 = vadd.f32 1e-07, %v6517_v12  ;;  %vm6518_vm13 = vcmp.gt.f32.partialorder %v6517_v12, 0.1  ;;  %v14933_v12 = vld [vmem:[#allocation79_spill] sm:$0xff] }
0x1b63   :  { %11903 = vrcp.f32 %v6519_v31 }
0x1b6d   :  { %v11904_v40 = vpop.eup %11903 }
0x1b6e   :  { %v6521_v6 = vmul.f32 0.1, %v11904_v40 }
0x1b70   :  { %v6522_v8 = vsel %vm6518_vm13, %v6521_v6, 1.0 }
0x1b71   :  { %v6530_v48 = vrot.slane %v6522_v8, %v12864_v53 }
0x1b73   :  { %v6532_v39 = vmul.f32 %v6530_v48, %v6446_v46  ;;  %v6533_v41 = vmul.f32 %v6530_v48, %v6447_v56 }
0x1b75   :  { %v13863_v29 = vadd.f32 %v13705_v32, %v6532_v39  ;;  %v13866_v24 = vadd.f32 %v13711_v3, %v6533_v41  ;;  %v14934_v39 = vld [vmem:[#allocation46_spill] sm:$0xff] }
0x1b77   :  { %v6545_v50 = vrot.slane %v13863_v29, %v12213_v19  ;;  %v6538_v20 = vcombine.high %v13863_v29, %v13863_v29  ;;  %v6555_v57 = vcombine.high %v13866_v24, %v13866_v24  ;;  %v6562_v61 = vrot.slane %v13866_v24, %v12213_v19 }
0x1b79   :  { %v6553_v46 = vcombine.high %v6545_v50, %v6545_v50  ;;  %v6552_v56 = vrot.slane %v6538_v20, %v12213_v19  ;;  %v6569_v14 = vrot.slane %v6555_v57, %v12213_v19  ;;  %v6570_v21 = vcombine.high %v6562_v61, %v6562_v61 }
0x1b7b   :  { %6644 = vmatprep.mubr.f32.mxu0 %v6553_v46  ;;  %v6554_v52 = vcombine.high %v6552_v56, %v6552_v56  ;;  %v6571_v27 = vcombine.high %v6569_v14, %v6569_v14 }
0x1b7c   :  { %6645 = vmatmul.mubr.f32.vlgmr.msra.gmra.mrb[64].mxu0 %v6545_v50 }
0x1b7d   :  { %11454 = vmatpush3.bf16.msra.mxu0 %v12354_v30  ;;  %6714 = vmatprep.mubr.f32.mxu1 %v6554_v52 }
0x1b7e   :  { %6784 = vmatprep.mubr.f32.mxu0 %v6570_v21  ;;  %6715 = vmatmul.mubr.f32.vlgmr.msra.gmra.mrb[64].mxu1 %v6552_v56 }
0x1b7f   :  { %11486 = vmatpush3.bf16.msra.mxu1 %v12358_v35  ;;  %11456 = vmatprep.subr.bf16.mxu0 %v12360_v36 }
0x1b80   :  { %6854 = vmatprep.mubr.f32.mxu1 %v6571_v27  ;;  %11488 = vmatprep.subr.bf16.mxu1 %v12372_v44 }
0x1b81   :  { %11458 = vmatpush3.bf16.msra.mxu0 %v12392_v60 }
0x1b82   :  { %11460 = vmatprep.subr.bf16.mxu0 %v12398_v63 }
0x1b83   :  { %11490 = vmatpush3.bf16.msra.mxu1 %v12396_v62 }
0x1b84   :  { %11492 = vmatprep.subr.bf16.mxu1 %v14558_v28 }
0x1b85   :  { %11462 = vmatpush3.bf16.msra.mxu0 %v14559_v15 }
0x1b86   :  { %11464 = vmatprep.subr.bf16.mxu0 %v14560_v18 }
0x1b87   :  { %11494 = vmatpush3.bf16.msra.mxu1 %v14561_v13 }
0x1b88   :  { %11496 = vmatprep.subr.bf16.mxu1 %v14562_v59 }
0x1b89   :  { %11466 = vmatpush3.bf16.msra.mxu0 %v14563_v55 }
0x1b8a   :  { %11468 = vmatprep.subr.bf16.mxu0 %v14564_v45 }
0x1b8b   :  { %11498 = vmatpush3.bf16.msra.mxu1 %v14565_v23 }
0x1b8c   :  { %11500 = vmatprep.subr.bf16.mxu1 %v14566_v54 }
0x1b8d   :  { %11470 = vmatpush3.bf16.msra.mxu0 %v14567_v42 }
0x1b8e   :  { %11472 = vmatprep.subr.bf16.mxu0 %v14568_v10 }
0x1b8f   :  { %11502 = vmatpush3.bf16.msra.mxu1 %v14609_v1 }
0x1b90   :  { %11504 = vmatprep.subr.bf16.mxu1 %v14610_v51 }
0x1b91   :  { %11474 = vmatpush3.bf16.msra.mxu0 %v14611_v25 }
0x1b92   :  { %11476 = vmatprep.subr.bf16.mxu0 %v14612_v2 }
0x1b93   :  { %11506 = vmatpush3.bf16.msra.mxu1 %v14613_v49 }
0x1b94   :  { %11508 = vmatprep.subr.bf16.mxu1 %v14614_v37 }
0x1b95   :  { %11478 = vmatpush3.bf16.msra.mxu0 %v14615_v4 }
0x1b96   :  { %11480 = vmatprep.subr.bf16.mxu0 %v14616_v38 }
0x1b97   :  { %11510 = vmatpush3.bf16.msra.mxu1 %v14660_v26 }
0x1b98   :  { %11512 = vmatprep.subr.bf16.mxu1 %v14661_v22 }
0x1b99   :  { %11482 = vmatpush3.bf16.msra.mxu0 %v14662_v0 }
0x1b9a   :  { %11516 = vmatprep.subr.bf16.mxu0 %v14663_v34 }
0x1b9b   :  { %11514 = vmatpush3.bf16.msra.mxu1 %v14923_v33 }
0x1b9c   :  { %6785 = vmatmul.mubr.f32.vlgmr.msra.gmra.mrb[66].mxu0 %v6562_v61  ;;  %11524 = vmatprep.subr.bf16.mxu1 %v14924_v11 }
0x1b9d   :  { %11518 = vmatpush1.bf16.msra.mxu0 %v14925_v9  ;;  %6929 = vmatprep.mubr.f32.mxu0 %v14926_v16 }
0x1b9e   :  { %6855 = vmatmul.mubr.f32.vlgmr.msra.gmra.mrb[66].mxu1 %v6569_v14  ;;  %11520 = vmatprep.subr.bf16.mxu0 %v14927_v17 }
0x1b9f   :  { %11526 = vmatpush1.bf16.msra.mxu1 %v14928_v47  ;;  %7000 = vmatprep.mubr.f32.mxu1 %v14926_v16 }
0x1ba0   :  { %11528 = vmatprep.subr.bf16.mxu1 %v14929_v58 }
0x1ba1   :  { %11522 = vmatpush1.bf16.msra.mxu0 %v14930_v43 }
0x1ba2   :  { %11532 = vmatprep.subr.bf16.mxu0 %v14931_v7 }
0x1ba3   :  { %11530 = vmatpush1.bf16.msra.mxu1 %v14932_v5  ;;  %v14935_v5 = vld [vmem:[#allocation45_spill] sm:$0xff] }
0x1ba4   :  { %11540 = vmatprep.subr.bf16.mxu1 %v14933_v12 }
0x1c4f   :  { %v9719_v31 = vpop.f32.mrb[64].mxu0 }
0x1c50   :  { %v9720_v40 = vpop.f32.mrb[65].mxu0 }
0x1c51   :  { %v9721_v6 = vadd.f32 %v9720_v40, %v9719_v31  ;;  %v9754_v8 = vpop.f32.mrb[64].mxu1  ;;  %v14936_v31 = vld [vmem:[#allocation83_spill] sm:$0xff]  ;;  %v14937_v40 = vld [vmem:[#allocation84_spill] sm:$0xff] }
0x1c52   :  { %v9755_v48 = vpop.f32.mrb[65].mxu1 }
0x1c53   :  { %v6647_v41 = vadd.f32 %v14934_v39, %v9721_v6  ;;  %v9756_v50 = vadd.f32 %v9755_v48, %v9754_v8  ;;  %v14938_v6 = vld [vmem:[#allocation85_spill] sm:$0xff]  ;;  %v14939_v8 = vld [vmem:[#allocation86_spill] sm:$0xff]  ;;  %v14940_v48 = vld [vmem:[#allocation87_spill] sm:$0xff] }
0x1c54   :  { %v14943_v39 = vld [vmem:[#allocation7_spill] sm:$0xff] }
0x1c55   :  { %v6717_v20 = vadd.f32 %v9756_v50, %v6647_v41  ;;  %v14944_v41 = vld [vmem:[#allocation6_spill] sm:$0xff]  ;;  %v14945_v50 = vld [vmem:[#allocation8_spill] sm:$0xff] }
0x1c6f   :  { %v9789_v57 = vpop.f32.mrb[66].mxu0 }
0x1c70   :  { %v9790_v61 = vpop.f32.mrb[67].mxu0 }
0x1c71   :  { %v9791_v46 = vadd.f32 %v9790_v61, %v9789_v57  ;;  %v9824_v56 = vpop.f32.mrb[66].mxu1  ;;  %v14947_v57 = vld [vmem:[#allocation11_spill] sm:$0xff]  ;;  %v14948_v61 = vld [vmem:[#allocation10_spill] sm:$0xff] }
0x1c72   :  { %v9825_v14 = vpop.f32.mrb[67].mxu1 }
0x1c73   :  { %v6787_v52 = vadd.f32 %v9791_v46, %v6717_v20  ;;  %v9826_v21 = vadd.f32 %v9825_v14, %v9824_v56  ;;  %v14946_v20 = vld [vmem:[#allocation9_spill] sm:$0xff]  ;;  %v14949_v46 = vld [vmem:[#allocation12_spill] sm:$0xff]  ;;  %v14951_v14 = vld [vmem:[#allocation15_spill] sm:$0xff] }
0x1c74   :  { %v14950_v56 = vld [vmem:[#allocation13_spill] sm:$0xff] }
0x1c75   :  { %v6857_v27 = vadd.f32 %v9826_v21, %v6787_v52  ;;  %v14952_v52 = vld [vmem:[#allocation14_spill] sm:$0xff]  ;;  %v14953_v21 = vld [vmem:[#allocation16_spill] sm:$0xff] }
0x1c77   :  { %v6860_v7 = vsub.f32 %v6857_v27, %v14935_v5  ;;  %v14941_v5 = vld [vmem:[#allocation88_spill] sm:$0xff]  ;;  %v14955_v27 = vld [vmem:[#allocation18_spill] sm:$0xff] }
0x1c79   :  { %v6861_v12 = vmul.f32 0.03125, %v6860_v7  ;;  %v14942_v7 = vld [vmem:[#allocation5_spill] sm:$0xff] }
0x1c7b   :  { %8559 = vmatmul.mubr.msk.f32.vlgmr.msra.gmra.mrb[68].mxu0 %vm524_vm0, %v6861_v12  ;;  %8560 = vmatmul.mubr.msk.f32.vlgmr.msra.gmra.mrb[68].mxu1 %vm524_vm0, %v6861_v12 }
0x1c7c   :  { %11534 = vmatpush1.bf16.msra.mxu0 %v14936_v31  ;;  %11542 = vmatpush1.bf16.msra.mxu1 %v14937_v40 }
0x1c7d   :  { %11536 = vmatprep.subr.bf16.mxu0 %v14938_v6  ;;  %11544 = vmatprep.subr.bf16.mxu1 %v14939_v8 }
0x1c7e   :  { %7071 = vmatprep.mubr.f32.mxu0 %v14926_v16  ;;  %7142 = vmatprep.mubr.f32.mxu1 %v14926_v16 }
0x1c80   :  { %11538 = vmatpush1.bf16.msra.mxu0 %v14940_v48  ;;  %11546 = vmatpush1.bf16.msra.mxu1 %v14941_v5 }
0x1c81   :  { %11548 = vmatprep.subr.bf16.mxu0 %v14942_v7  ;;  %11580 = vmatprep.subr.bf16.mxu1 %v14943_v39 }
0x1c83   :  { %8561 = vmatmul.mubr.msk.f32.vlgmr.msra.gmra.mrb[70].mxu0 %vm524_vm0, %v6861_v12  ;;  %8562 = vmatmul.mubr.msk.f32.vlgmr.msra.gmra.mrb[70].mxu1 %vm524_vm0, %v6861_v12  ;;  %v14954_v12 = vld [vmem:[#allocation17_spill] sm:$0xff] }
0x1c84   :  { %11550 = vmatpush3.bf16.msra.mxu0 %v14944_v41  ;;  %11582 = vmatpush3.bf16.msra.mxu1 %v14945_v50  ;;  %v14956_v50 = vld [vmem:[#allocation19_spill] sm:$0xff] }
0x1c85   :  { %11552 = vmatprep.subr.bf16.mxu0 %v14946_v20  ;;  %11584 = vmatprep.subr.bf16.mxu1 %v14947_v57  ;;  %v14957_v20 = vld [vmem:[#allocation20_spill] sm:$0xff]  ;;  %v14958_v57 = vld [vmem:[#allocation21_spill] sm:$0xff] }
0x1c88   :  { %11554 = vmatpush3.bf16.msra.mxu0 %v14948_v61  ;;  %11586 = vmatpush3.bf16.msra.mxu1 %v14949_v46  ;;  %v14959_v61 = vld [vmem:[#allocation22_spill] sm:$0xff]  ;;  %v14960_v46 = vld [vmem:[#allocation23_spill] sm:$0xff] }
0x1c89   :  { %11556 = vmatprep.subr.bf16.mxu0 %v14950_v56  ;;  %11588 = vmatprep.subr.bf16.mxu1 %v14951_v14  ;;  %v14961_v56 = vld [vmem:[#allocation24_spill] sm:$0xff]  ;;  %v14962_v14 = vld [vmem:[#allocation25_spill] sm:$0xff] }
0x1c8c   :  { %11558 = vmatpush3.bf16.msra.mxu0 %v14952_v52  ;;  %11590 = vmatpush3.bf16.msra.mxu1 %v14953_v21  ;;  %v14963_v52 = vld [vmem:[#allocation26_spill] sm:$0xff]  ;;  %v14964_v21 = vld [vmem:[#allocation27_spill] sm:$0xff] }
0x1c8d   :  { %11560 = vmatprep.subr.bf16.mxu0 %v14954_v12  ;;  %11592 = vmatprep.subr.bf16.mxu1 %v14955_v27  ;;  %v14965_v12 = vld [vmem:[#allocation28_spill] sm:$0xff]  ;;  %v14966_v27 = vld [vmem:[#allocation29_spill] sm:$0xff] }
0x1c90   :  { %11562 = vmatpush3.bf16.msra.mxu0 %v14956_v50  ;;  %11594 = vmatpush3.bf16.msra.mxu1 %v14957_v20  ;;  %v14967_v50 = vld [vmem:[#allocation30_spill] sm:$0xff]  ;;  %v14968_v20 = vld [vmem:[#allocation32_spill] sm:$0xff] }
0x1c91   :  { %11564 = vmatprep.subr.bf16.mxu0 %v14958_v57  ;;  %11596 = vmatprep.subr.bf16.mxu1 %v14959_v61  ;;  %v14969_v57 = vld [vmem:[#allocation35_spill] sm:$0xff]  ;;  %v14970_v61 = vld [vmem:[#allocation36_spill] sm:$0xff] }
0x1c94   :  { %11566 = vmatpush3.bf16.msra.mxu0 %v14960_v46  ;;  %11598 = vmatpush3.bf16.msra.mxu1 %v14961_v56  ;;  %v14971_v46 = vld [vmem:[#allocation37_spill] sm:$0xff]  ;;  %v14972_v56 = vld [vmem:[#allocation39_spill] sm:$0xff] }
0x1c95   :  { %11568 = vmatprep.subr.bf16.mxu0 %v14962_v14  ;;  %11600 = vmatprep.subr.bf16.mxu1 %v14963_v52  ;;  %v14973_v14 = vld [vmem:[#allocation40_spill] sm:$0xff]  ;;  %v14974_v52 = vld [vmem:[#allocation41_spill] sm:$0xff] }
0x1c98   :  { %11570 = vmatpush3.bf16.msra.mxu0 %v14964_v21  ;;  %11602 = vmatpush3.bf16.msra.mxu1 %v14965_v12  ;;  %v14975_v21 = vld [vmem:[#allocation42_spill] sm:$0xff] }
0x1c99   :  { %11572 = vmatprep.subr.bf16.mxu0 %v14966_v27  ;;  %11604 = vmatprep.subr.bf16.mxu1 %v14967_v50 }
0x1c9c   :  { %11574 = vmatpush3.bf16.msra.mxu0 %v14968_v20  ;;  %11606 = vmatpush3.bf16.msra.mxu1 %v14969_v57 }
0x1c9d   :  { %11576 = vmatprep.subr.bf16.mxu0 %v14970_v61  ;;  %11608 = vmatprep.subr.bf16.mxu1 %v14971_v46 }
0x1ca0   :  { %11578 = vmatpush3.bf16.msra.mxu0 %v14972_v56  ;;  %11610 = vmatpush3.bf16.msra.mxu1 %v14973_v14 }
0x1ca1   :  { %11612 = vmatprep.subr.bf16.mxu0 %v14974_v52  ;;  %11644 = vmatprep.subr.bf16.mxu1 %v14975_v21 }
0x1d4e   :  { %v6931_v12 = vpop.f32.mrb[68].mxu0  ;;  %v7002_v27 = vpop.f32.mrb[68].mxu1 }
0x1d4f   :  { %v7149_v41 = vmul.f32 %v6931_v12, %v6931_v12  ;;  %v6933_v50 = vpop.f32.mrb[69].mxu0  ;;  %v7004_v39 = vpop.f32.mrb[69].mxu1  ;;  %v7151_v20 = vmul.f32 %v7002_v27, %v7002_v27 }
0x1d50   :  { %v7150_v7 = vmul.f32 %v6933_v50, %v6933_v50  ;;  %v7152_v46 = vmul.f32 %v7004_v39, %v7004_v39 }
0x1d51   :  { %v7157_v57 = vsel %vm820_vm1, %v7149_v41, 0.0  ;;  %v7160_v56 = vsel %vm820_vm1, %v7151_v20, 0.0 }
0x1d52   :  { %v7158_v61 = vsel %vm820_vm1, %v7150_v7, 0.0  ;;  %v7162_v52 = vsel %vm820_vm1, %v7152_v46, 0.0 }
0x1d53   :  { %v7159_v5 = vadd.f32 %v7158_v61, %v7157_v57 }
0x1d55   :  { %v7161_v14 = vadd.f32 %v7160_v56, %v7159_v5 }
0x1d56   :  { %v7073_v48 = vpop.f32.mrb[70].mxu0  ;;  %v7144_v21 = vpop.f32.mrb[70].mxu1 }
0x1d57   :  { %v7163_v8 = vadd.f32 %v7162_v52, %v7161_v14  ;;  %v7153_v6 = vmul.f32 %v7073_v48, %v7073_v48  ;;  %v7075_v40 = vpop.f32.mrb[71].mxu0  ;;  %v7146_v31 = vpop.f32.mrb[71].mxu1  ;;  %v7155_v47 = vmul.f32 %v7144_v21, %v7144_v21 }
0x1d58   :  { %v7154_v43 = vmul.f32 %v7075_v40, %v7075_v40  ;;  %v7156_v17 = vmul.f32 %v7146_v31, %v7146_v31 }
0x1d59   :  { %v7164_v58 = vsel %vm820_vm1, %v7153_v6, 0.0  ;;  %v7168_v20 = vsel %vm820_vm1, %v7155_v47, 0.0 }
0x1d5a   :  { %v7165_v41 = vadd.f32 %v7164_v58, %v7163_v8  ;;  %v7166_v7 = vsel %vm820_vm1, %v7154_v43, 0.0  ;;  %v7170_v61 = vsel %vm820_vm1, %v7156_v17, 0.0 }
0x1d5c   :  { %v7167_v57 = vadd.f32 %v7166_v7, %v7165_v41 }
0x1d5e   :  { %v7169_v5 = vadd.f32 %v7168_v20, %v7167_v57 }
0x1d60   :  { %v7171_v46 = vadd.f32 %v7170_v61, %v7169_v5 }
0x1d62   :  { %7172 = vadd.xlane.f32.xlu0 %v7171_v46 }
0x1def   :  { %v7173_v56 = vpop.xlane.xlu0 %7172 }
0x1df0   :  { %11905 = vrsqrt.f32 %v7173_v56  ;;  %vm7176_vm14 = vcmp.eq.f32.partialorder %v7173_v56, inf  ;;  %v7179_v16 = vand.u32 2147483648, %v7173_v56  ;;  %vm7178_vm15 = vcmp.eq.f32.partialorder %v7173_v56, 0.0 }
0x1dfa   :  { %v11906_v14 = vpop.eup %11905 }
0x1dfb   :  { %v7175_v52 = vmul.f32 %v11906_v14, %v7173_v56 }
0x1dfd   :  { %v7177_v6 = vsel %vm7176_vm14, %v7173_v56, %v7175_v52 }
0x1dfe   :  { %v7180_v58 = vsel %vm7178_vm15, %v7179_v16, %v7177_v6 }
0x1dff   :  { %v7181_v8 = vadd.f32 1e-10, %v7180_v58 }
0x1e01   :  { %11907 = vrcp.f32 %v7181_v8 }
0x1e0b   :  { %v11908_v43 = vpop.eup %11907 }
0x1e0c   :  { %v7183_v41 = vmul.f32 0.1, %v11908_v43 }
0x1e0e   :  { %v7184_v7 = vmul.f32 %v7183_v41, %v6931_v12  ;;  %v7185_v47 = vmul.f32 %v7183_v41, %v6933_v50  ;;  %v7186_v57 = vmul.f32 %v7183_v41, %v7002_v27  ;;  %v7187_v20 = vmul.f32 %v7183_v41, %v7004_v39 }
0x1e0f   :  { %v7188_v17 = vmul.f32 %v7183_v41, %v7073_v48  ;;  %v7189_v5 = vmul.f32 %v7183_v41, %v7075_v40  ;;  %v7190_v61 = vmul.f32 %v7183_v41, %v7144_v21  ;;  %v7191_v46 = vmul.f32 %v7183_v41, %v7146_v31 }
0x1e10   :  { %v7200_v9 = vcombine.low %v7184_v7, %v7185_v47  ;;  %v7201_v11 = vcombine.low %v7186_v57, %v7187_v20 }
0x1e11   :  { %v7217_v14 = vcombine.low %v7188_v17, %v7189_v5  ;;  %v7218_v33 = vcombine.low %v7190_v61, %v7191_v46 }
0x1e12   :  { %v7208_v52 = vrot.slane %v7200_v9, %v12213_v19  ;;  %v7215_v16 = vrot.slane %v7201_v11, %v12213_v19 }
0x1e13   :  { %v7225_v56 = vrot.slane %v7217_v14, %v12213_v19  ;;  %v7232_v6 = vrot.slane %v7218_v33, %v12213_v19 }
0x1e14   :  { %v7216_v12 = vcombine.low %v7208_v52, %v7215_v16 }
0x1e15   :  { %v7233_v50 = vcombine.low %v7225_v56, %v7232_v6 }
0x1e16   :  { %v7236_v39 = vadd.f32 %v7216_v12, %v13863_v29 }
0x1e17   :  { %v7237_v40 = vadd.f32 %v7233_v50, %v13866_v24 }
0x1e18   :  { %v7238_v31 = vsub.f32 %v7236_v39, %v13705_v32 }
0x1e19   :  { %v7239_v48 = vsub.f32 %v7237_v40, %v13711_v3 }
0x1e1a   :  { %v7240_v21 = vmul.f32 %v7238_v31, %v7238_v31 }
0x1e1b   :  { %v7241_v27 = vmul.f32 %v7239_v48, %v7239_v48 }
0x1e1c   :  { %v7244_v58 = vcombine.high %v7240_v21, %v7240_v21  ;;  %v7251_v9 = vrot.slane %v7240_v21, %v12213_v19 }
0x1e1d   :  { %v7261_v43 = vcombine.high %v7241_v27, %v7241_v27  ;;  %v7268_v41 = vrot.slane %v7241_v27, %v12213_v19 }
0x1e1e   :  { %v7258_v11 = vrot.slane %v7244_v58, %v12213_v19  ;;  %v7259_v8 = vcombine.high %v7251_v9, %v7251_v9  ;;  %v7286_v29 = vsel %vm820_vm1, %v7251_v9, 0.0 }
0x1e1f   :  { %v7275_v47 = vrot.slane %v7261_v43, %v12213_v19  ;;  %v7276_v57 = vcombine.high %v7268_v41, %v7268_v41  ;;  %v7293_v5 = vsel %vm820_vm1, %v7268_v41, 0.0 }
0x1e20   :  { %v7260_v33 = vcombine.high %v7258_v11, %v7258_v11  ;;  %v7287_v24 = vsel %vm820_vm1, %v7259_v8, 0.0  ;;  %v7289_v32 = vsel %vm820_vm1, %v7258_v11, 0.0 }
0x1e21   :  { %v7288_v7 = vadd.f32 %v7287_v24, %v7286_v29  ;;  %v7277_v46 = vcombine.high %v7275_v47, %v7275_v47  ;;  %v7295_v14 = vsel %vm820_vm1, %v7276_v57, 0.0  ;;  %v7297_v16 = vsel %vm820_vm1, %v7275_v47, 0.0  ;;  %v14000_v24 = vld [vmem:[%s14288_s0] sm:$0xff] }
0x1e22   :  { %v7291_v20 = vsel %vm820_vm1, %v7260_v33, 0.0 }
0x1e23   :  { %v7290_v3 = vadd.f32 %v7289_v32, %v7288_v7  ;;  %v7299_v6 = vsel %vm820_vm1, %v7277_v46, 0.0  ;;  %v14008_v32 = vld [vmem:[%s14288_s0 + $0x8] sm:$0xff] }
0x1e25   :  { %v7292_v17 = vadd.f32 %v7291_v20, %v7290_v3 }
0x1e27   :  { %v7294_v61 = vadd.f32 %v7293_v5, %v7292_v17 }
0x1e29   :  { %v7296_v52 = vadd.f32 %v7295_v14, %v7294_v61 }
0x1e2b   :  { %v7298_v56 = vadd.f32 %v7297_v16, %v7296_v52  ;;  %v14976_v52 = vld [vmem:[#allocation69_spill] sm:$0xff]  ;;  %v14977_v16 = vld [vmem:[#allocation71_spill] sm:$0xff] }
0x1e2d   :  { %v7300_v12 = vadd.f32 %v7299_v6, %v7298_v56  ;;  %v14978_v56 = vld [vmem:[#allocation72_spill] sm:$0xff]  ;;  %v14979_v6 = vmov 0.0  }
0x1e2f   :  { %7301 = vadd.xlane.f32.xlu1 %v7300_v12  ;;  %v14980_v12 = vld [vmem:[#allocation74_spill] sm:$0xff] }
0x1ebc   :  { %v7302_v50 = vpop.xlane.xlu1 %7301 }
0x1ebd   :  { %11909 = vrsqrt.f32 %v7302_v50  ;;  %vm7305_vm2 = vcmp.eq.f32.partialorder %v7302_v50, inf  ;;  %v7308_v21 = vand.u32 2147483648, %v7302_v50  ;;  %vm7307_vm3 = vcmp.eq.f32.partialorder %v7302_v50, 0.0 }
0x1ec7   :  { %v11910_v39 = vpop.eup %11909 }
0x1ec8   :  { %v7304_v40 = vmul.f32 %v11910_v39, %v7302_v50  ;;  %v14982_v39 = vld [vmem:[#allocation75_spill] sm:$0xff] }
0x1eca   :  { %v7306_v27 = vsel %vm7305_vm2, %v7302_v50, %v7304_v40  ;;  %v14981_v50 = vld [vmem:[#allocation73_spill] sm:$0xff]  ;;  %v14983_v40 = vld [vmem:[#allocation76_spill] sm:$0xff] }
0x1ecb   :  { %v7309_v58 = vsel %vm7307_vm3, %v7308_v21, %v7306_v27  ;;  %v14985_v21 = vld [vmem:[#allocation77_spill] sm:$0xff]  ;;  %v14986_v27 = vld [vmem:[#allocation79_spill] sm:$0xff] }
0x1ecc   :  { %v7311_v9 = vadd.f32 1e-07, %v7309_v58  ;;  %vm7310_vm4 = vcmp.gt.f32.partialorder %v7309_v58, 0.1 }
0x1ece   :  { %11911 = vrcp.f32 %v7311_v9 }
0x1ed8   :  { %v11912_v11 = vpop.eup %11911 }
0x1ed9   :  { %v7313_v8 = vmul.f32 0.1, %v11912_v11 }
0x1edb   :  { %v7314_v43 = vsel %vm7310_vm4, %v7313_v8, 1.0 }
0x1edc   :  { %v7322_v33 = vrot.slane %v7314_v43, %v12864_v53 }
0x1ede   :  { %v7324_v41 = vmul.f32 %v7322_v33, %v7238_v31  ;;  %v7325_v29 = vmul.f32 %v7322_v33, %v7239_v48  ;;  %v14068_v33 = vld [vmem:[%s14292_s4] ss:$0 sm:$0xff] }
0x1edf   :  { %14987 = vst [vmem:[#allocation47_spill] sm:$0xff] %v14068_v33 }
0x1ee0   :  { %v14003_v7 = vadd.f32 %v14000_v24, %v7324_v41  ;;  %v14011_v3 = vadd.f32 %v14008_v32, %v7325_v29 }
0x1ee2   :  { %v7337_v31 = vrot.slane %v14003_v7, %v12213_v19  ;;  %v7330_v48 = vcombine.high %v14003_v7, %v14003_v7  ;;  %v7347_v47 = vcombine.high %v14011_v3, %v14011_v3  ;;  %v7354_v57 = vrot.slane %v14011_v3, %v12213_v19 }
0x1ee4   :  { %v7345_v20 = vcombine.high %v7337_v31, %v7337_v31  ;;  %v7344_v17 = vrot.slane %v7330_v48, %v12213_v19  ;;  %v7361_v5 = vrot.slane %v7347_v47, %v12213_v19  ;;  %v7362_v46 = vcombine.high %v7354_v57, %v7354_v57 }
0x1ee6   :  { %7436 = vmatprep.mubr.f32.mxu0 %v7345_v20  ;;  %v7346_v61 = vcombine.high %v7344_v17, %v7344_v17  ;;  %v7363_v14 = vcombine.high %v7361_v5, %v7361_v5 }
0x1ee7   :  { %7437 = vmatmul.mubr.f32.vlgmr.msra.gmra.mrb[72].mxu0 %v7337_v31 }
0x1ee8   :  { %11614 = vmatpush3.bf16.msra.mxu0 %v12354_v30  ;;  %7506 = vmatprep.mubr.f32.mxu1 %v7346_v61 }
0x1ee9   :  { %7576 = vmatprep.mubr.f32.mxu0 %v7362_v46  ;;  %7507 = vmatmul.mubr.f32.vlgmr.msra.gmra.mrb[72].mxu1 %v7344_v17 }
0x1eea   :  { %11646 = vmatpush3.bf16.msra.mxu1 %v12358_v35  ;;  %11616 = vmatprep.subr.bf16.mxu0 %v12360_v36 }
0x1eeb   :  { %7646 = vmatprep.mubr.f32.mxu1 %v7363_v14  ;;  %11648 = vmatprep.subr.bf16.mxu1 %v12372_v44  ;;  %v14074_v14 = vld [vmem:[%s14289_s1] sm:$0x3]  ;;  %s11962_s1 = smov [#allocation2]  }
0x1eec   :  { %11618 = vmatpush3.bf16.msra.mxu0 %v12392_v60  ;;  %14988 = vst [vmem:[#allocation48_spill] sm:$0xff] %v14074_v14  ;;  %s8516_s4 = sshll.u32 %s11962_s1, 4  ;;  %s8517_s4 = int_to_ptr.vmem [resolvable:$true] %s8516_s4 }
0x1eed   :  { %11620 = vmatprep.subr.bf16.mxu0 %v12398_v63  ;;  %s11935_s10 = scalar_lea.vmem %s8517_s4, 32  ;;  %p11940_p1 = scmp.lt.s32.totalorder %s8517_s4, %s8517_s4 }
0x1eee   :  { %11650 = vmatpush3.bf16.msra.mxu1 %v12396_v62  ;;  %p11936_p0 = scmp.ne.s32.totalorder %s8517_s4, %s11935_s10  ;;  %p11941_p2 = scmp.lt.s32.totalorder %s11935_s10, %s11935_s10 }
0x1eef   :  { %11652 = vmatprep.subr.bf16.mxu1 %v14558_v28 }
0x1ef0   :  { %11622 = vmatpush3.bf16.msra.mxu0 %v14559_v15  ;;  %p11942_p3 = por %p11941_p2, %p11940_p1 }
0x1ef1   :  { %11624 = vmatprep.subr.bf16.mxu0 %v14560_v18 }
0x1ef2   :  { %11654 = vmatpush3.bf16.msra.mxu1 %v14561_v13  ;;  %p11943_p4 = pnand %p11942_p3, %p11936_p0 }
0x1ef3   :  { %11656 = vmatprep.subr.bf16.mxu1 %v14562_v59 }
0x1ef4   :  { %11626 = vmatpush3.bf16.msra.mxu0 %v14563_v55 }
0x1ef5   :  { %11628 = vmatprep.subr.bf16.mxu0 %v14564_v45 }
0x1ef6   :  { %11658 = vmatpush3.bf16.msra.mxu1 %v14565_v23 }
0x1ef7   :  { %11660 = vmatprep.subr.bf16.mxu1 %v14566_v54 }
0x1ef8   :  { %11630 = vmatpush3.bf16.msra.mxu0 %v14567_v42 }
0x1ef9   :  { %11632 = vmatprep.subr.bf16.mxu0 %v14568_v10 }
0x1efa   :  { %11662 = vmatpush3.bf16.msra.mxu1 %v14609_v1 }
0x1efb   :  { %11664 = vmatprep.subr.bf16.mxu1 %v14610_v51 }
0x1efc   :  { %11634 = vmatpush3.bf16.msra.mxu0 %v14611_v25 }
0x1efd   :  { %11636 = vmatprep.subr.bf16.mxu0 %v14612_v2 }
0x1efe   :  { %11666 = vmatpush3.bf16.msra.mxu1 %v14613_v49 }
0x1eff   :  { %11668 = vmatprep.subr.bf16.mxu1 %v14614_v37 }
0x1f00   :  { %11638 = vmatpush3.bf16.msra.mxu0 %v14615_v4 }
0x1f01   :  { %11640 = vmatprep.subr.bf16.mxu0 %v14616_v38 }
0x1f02   :  { %11670 = vmatpush3.bf16.msra.mxu1 %v14660_v26 }
0x1f03   :  { %11672 = vmatprep.subr.bf16.mxu1 %v14661_v22 }
0x1f04   :  { %11642 = vmatpush3.bf16.msra.mxu0 %v14662_v0 }
0x1f05   :  { %11676 = vmatprep.subr.bf16.mxu0 %v14663_v34  ;;  %v14984_v34 = vld [vmem:[#allocation78_spill] sm:$0xff] }
0x1f06   :  { %11674 = vmatpush3.bf16.msra.mxu1 %v14976_v52 }
0x1f07   :  { %7577 = vmatmul.mubr.f32.vlgmr.msra.gmra.mrb[74].mxu0 %v7354_v57  ;;  %11684 = vmatprep.subr.bf16.mxu1 %v14977_v16 }
0x1f08   :  { %11678 = vmatpush1.bf16.msra.mxu0 %v14978_v56  ;;  %7721 = vmatprep.mubr.f32.mxu0 %v14979_v6 }
0x1f09   :  { %7647 = vmatmul.mubr.f32.vlgmr.msra.gmra.mrb[74].mxu1 %v7361_v5  ;;  %11680 = vmatprep.subr.bf16.mxu0 %v14980_v12  ;;  %v14989_v12 = vld [vmem:[#allocation83_spill] sm:$0xff] }
0x1f0a   :  { %11686 = vmatpush1.bf16.msra.mxu1 %v14981_v50  ;;  %7792 = vmatprep.mubr.f32.mxu1 %v14979_v6  ;;  %v14990_v50 = vld [vmem:[#allocation84_spill] sm:$0xff] }
0x1f0b   :  { %11688 = vmatprep.subr.bf16.mxu1 %v14982_v39  ;;  %v14991_v39 = vld [vmem:[#allocation85_spill] sm:$0xff] }
0x1f0c   :  { %11682 = vmatpush1.bf16.msra.mxu0 %v14983_v40  ;;  %v14992_v40 = vld [vmem:[#allocation86_spill] sm:$0xff] }
0x1f0d   :  { %11692 = vmatprep.subr.bf16.mxu0 %v14984_v34  ;;  %v14993_v34 = vld [vmem:[#allocation87_spill] sm:$0xff] }
0x1f0e   :  { %11690 = vmatpush1.bf16.msra.mxu1 %v14985_v21  ;;  %v14994_v21 = vld [vmem:[#allocation88_spill] sm:$0xff] }
0x1f0f   :  { %11700 = vmatprep.subr.bf16.mxu1 %v14986_v27  ;;  %v14995_v27 = vld [vmem:[#allocation5_spill] sm:$0xff] }
0x1fba   :  { %v9859_v58 = vpop.f32.mrb[72].mxu0 }
0x1fbb   :  { %v9860_v9 = vpop.f32.mrb[73].mxu0 }
0x1fbc   :  { %v9861_v11 = vadd.f32 %v9860_v9, %v9859_v58  ;;  %v9894_v8 = vpop.f32.mrb[72].mxu1  ;;  %v14996_v58 = vld [vmem:[#allocation7_spill] sm:$0xff]  ;;  %v14997_v9 = vld [vmem:[#allocation6_spill] sm:$0xff] }
0x1fbd   :  { %v9895_v43 = vpop.f32.mrb[73].mxu1 }
0x1fbe   :  { %v7439_v41 = vadd.f32 %v14068_v33, %v9861_v11  ;;  %v9896_v29 = vadd.f32 %v9895_v43, %v9894_v8  ;;  %v14998_v11 = vld [vmem:[#allocation8_spill] sm:$0xff]  ;;  %v14999_v8 = vld [vmem:[#allocation9_spill] sm:$0xff]  ;;  %v15000_v43 = vld [vmem:[#allocation11_spill] sm:$0xff] }
0x1fc0   :  { %v7509_v31 = vadd.f32 %v9896_v29, %v7439_v41  ;;  %v15002_v41 = vld [vmem:[#allocation12_spill] sm:$0xff]  ;;  %v15003_v29 = vld [vmem:[#allocation13_spill] sm:$0xff] }
0x1fda   :  { %v9929_v48 = vpop.f32.mrb[74].mxu0 }
0x1fdb   :  { %v9930_v47 = vpop.f32.mrb[75].mxu0 }
0x1fdc   :  { %v9931_v57 = vadd.f32 %v9930_v47, %v9929_v48  ;;  %v9964_v20 = vpop.f32.mrb[74].mxu1  ;;  %v15005_v48 = vld [vmem:[#allocation14_spill] sm:$0xff]  ;;  %v15006_v47 = vld [vmem:[#allocation16_spill] sm:$0xff] }
0x1fdd   :  { %v9965_v17 = vpop.f32.mrb[75].mxu1 }
0x1fde   :  { %v7579_v5 = vadd.f32 %v9931_v57, %v7509_v31  ;;  %v9966_v61 = vadd.f32 %v9965_v17, %v9964_v20  ;;  %v15004_v31 = vld [vmem:[#allocation15_spill] sm:$0xff]  ;;  %v15007_v57 = vld [vmem:[#allocation17_spill] sm:$0xff]  ;;  %v15008_v20 = vld [vmem:[#allocation18_spill] sm:$0xff] }
0x1fdf   :  { %v15009_v17 = vld [vmem:[#allocation19_spill] sm:$0xff] }
0x1fe0   :  { %v7649_v46 = vadd.f32 %v9966_v61, %v7579_v5  ;;  %v15010_v5 = vld [vmem:[#allocation20_spill] sm:$0xff]  ;;  %v15011_v61 = vld [vmem:[#allocation21_spill] sm:$0xff] }
0x1fe2   :  { %v7652_v16 = vsub.f32 %v7649_v46, %v14074_v14  ;;  %v15012_v46 = vld [vmem:[#allocation22_spill] sm:$0xff] }
0x1fe4   :  { %v7653_v56 = vmul.f32 0.03125, %v7652_v16  ;;  %v15013_v16 = vld [vmem:[#allocation23_spill] sm:$0xff] }
0x1fe6   :  { %8563 = vmatmul.mubr.msk.f32.vlgmr.msra.gmra.mrb[76].mxu0 %vm524_vm0, %v7653_v56  ;;  %8564 = vmatmul.mubr.msk.f32.vlgmr.msra.gmra.mrb[76].mxu1 %vm524_vm0, %v7653_v56 }
0x1fe7   :  { %11694 = vmatpush1.bf16.msra.mxu0 %v14989_v12  ;;  %11702 = vmatpush1.bf16.msra.mxu1 %v14990_v50  ;;  %v15015_v12 = vld [vmem:[#allocation25_spill] sm:$0xff]  ;;  %v15016_v50 = vld [vmem:[#allocation26_spill] sm:$0xff] }
0x1fe8   :  { %11696 = vmatprep.subr.bf16.mxu0 %v14991_v39  ;;  %11704 = vmatprep.subr.bf16.mxu1 %v14992_v40  ;;  %v15017_v39 = vld [vmem:[#allocation27_spill] sm:$0xff]  ;;  %v15018_v40 = vld [vmem:[#allocation28_spill] sm:$0xff] }
0x1fe9   :  { %7863 = vmatprep.mubr.f32.mxu0 %v14979_v6  ;;  %7934 = vmatprep.mubr.f32.mxu1 %v14979_v6  ;;  %v15001_v6 = vld [vmem:[#allocation10_spill] sm:$0xff] }
0x1feb   :  { %11698 = vmatpush1.bf16.msra.mxu0 %v14993_v34  ;;  %11706 = vmatpush1.bf16.msra.mxu1 %v14994_v21  ;;  %v15019_v34 = vld [vmem:[#allocation29_spill] sm:$0xff]  ;;  %v15020_v21 = vld [vmem:[#allocation30_spill] sm:$0xff] }
0x1fec   :  { %11708 = vmatprep.subr.bf16.mxu0 %v14995_v27  ;;  %11740 = vmatprep.subr.bf16.mxu1 %v14996_v58  ;;  %v15021_v27 = vld [vmem:[#allocation32_spill] sm:$0xff]  ;;  %v15022_v58 = vld [vmem:[#allocation35_spill] sm:$0xff] }
0x1fee   :  { %8565 = vmatmul.mubr.msk.f32.vlgmr.msra.gmra.mrb[78].mxu0 %vm524_vm0, %v7653_v56  ;;  %8566 = vmatmul.mubr.msk.f32.vlgmr.msra.gmra.mrb[78].mxu1 %vm524_vm0, %v7653_v56  ;;  %v15014_v56 = vld [vmem:[#allocation24_spill] sm:$0xff]  ;;  %vm519_vm0 = vcmask 254976  }
0x1fef   :  { %11710 = vmatpush3.bf16.msra.mxu0 %v14997_v9  ;;  %11742 = vmatpush3.bf16.msra.mxu1 %v14998_v11  ;;  %v15023_v9 = vld [vmem:[#allocation36_spill] sm:$0xff]  ;;  %v15024_v11 = vld [vmem:[#allocation37_spill] sm:$0xff] }
0x1ff0   :  { %11712 = vmatprep.subr.bf16.mxu0 %v14999_v8  ;;  %11744 = vmatprep.subr.bf16.mxu1 %v15000_v43  ;;  %v15025_v8 = vld [vmem:[#allocation39_spill] sm:$0xff]  ;;  %v15026_v43 = vld [vmem:[#allocation40_spill] sm:$0xff] }
0x1ff3   :  { %11714 = vmatpush3.bf16.msra.mxu0 %v15001_v6  ;;  %11746 = vmatpush3.bf16.msra.mxu1 %v15002_v41  ;;  %v15027_v6 = vld [vmem:[#allocation41_spill] sm:$0xff]  ;;  %v15028_v41 = vld [vmem:[#allocation42_spill] sm:$0xff] }
0x1ff4   :  { %11716 = vmatprep.subr.bf16.mxu0 %v15003_v29  ;;  %11748 = vmatprep.subr.bf16.mxu1 %v15004_v31 }
0x1ff7   :  { %11718 = vmatpush3.bf16.msra.mxu0 %v15005_v48  ;;  %11750 = vmatpush3.bf16.msra.mxu1 %v15006_v47 }
0x1ff8   :  { %11720 = vmatprep.subr.bf16.mxu0 %v15007_v57  ;;  %11752 = vmatprep.subr.bf16.mxu1 %v15008_v20 }
0x1ffb   :  { %11722 = vmatpush3.bf16.msra.mxu0 %v15009_v17  ;;  %11754 = vmatpush3.bf16.msra.mxu1 %v15010_v5 }
0x1ffc   :  { %11724 = vmatprep.subr.bf16.mxu0 %v15011_v61  ;;  %11756 = vmatprep.subr.bf16.mxu1 %v15012_v46 }
0x1fff   :  { %11726 = vmatpush3.bf16.msra.mxu0 %v15013_v16  ;;  %11758 = vmatpush3.bf16.msra.mxu1 %v15014_v56 }
0x2000   :  { %11728 = vmatprep.subr.bf16.mxu0 %v15015_v12  ;;  %11760 = vmatprep.subr.bf16.mxu1 %v15016_v50 }
0x2003   :  { %11730 = vmatpush3.bf16.msra.mxu0 %v15017_v39  ;;  %11762 = vmatpush3.bf16.msra.mxu1 %v15018_v40 }
0x2004   :  { %11732 = vmatprep.subr.bf16.mxu0 %v15019_v34  ;;  %11764 = vmatprep.subr.bf16.mxu1 %v15020_v21 }
0x2007   :  { %11734 = vmatpush3.bf16.msra.mxu0 %v15021_v27  ;;  %11766 = vmatpush3.bf16.msra.mxu1 %v15022_v58 }
0x2008   :  { %11736 = vmatprep.subr.bf16.mxu0 %v15023_v9  ;;  %11768 = vmatprep.subr.bf16.mxu1 %v15024_v11 }
0x200b   :  { %11738 = vmatpush3.bf16.msra.mxu0 %v15025_v8  ;;  %11770 = vmatpush3.bf16.msra.mxu1 %v15026_v43 }
0x200c   :  { %11772 = vmatprep.subr.bf16.mxu0 %v15027_v6  ;;  %11804 = vmatprep.subr.bf16.mxu1 %v15028_v41 }
0x20b9   :  { %v7723_v29 = vpop.f32.mrb[76].mxu0  ;;  %v7794_v31 = vpop.f32.mrb[76].mxu1 }
0x20ba   :  { %v7941_v48 = vmul.f32 %v7723_v29, %v7723_v29  ;;  %v7725_v47 = vpop.f32.mrb[77].mxu0  ;;  %v7796_v57 = vpop.f32.mrb[77].mxu1  ;;  %v7943_v20 = vmul.f32 %v7794_v31, %v7794_v31 }
0x20bb   :  { %v7942_v17 = vmul.f32 %v7725_v47, %v7725_v47  ;;  %v7944_v46 = vmul.f32 %v7796_v57, %v7796_v57 }
0x20bc   :  { %v7949_v5 = vsel %vm820_vm1, %v7941_v48, 0.0  ;;  %v7952_v56 = vsel %vm820_vm1, %v7943_v20, 0.0 }
0x20bd   :  { %v7950_v61 = vsel %vm820_vm1, %v7942_v17, 0.0  ;;  %v7954_v50 = vsel %vm820_vm1, %v7944_v46, 0.0  ;;  %v15029_v46 = vld [vmem:[#allocation82_spill] sm:$0xff] }
0x20be   :  { %v7951_v16 = vadd.f32 %v7950_v61, %v7949_v5 }
0x20c0   :  { %v7953_v12 = vadd.f32 %v7952_v56, %v7951_v16  ;;  %v518_v16 = vmul.f32 %v15029_v46, %v15029_v46 }
0x20c1   :  { %v7865_v39 = vpop.f32.mrb[78].mxu0  ;;  %v7936_v40 = vpop.f32.mrb[78].mxu1 }
0x20c2   :  { %v7955_v34 = vadd.f32 %v7954_v50, %v7953_v12  ;;  %v7945_v21 = vmul.f32 %v7865_v39, %v7865_v39  ;;  %v7867_v27 = vpop.f32.mrb[79].mxu0  ;;  %v7938_v58 = vpop.f32.mrb[79].mxu1  ;;  %v7947_v8 = vmul.f32 %v7936_v40, %v7936_v40  ;;  %v520_v56 = vsel %vm519_vm0, %v518_v16, 0.0 }
0x20c3   :  { %v7946_v9 = vmul.f32 %v7867_v27, %v7867_v27  ;;  %v7948_v41 = vmul.f32 %v7938_v58, %v7938_v58 }
0x20c4   :  { %v7956_v11 = vsel %vm820_vm1, %v7945_v21, 0.0  ;;  %v7960_v20 = vsel %vm820_vm1, %v7947_v8, 0.0 }
0x20c5   :  { %v7957_v43 = vadd.f32 %v7956_v11, %v7955_v34  ;;  %v7958_v6 = vsel %vm820_vm1, %v7946_v9, 0.0  ;;  %v7962_v5 = vsel %vm820_vm1, %v7948_v41, 0.0 }
0x20c7   :  { %v7959_v48 = vadd.f32 %v7958_v6, %v7957_v43 }
0x20c9   :  { %v7961_v17 = vadd.f32 %v7960_v20, %v7959_v48 }
0x20cb   :  { %v7963_v61 = vadd.f32 %v7962_v5, %v7961_v17 }
0x20cd   :  { %7964 = vadd.xlane.f32.xlu0 %v7963_v61 }
0x20d1   :  { %521 = vadd.xlane.f32.xlu0 %v520_v56 }
0x215a   :  { %v7965_v12 = vpop.xlane.xlu0 %7964 }
0x215b   :  { %11913 = vrsqrt.f32 %v7965_v12  ;;  %vm7968_vm5 = vcmp.eq.f32.partialorder %v7965_v12, inf  ;;  %v7971_v21 = vand.u32 2147483648, %v7965_v12  ;;  %vm7970_vm6 = vcmp.eq.f32.partialorder %v7965_v12, 0.0 }
0x2165   :  { %v11914_v50 = vpop.eup %11913 }
0x2166   :  { %v7967_v34 = vmul.f32 %v11914_v50, %v7965_v12 }
0x2168   :  { %v7969_v9 = vsel %vm7968_vm5, %v7965_v12, %v7967_v34 }
0x2169   :  { %v7972_v11 = vsel %vm7970_vm6, %v7971_v21, %v7969_v9 }
0x216a   :  { %v7973_v8 = vadd.f32 1e-10, %v7972_v11 }
0x216c   :  { %11915 = vrcp.f32 %v7973_v8 }
0x2176   :  { %v11916_v43 = vpop.eup %11915 }
0x2177   :  { %v7975_v6 = vmul.f32 0.1, %v11916_v43 }
0x2179   :  { %v7976_v41 = vmul.f32 %v7975_v6, %v7723_v29  ;;  %v7977_v48 = vmul.f32 %v7975_v6, %v7725_v47  ;;  %v7978_v20 = vmul.f32 %v7975_v6, %v7794_v31  ;;  %v7979_v17 = vmul.f32 %v7975_v6, %v7796_v57 }
0x217a   :  { %v7980_v5 = vmul.f32 %v7975_v6, %v7865_v39  ;;  %v7981_v61 = vmul.f32 %v7975_v6, %v7867_v27  ;;  %v7982_v46 = vmul.f32 %v7975_v6, %v7936_v40  ;;  %v7983_v16 = vmul.f32 %v7975_v6, %v7938_v58 }
0x217b   :  { %v7992_v56 = vcombine.low %v7976_v41, %v7977_v48  ;;  %v7993_v14 = vcombine.low %v7978_v20, %v7979_v17 }
0x217c   :  { %v8009_v50 = vcombine.low %v7980_v5, %v7981_v61  ;;  %v8010_v33 = vcombine.low %v7982_v46, %v7983_v16 }
0x217d   :  { %v8000_v34 = vrot.slane %v7992_v56, %v12213_v19  ;;  %v8007_v12 = vrot.slane %v7993_v14, %v12213_v19 }
0x217e   :  { %v8017_v21 = vrot.slane %v8009_v50, %v12213_v19  ;;  %v8024_v9 = vrot.slane %v8010_v33, %v12213_v19 }
0x217f   :  { %v8008_v29 = vcombine.low %v8000_v34, %v8007_v12 }
0x2180   :  { %v8025_v47 = vcombine.low %v8017_v21, %v8024_v9 }
0x2181   :  { %v8028_v31 = vadd.f32 %v8008_v29, %v14003_v7 }
0x2182   :  { %v8029_v57 = vadd.f32 %v8025_v47, %v14011_v3 }
0x2183   :  { %v8030_v39 = vsub.f32 %v8028_v31, %v14000_v24 }
0x2184   :  { %v8031_v40 = vsub.f32 %v8029_v57, %v14008_v32 }
0x2185   :  { %v8032_v27 = vmul.f32 %v8030_v39, %v8030_v39 }
0x2186   :  { %v8033_v58 = vmul.f32 %v8031_v40, %v8031_v40 }
0x2187   :  { %v8036_v11 = vcombine.high %v8032_v27, %v8032_v27  ;;  %v8043_v8 = vrot.slane %v8032_v27, %v12213_v19 }
0x2188   :  { %v8053_v6 = vcombine.high %v8033_v58, %v8033_v58  ;;  %v8060_v41 = vrot.slane %v8033_v58, %v12213_v19 }
0x2189   :  { %v8050_v14 = vrot.slane %v8036_v11, %v12213_v19  ;;  %v8051_v43 = vcombine.high %v8043_v8, %v8043_v8  ;;  %v8078_v7 = vsel %vm820_vm1, %v8043_v8, 0.0 }
0x218a   :  { %v8067_v5 = vrot.slane %v8053_v6, %v12213_v19  ;;  %v8068_v61 = vcombine.high %v8060_v41, %v8060_v41  ;;  %v8085_v56 = vsel %vm820_vm1, %v8060_v41, 0.0 }
0x218b   :  { %v8052_v33 = vcombine.high %v8050_v14, %v8050_v14  ;;  %v8079_v3 = vsel %vm820_vm1, %v8051_v43, 0.0  ;;  %v8081_v20 = vsel %vm820_vm1, %v8050_v14, 0.0 }
0x218c   :  { %v8080_v48 = vadd.f32 %v8079_v3, %v8078_v7  ;;  %v8069_v34 = vcombine.high %v8067_v5, %v8067_v5  ;;  %v8087_v12 = vsel %vm820_vm1, %v8068_v61, 0.0  ;;  %v8089_v9 = vsel %vm820_vm1, %v8067_v5, 0.0 }
0x218d   :  { %v8083_v46 = vsel %vm820_vm1, %v8052_v33, 0.0 }
0x218e   :  { %v8082_v17 = vadd.f32 %v8081_v20, %v8080_v48  ;;  %v8091_v47 = vsel %vm820_vm1, %v8069_v34, 0.0 }
0x2190   :  { %v8084_v16 = vadd.f32 %v8083_v46, %v8082_v17 }
0x2192   :  { %v8086_v50 = vadd.f32 %v8085_v56, %v8084_v16 }
0x2194   :  { %v8088_v21 = vadd.f32 %v8087_v12, %v8086_v50  ;;  %v15037_v50 = vld [vmem:[#allocation38_spill] sm:$0xff]  ;;  %v15038_v12 = vld [vmem:[#allocation49_spill] sm:$0xff] }
0x2196   :  { %v8090_v29 = vadd.f32 %v8089_v9, %v8088_v21  ;;  %v15039_v9 = vld [vmem:[#allocation53_spill] sm:$0xff] }
0x2198   :  { %v8092_v31 = vadd.f32 %v8091_v47, %v8090_v29  ;;  %v15040_v47 = vld [vmem:[#allocation54_spill] sm:$0xff] }
0x219a   :  { %8093 = vadd.xlane.f32.xlu1 %v8092_v31 }
0x2227   :  { %v8094_v57 = vpop.xlane.xlu1 %8093 }
0x2228   :  { %11917 = vrsqrt.f32 %v8094_v57  ;;  %vm8097_vm7 = vcmp.eq.f32.partialorder %v8094_v57, inf  ;;  %v8100_v11 = vand.u32 2147483648, %v8094_v57  ;;  %vm8099_vm8 = vcmp.eq.f32.partialorder %v8094_v57, 0.0 }
0x2232   :  { %v11918_v27 = vpop.eup %11917 }
0x2233   :  { %v8096_v58 = vmul.f32 %v11918_v27, %v8094_v57 }
0x2235   :  { %v8098_v8 = vsel %vm8097_vm7, %v8094_v57, %v8096_v58  ;;  %v15041_v57 = vld [vmem:[#allocation56_spill] sm:$0xff] }
0x2236   :  { %v8101_v14 = vsel %vm8099_vm8, %v8100_v11, %v8098_v8 }
0x2237   :  { %v8103_v43 = vadd.f32 1e-07, %v8101_v14  ;;  %vm8102_vm9 = vcmp.gt.f32.partialorder %v8101_v14, 0.1 }
0x2239   :  { %11919 = vrcp.f32 %v8103_v43  ;;  %v15042_v43 = vld [vmem:[#allocation81_spill] sm:$0xff] }
0x2243   :  { %v11920_v6 = vpop.eup %11919 }
0x2244   :  { %v8105_v33 = vmul.f32 0.1, %v11920_v6 }
0x2246   :  { %v8106_v41 = vsel %vm8102_vm9, %v8105_v33, 1.0 }
0x2247   :  { %v8114_v7 = vrot.slane %v8106_v41, %v12864_v53 }
0x2249   :  { %v8116_v3 = vmul.f32 %v8114_v7, %v8030_v39  ;;  %v8117_v48 = vmul.f32 %v8114_v7, %v8031_v40 }
0x224b   :  { %v8118_v20 = vadd.f32 %v14000_v24, %v8116_v3  ;;  %v8119_v17 = vadd.f32 %v14008_v32, %v8117_v48 }
0x224d   :  { %v14158_v5 = vrot.slane %v8118_v20, %v12213_v19  ;;  %v8122_v61 = vcombine.high %v8118_v20, %v8118_v20  ;;  %v8139_v46 = vcombine.high %v8119_v17, %v8119_v17  ;;  %v14161_v16 = vrot.slane %v8119_v17, %v12213_v19 }
0x224f   :  { %v14165_v56 = vcombine.high %v14158_v5, %v14158_v5  ;;  %v14168_v53 = vrot.slane %v8122_v61, %v12213_v19  ;;  %v14171_v39 = vrot.slane %v8139_v46, %v12213_v19  ;;  %v14181_v32 = vcombine.high %v14161_v16, %v14161_v16 }
0x2251   :  { %8228 = vmatprep.mubr.f32.mxu0 %v14165_v56  ;;  %v14176_v24 = vcombine.high %v14168_v53, %v14168_v53  ;;  %v14189_v40 = vcombine.high %v14171_v39, %v14171_v39 }
0x2252   :  { %8229 = vmatmul.mubr.f32.vlgmr.msra.gmra.mrb[80].mxu0 %v14158_v5 }
0x2253   :  { %11774 = vmatpush3.bf16.msra.mxu0 %v12354_v30  ;;  %8298 = vmatprep.mubr.f32.mxu1 %v14176_v24 }
0x2254   :  { %8368 = vmatprep.mubr.f32.mxu0 %v14181_v32  ;;  %8299 = vmatmul.mubr.f32.vlgmr.msra.gmra.mrb[80].mxu1 %v14168_v53 }
0x2255   :  { %11806 = vmatpush3.bf16.msra.mxu1 %v12358_v35  ;;  %11776 = vmatprep.subr.bf16.mxu0 %v12360_v36 }
0x2256   :  { %8438 = vmatprep.mubr.f32.mxu1 %v14189_v40  ;;  %11808 = vmatprep.subr.bf16.mxu1 %v12372_v44 }
0x2257   :  { %11778 = vmatpush3.bf16.msra.mxu0 %v12392_v60 }
0x2258   :  { %11780 = vmatprep.subr.bf16.mxu0 %v12398_v63 }
0x2259   :  { %11810 = vmatpush3.bf16.msra.mxu1 %v12396_v62  ;;  %v15030_v62 = vld [vmem:[#allocation47_spill] sm:$0xff] }
0x225a   :  { %11812 = vmatprep.subr.bf16.mxu1 %v14558_v28 }
0x225b   :  { %11782 = vmatpush3.bf16.msra.mxu0 %v14559_v15 }
0x225c   :  { %11784 = vmatprep.subr.bf16.mxu0 %v14560_v18 }
0x225d   :  { %11814 = vmatpush3.bf16.msra.mxu1 %v14561_v13 }
0x225e   :  { %11816 = vmatprep.subr.bf16.mxu1 %v14562_v59 }
0x225f   :  { %11786 = vmatpush3.bf16.msra.mxu0 %v14563_v55 }
0x2260   :  { %11788 = vmatprep.subr.bf16.mxu0 %v14564_v45 }
0x2261   :  { %11818 = vmatpush3.bf16.msra.mxu1 %v14565_v23 }
0x2262   :  { %11820 = vmatprep.subr.bf16.mxu1 %v14566_v54 }
0x2263   :  { %11790 = vmatpush3.bf16.msra.mxu0 %v14567_v42 }
0x2264   :  { %11792 = vmatprep.subr.bf16.mxu0 %v14568_v10  ;;  %v15031_v10 = vld [vmem:[#allocation48_spill] sm:$0xff] }
0x2265   :  { %11822 = vmatpush3.bf16.msra.mxu1 %v14609_v1 }
0x2266   :  { %11824 = vmatprep.subr.bf16.mxu1 %v14610_v51 }
0x2267   :  { %11794 = vmatpush3.bf16.msra.mxu0 %v14611_v25 }
0x2268   :  { %11796 = vmatprep.subr.bf16.mxu0 %v14612_v2  ;;  %v522_v2 = vpop.xlane.xlu0 %521 }
0x2269   :  { %11826 = vmatpush3.bf16.msra.mxu1 %v14613_v49 }
0x226a   :  { %11828 = vmatprep.subr.bf16.mxu1 %v14614_v37 }
0x226b   :  { %11798 = vmatpush3.bf16.msra.mxu0 %v14615_v4  ;;  %v15034_v4 = vld [vmem:[#allocation31_spill] sm:$0xff] }
0x226c   :  { %11800 = vmatprep.subr.bf16.mxu0 %v14616_v38 }
0x226d   :  { %11830 = vmatpush3.bf16.msra.mxu1 %v14660_v26  ;;  %v15035_v26 = vld [vmem:[#allocation33_spill] sm:$0xff] }
0x226e   :  { %11832 = vmatprep.subr.bf16.mxu1 %v14661_v22 }
0x226f   :  { %11802 = vmatpush3.bf16.msra.mxu0 %v14662_v0  ;;  %v15036_v0 = vld [vmem:[#allocation34_spill] sm:$0xff] }
0x2271   :  { %11834 = vmatpush3.bf16.msra.mxu1 %v14976_v52 }
0x2272   :  { %8369 = vmatmul.mubr.f32.vlgmr.msra.gmra.mrb[82].mxu0 %v14161_v16 }
0x2274   :  { %8439 = vmatmul.mubr.f32.vlgmr.msra.gmra.mrb[82].mxu1 %v14171_v39 }
0x2325   :  { %v9999_v30 = vpop.f32.mrb[80].mxu0 }
0x2326   :  { %v10000_v35 = vpop.f32.mrb[81].mxu0 }
0x2327   :  { %v10001_v36 = vadd.f32 %v10000_v35, %v9999_v30  ;;  %v10034_v44 = vpop.f32.mrb[80].mxu1 }
0x2328   :  { %v10035_v60 = vpop.f32.mrb[81].mxu1 }
0x2329   :  { %v8231_v63 = vadd.f32 %v15030_v62, %v10001_v36  ;;  %v10036_v28 = vadd.f32 %v10035_v60, %v10034_v44 }
0x232b   :  { %v8301_v15 = vadd.f32 %v10036_v28, %v8231_v63 }
0x2345   :  { %v10069_v18 = vpop.f32.mrb[82].mxu0 }
0x2346   :  { %v10070_v13 = vpop.f32.mrb[83].mxu0 }
0x2347   :  { %v10071_v59 = vadd.f32 %v10070_v13, %v10069_v18  ;;  %v10104_v55 = vpop.f32.mrb[82].mxu1 }
0x2348   :  { %v10105_v45 = vpop.f32.mrb[83].mxu1 }
0x2349   :  { %v8371_v23 = vadd.f32 %v10071_v59, %v8301_v15  ;;  %v10106_v54 = vadd.f32 %v10105_v45, %v10104_v55 }
0x234b   :  { %v8441_v42 = vadd.f32 %v10106_v54, %v8371_v23 }
0x234d   :  { %v8444_v1 = vsub.f32 %v8441_v42, %v15031_v10 }
0x234f   :  { %v8445_v51 = vmul.f32 %v8444_v1, %v8444_v1 }
0x2351   :  { %v8446_v25 = vsel %vm519_vm0, %v8445_v51, 0.0 }
0x2352   :  { %8447 = vadd.xlane.f32.xlu1 %v8446_v25 }
0x23df   :  { %v8448_v49 = vpop.xlane.xlu1 %8447 }
0x23e0   :  { %vm14226_vm1 = vcmp.lt.f32.partialorder %v522_v2, %v8448_v49 }
0x23e1   :  { %v8452_v38 = vsel %vm14226_vm1, %v14158_v5, %v15034_v4  ;;  %v8453_v22 = vsel %vm14226_vm1, %v14165_v56, %v15035_v26  ;;  %v8454_v52 = vsel %vm14226_vm1, %v14168_v53, %v15036_v0  ;;  %v8455_v34 = vsel %vm14226_vm1, %v14176_v24, %v15037_v50 }
0x23e2   :  { %v8456_v21 = vsel %vm14226_vm1, %v14161_v16, %v15038_v12  ;;  %v8457_v29 = vsel %vm14226_vm1, %v14181_v32, %v15039_v9  ;;  %v8458_v31 = vsel %vm14226_vm1, %v14171_v39, %v15040_v47  ;;  %v8459_v27 = vsel %vm14226_vm1, %v14189_v40, %v15041_v57 }
0x23e3   :  { %v8468_v58 = vcombine.low %v8452_v38, %v8453_v22  ;;  %v8469_v11 = vcombine.low %v8454_v52, %v8455_v34  ;;  %v8485_v8 = vcombine.low %v8456_v21, %v8457_v29  ;;  %v8486_v14 = vcombine.low %v8458_v31, %v8459_v27 }
0x23e4   :  { %v8506_v6 = vsel %vm14226_vm1, %v8441_v42, %v15042_v43 }
0x23e5   :  { %v8476_v33 = vrot.slane %v8468_v58, %v12213_v19  ;;  %v8483_v41 = vrot.slane %v8469_v11, %v12213_v19  ;;  %v8493_v7 = vrot.slane %v8485_v8, %v12213_v19  ;;  %v8500_v3 = vrot.slane %v8486_v14, %v12213_v19  ;;  %8507 = vst.msk [vmem:[#allocation2] sm:$0x3] %vm519_vm0, %v8506_v6 }
0x23e6   :  { %11946 = shalt.err (!%p11943_p4)
}
0x23e7   :  { %s11947_s13 = scalar_lea.hbm %s14294_s6, 32 }
0x23e8   :  { %p11948_p5 = scmp.ne.s32.totalorder %s14294_s6, %s11947_s13  ;;  %p11951_p6 = scmp.lt.u32.totalorder %s11947_s13, %s14294_s6 }
0x23ea   :  { %p11953_p7 = pnand %p11951_p6, %p11948_p5 }
0x23ec   :  { %11956 = shalt.err (!%p11953_p7)
}
0x23ed   :  { %8519 = dma.vmem_to_hbm [thread:$0]  %s8517_s4, 32, %s14294_s6, [#allocation3]   ;;  %v8484_v19 = vcombine.low %v8476_v33, %v8483_v41  ;;  %v8501_v48 = vcombine.low %v8493_v7, %v8500_v3 }
0x23ef   :  { %8504 = vst [vmem:[%s14293_s5] sm:$0xff] %v8484_v19  ;;  %8505 = vst [vmem:[%s14293_s5 + $0x8] sm:$0xff] %v8501_v48 }
0x23f0   :  { %11957 = dma.done.wait [#allocation3], 32  }
0x23f1   :  { %11958 = vsyncadd [#allocation3], 4294967264 }
0x23f2   :  { %8525 = vsyncpa [#allocation3], 1 }

</bundles_post_ra>
